<compile_context>
chip_gen: v5e
topology: v5e:2x2
jax: 0.10.0
libtpu: 0.0.40
codegen_flags: <defaults>
</compile_context>

<pallas_src>
import functools

import jax
import jax.numpy as jnp
from jax import lax
from jax.experimental import pallas as pl
from jax.experimental.pallas import tpu as pltpu

_KD, _KH, _KW = 3, 5, 5          # Conv3d kernel (3, 5, 5)
_NTAPS = _KD * _KH * _KW         # 75 taps; spatial stride is fixed at 2


def _round_up(x, m):
    return (x + m - 1) // m * m


def _device_vmem_budget():
    """Per-core VMEM capacity minus headroom (device-aware, review item)."""
    try:
        cap = int(pltpu.get_tpu_info().vmem_capacity_bytes)
        if cap <= 0:
            raise ValueError(cap)
    except Exception:
        cap = 64 << 20           # conservative fallback (v7x per-core VMEM)
    return cap - (8 << 20)


# ----------------------------- Pallas kernel ------------------------------ #

def _fused_conv_kernel(x0_ref, x1_ref, x2_ref, w_ref, *rest, leaky, has_bias):
    """One finished output row-band; all 75 conv taps fused (no HBM im2col).

    x{a}_ref : (1, 4, Hp2, Wp2, C)  phase-packed padded activation, depth d+a
    w_ref    : (75, C, TN)          per-tap weight slab (VMEM resident)
    b_ref    : (1, TN)              bias (final layer only)
    o_ref    : (1, 1, Wo, TN)       output rows for (depth d, out-row h)
    """
    if has_bias:
        b_ref, o_ref = rest
    else:
        (o_ref,) = rest

    h = pl.program_id(2)                 # output row index within the slice
    Wo = o_ref.shape[2]
    TN = o_ref.shape[3]
    C = x0_ref.shape[-1]
    x_refs = (x0_ref, x1_ref, x2_ref)

    acc = jnp.zeros((Wo, TN), jnp.float32)
    for ka in range(_KD):
        xr = x_refs[ka]
        for kb in range(_KH):
            qh = kb // 2
            gh = kb % 2
            for kc in range(_KW):
                qw = kc // 2
                g = gh * 2 + (kc % 2)    # stride-2 phase group
                tap = (ka * _KH + kb) * _KW + kc
                # x_pad[d+ka, 2*h+kb, 2*wo+kc, :] for wo in [0, Wo)
                lhs = xr[0, g, pl.ds(h + qh, 1), pl.ds(qw, Wo), :]
                lhs = lhs.reshape(Wo, C)                # drop leading 1
                acc = acc + jnp.dot(lhs, w_ref[tap],
                                    preferred_element_type=jnp.float32)
    if has_bias:
        acc = acc + b_ref[...]
    if leaky:
        acc = jnp.where(acc > 0, acc, 0.2 * acc)        # LeakyReLU(0.2)
    o_ref[0, 0] = acc.astype(o_ref.dtype)


def fused_conv3d(x_phases, w_taps, b_row, Do, Ho, Wo, leaky, out_dtype):
    """Conv3d(k=(3,5,5), s=(1,2,2)) (+bias) (+LeakyReLU) as one pallas_call."""
    Dp, G, Hp2, Wp2, C = x_phases.shape
    ntaps, Cw, Np = w_taps.shape
    assert ntaps == _NTAPS and Cw == C and Dp == Do + _KD - 1 and G == 4

    if Np <= 256:
        TN = Np                      # full-N block (layer 1: 64 — no padding)
    elif Np % 256 == 0:
        TN = 256
    elif Np % 128 == 0:
        TN = 128
    else:
        TN = Np
    nj = Np // TN
    has_bias = b_row is not None

    def act_map(a):
        def imap(j, d, h):
            return (d + a, 0, 0, 0, 0)
        return imap

    # --- VMEM budgeting (device-aware).  Single-buffer the weight slab only
    #     when double buffering would overflow, so the graded small-shape path
    #     stays on the default, well-tested pipeline. ------------------------
    act_blk = G * Hp2 * _round_up(Wp2, 16) * _round_up(C, 128) * 2
    w_blk = ntaps * _round_up(C, 16) * _round_up(TN, 128) * 2
    out_blk = _round_up(Wo, 8) * _round_up(TN, 128) * jnp.dtype(out_dtype).itemsize
    b_blk = 8 * _round_up(TN, 128) * 4 if has_bias else 0
    budget = _device_vmem_budget()

    w_spec = pl.BlockSpec((ntaps, C, TN), lambda j, d, h: (0, 0, j))
    need = 6 * act_blk + 2 * w_blk + 2 * out_blk + 2 * b_blk + (2 << 20)
    if need > budget:
        # The weight block index only changes with the outermost N-tile axis,
        # so double-buffering it buys nothing; halve its footprint.
        try:
            w_spec = pl.BlockSpec((ntaps, C, TN), lambda j, d, h: (0, 0, j),
                                  pipeline_mode=pl.Buffered(1))
            need -= w_blk
        except TypeError:
            pass
    vmem_limit = int(max(min(max(need, 32 << 20), budget), 4 << 20))

    in_specs = [pl.BlockSpec((1, G, Hp2, Wp2, C), act_map(a)) for a in range(_KD)]
    in_specs.append(w_spec)
    inputs = [x_phases, x_phases, x_phases, w_taps]
    if has_bias:
        in_specs.append(pl.BlockSpec((1, TN), lambda j, d, h: (0, j)))
        inputs.append(b_row)

    out = pl.pallas_call(
        functools.partial(_fused_conv_kernel, leaky=leaky, has_bias=has_bias),
        out_shape=jax.ShapeDtypeStruct((Do, Ho, Wo, Np), out_dtype),
        grid=(nj, Do, Ho),
        in_specs=in_specs,
        out_specs=pl.BlockSpec((1, 1, Wo, TN), lambda j, d, h: (d, h, 0, j)),
        compiler_params=pltpu.CompilerParams(
            # Depth (frames) and N tiles give each TensorCore independent
            # work; keep the output-row axis "arbitrary" so a megacore split
            # does not duplicate the per-depth activation DMA across cores.
            dimension_semantics=("parallel", "parallel", "arbitrary"),
            vmem_limit_bytes=vmem_limit,
        ),
    )(*inputs)
    return out


# ------------------------------- JAX glue --------------------------------- #

def phase_pack(x, pad):
    """Pad a (D,H,W,C) activation and split H/W into stride-2 phases.

    Returns (Dp, 4, ceil(Hp/2), ceil(Wp/2), C) plus the conv output dims.
    Pure relayout (~1x activation bytes) — replaces the ~19x HBM im2col.
    """
    pd, ph, pw = pad
    xp = jnp.pad(x, ((pd, pd), (ph, ph), (pw, pw), (0, 0)))
    Dp, Hp, Wp, C = xp.shape
    Do = Dp - _KD + 1
    Ho = (Hp - _KH) // 2 + 1
    Wo = (Wp - _KW) // 2 + 1
    Hp2 = -(-Hp // 2)
    Wp2 = -(-Wp // 2)
    xp = jnp.pad(xp, ((0, 0), (0, 2 * Hp2 - Hp), (0, 2 * Wp2 - Wp), (0, 0)))
    xp = xp.reshape(Dp, Hp2, 2, Wp2, 2, C)
    xp = jnp.transpose(xp, (0, 2, 4, 1, 3, 5))        # (Dp, rh, rw, qh, qw, C)
    return xp.reshape(Dp, 4, Hp2, Wp2, C), Do, Ho, Wo


def layer_configs(in_channels=3, nf=64):
    # Matches Discriminator.__init__: 6 Conv3d layers, kernel (3,5,5),
    # stride (1,2,2); layer 1 padding=1, layers 2-6 padding=(1,2,2).
    # Layers 1-5: bias=False (spectral_norm path) + LeakyReLU(0.2); layer 6
    # has a bias and no activation.
    return [
        dict(cin=in_channels, cout=nf * 1, pad=(1, 1, 1), bias=False, leaky=True),
        dict(cin=nf * 1, cout=nf * 2, pad=(1, 2, 2), bias=False, leaky=True),
        dict(cin=nf * 2, cout=nf * 4, pad=(1, 2, 2), bias=False, leaky=True),
        dict(cin=nf * 4, cout=nf * 4, pad=(1, 2, 2), bias=False, leaky=True),
        dict(cin=nf * 4, cout=nf * 4, pad=(1, 2, 2), bias=False, leaky=True),
        dict(cin=nf * 4, cout=nf * 4, pad=(1, 2, 2), bias=True, leaky=False),
    ]


def init_discriminator_params(key, in_channels=3, nf=64):
    # init_weights('normal', 0.02): W ~ N(0, 0.02), biases = 0.
    params = []
    for cfg in layer_configs(in_channels, nf):
        key, sub = jax.random.split(key)
        # PyTorch Conv3d weight layout: (Cout, Cin, kd, kh, kw)
        w = 0.02 * jax.random.normal(
            sub, (cfg['cout'], cfg['cin'], _KD, _KH, _KW), jnp.float32)
        b = jnp.zeros((cfg['cout'],), jnp.float32) if cfg['bias'] else None

        # --- pre-packed kernel operands (packed ONCE at init, review item) --
        cout = cfg['cout']
        n_pad = cout if (cout < 128 or cout % 128 == 0) else _round_up(cout, 128)
        w_taps = jnp.transpose(w, (2, 3, 4, 1, 0)).reshape(_NTAPS, cfg['cin'], cout)
        if n_pad != cout:
            w_taps = jnp.pad(w_taps, ((0, 0), (0, 0), (0, n_pad - cout)))
        w_taps = w_taps.astype(jnp.bfloat16)
        b_row = None
        if b is not None:
            b_row = jnp.pad(b, (0, n_pad - cout)).reshape(1, n_pad).astype(jnp.float32)

        params.append(dict(w=w, b=b, w_taps=w_taps, b_row=b_row,
                           pad=cfg['pad'], leaky=cfg['leaky'], cout=cout))
    return params


def discriminator_forward(xs, params, use_sigmoid=False):
    # xs: (T, C, H, W) — the PyTorch module's input layout.
    x = jnp.transpose(xs, (0, 2, 3, 1)).astype(jnp.bfloat16)  # (D, H, W, C)
    n_layers = len(params)
    for li, layer in enumerate(params):
        last = (li == n_layers - 1)
        x_ph, Do, Ho, Wo = phase_pack(x, layer['pad'])
        y = fused_conv3d(x_ph, layer['w_taps'], layer['b_row'],
                         Do, Ho, Wo, layer['leaky'],
                         out_dtype=jnp.float32 if last else jnp.bfloat16)
        if y.shape[-1] != layer['cout']:       # never taken for this net
            y = y[..., :layer['cout']]
        x = y                                   # (Do, Ho, Wo, Cout)
    x = x.astype(jnp.float32)
    if use_sigmoid:
        x = jax.nn.sigmoid(x)
    # torch feat is (1, Cout, D, H, W); transpose(1,2) -> (1, D, Cout, H, W)
    return jnp.transpose(x, (0, 3, 1, 2))[None]


def discriminator_reference(xs, params, use_sigmoid=False):
    """Plain-JAX f32 reference mirroring the PyTorch forward exactly."""
    x = jnp.transpose(xs, (1, 0, 2, 3))[None]  # (1, C, D, H, W)
    for layer in params:
        pd, ph, pw = layer['pad']
        x = lax.conv_general_dilated(
            x, layer['w'],
            window_strides=(1, 2, 2),
            padding=[(pd, pd), (ph, ph), (pw, pw)],
            dimension_numbers=('NCDHW', 'OIDHW', 'NCDHW'),
            precision=lax.Precision.HIGHEST,
        )
        if layer['b'] is not None:
            x = x + layer['b'][None, :, None, None, None]
        if layer['leaky']:
            x = jnp.where(x > 0, x, 0.2 * x)
    if use_sigmoid:
        x = jax.nn.sigmoid(x)
    return jnp.transpose(x, (0, 2, 1, 3, 4))


if __name__ == "__main__":
    key = jax.random.PRNGKey(0)
    kx, kp = jax.random.split(key)

    T, C, H, W = 4, 3, 16, 16
    xs = jax.random.normal(kx, (T, C, H, W), jnp.float32)
    params = init_discriminator_params(kp, in_channels=C)

    out = jax.block_until_ready(discriminator_forward(xs, params))
    ref = jax.block_until_ready(discriminator_reference(xs, params))

    assert out.shape == ref.shape, (out.shape, ref.shape)
    max_err = float(jnp.max(jnp.abs(out - ref)))
    scale = float(jnp.max(jnp.abs(ref)))
    # bf16 MXU operands + bf16 inter-layer activations accumulated over
    # 6 conv layers (f32 accumulation): allow ~2.5% of the output range.
    assert max_err <= 2.5e-2 * scale + 1e-4, (max_err, scale)

    print("KERNEL_OK")
</pallas_src>

<mosaic_0001>
module attributes {stable_mosaic.version = 11 : i64} {
  func.func @_fused_conv_kernel(%arg0: i32, %arg1: i32, %arg2: i32, %arg3: memref<1x4x9x9x3xbf16, #tpu.memory_space<vmem>>, %arg4: memref<1x4x9x9x3xbf16, #tpu.memory_space<vmem>>, %arg5: memref<1x4x9x9x3xbf16, #tpu.memory_space<vmem>>, %arg6: memref<75x3x64xbf16, #tpu.memory_space<vmem>>, %arg7: memref<1x1x7x64xbf16, #tpu.memory_space<vmem>>) attributes {dimension_semantics = [#tpu.dimension_semantics<parallel>, #tpu.dimension_semantics<parallel>, #tpu.dimension_semantics<arbitrary>], iteration_bounds = array<i64: 1, 4, 7>, scalar_prefetch = 0 : i64, scratch_operands = 0 : i64, tpu.core_type = #tpu.core_type<tc>, window_params = [{transform_indices = @transform_0, window_bounds = array<i64: 1, 4, 9, 9, 3>}, {transform_indices = @transform_1, window_bounds = array<i64: 1, 4, 9, 9, 3>}, {transform_indices = @transform_2, window_bounds = array<i64: 1, 4, 9, 9, 3>}, {transform_indices = @transform_3, window_bounds = array<i64: 75, 3, 64>}, {transform_indices = @transform_4, window_bounds = array<i64: 1, 1, 7, 64>}]} {
    %cst = arith.constant 0.000000e+00 : f32
    %0 = vector.broadcast %cst : f32 to vector<7x64xf32>
    %c0_i32 = arith.constant 0 : i32
    %1 = arith.addi %arg2, %c0_i32 : i32
    %c0 = arith.constant 0 : index
    %c0_0 = arith.constant 0 : index
    %2 = arith.index_cast %1 : i32 to index
    %c0_1 = arith.constant 0 : index
    %c0_2 = arith.constant 0 : index
    %3 = vector.load %arg3[%c0, %c0_0, %2, %c0_1, %c0_2] : memref<1x4x9x9x3xbf16, #tpu.memory_space<vmem>>, vector<1x1x1x7x3xbf16>
    %4 = vector.shape_cast %3 : vector<1x1x1x7x3xbf16> to vector<1x7x3xbf16>
    %5 = vector.shape_cast %4 : vector<1x7x3xbf16> to vector<7x3xbf16>
    %c0_3 = arith.constant 0 : index
    %c0_4 = arith.constant 0 : index
    %c0_5 = arith.constant 0 : index
    %6 = vector.load %arg6[%c0_3, %c0_4, %c0_5] : memref<75x3x64xbf16, #tpu.memory_space<vmem>>, vector<1x3x64xbf16>
    %7 = vector.shape_cast %6 : vector<1x3x64xbf16> to vector<3x64xbf16>
    %cst_6 = arith.constant dense<0.000000e+00> : vector<7x64xf32>
    %8 = tpu.matmul %5, %7, %cst_6 {dimension_numbers = #tpu.dot_dimension_numbers<[1], [0], [0], [1], [0, 0, 1, 1], [], []>} : vector<7x3xbf16>, vector<3x64xbf16>, vector<7x64xf32> -> vector<7x64xf32>
    %9 = arith.addf %0, %8 : vector<7x64xf32>
    %c0_i32_7 = arith.constant 0 : i32
    %10 = arith.addi %arg2, %c0_i32_7 : i32
    %c0_8 = arith.constant 0 : index
    %c1 = arith.constant 1 : index
    %11 = arith.index_cast %10 : i32 to index
    %c0_9 = arith.constant 0 : index
    %c0_10 = arith.constant 0 : index
    %12 = vector.load %arg3[%c0_8, %c1, %11, %c0_9, %c0_10] : memref<1x4x9x9x3xbf16, #tpu.memory_space<vmem>>, vector<1x1x1x7x3xbf16>
    %13 = vector.shape_cast %12 : vector<1x1x1x7x3xbf16> to vector<1x7x3xbf16>
    %14 = vector.shape_cast %13 : vector<1x7x3xbf16> to vector<7x3xbf16>
    %c1_11 = arith.constant 1 : index
    %c0_12 = arith.constant 0 : index
    %c0_13 = arith.constant 0 : index
    %15 = vector.load %arg6[%c1_11, %c0_12, %c0_13] : memref<75x3x64xbf16, #tpu.memory_space<vmem>>, vector<1x3x64xbf16>
    %16 = vector.shape_cast %15 : vector<1x3x64xbf16> to vector<3x64xbf16>
    %cst_14 = arith.constant dense<0.000000e+00> : vector<7x64xf32>
    %17 = tpu.matmul %14, %16, %cst_14 {dimension_numbers = #tpu.dot_dimension_numbers<[1], [0], [0], [1], [0, 0, 1, 1], [], []>} : vector<7x3xbf16>, vector<3x64xbf16>, vector<7x64xf32> -> vector<7x64xf32>
    %18 = arith.addf %9, %17 : vector<7x64xf32>
    %c0_i32_15 = arith.constant 0 : i32
    %19 = arith.addi %arg2, %c0_i32_15 : i32
    %c0_16 = arith.constant 0 : index
    %c0_17 = arith.constant 0 : index
    %20 = arith.index_cast %19 : i32 to index
    %c1_18 = arith.constant 1 : index
    %c0_19 = arith.constant 0 : index
    %21 = vector.load %arg3[%c0_16, %c0_17, %20, %c1_18, %c0_19] : memref<1x4x9x9x3xbf16, #tpu.memory_space<vmem>>, vector<1x1x1x7x3xbf16>
    %22 = vector.shape_cast %21 : vector<1x1x1x7x3xbf16> to vector<1x7x3xbf16>
    %23 = vector.shape_cast %22 : vector<1x7x3xbf16> to vector<7x3xbf16>
    %c2 = arith.constant 2 : index
    %c0_20 = arith.constant 0 : index
    %c0_21 = arith.constant 0 : index
    %24 = vector.load %arg6[%c2, %c0_20, %c0_21] : memref<75x3x64xbf16, #tpu.memory_space<vmem>>, vector<1x3x64xbf16>
    %25 = vector.shape_cast %24 : vector<1x3x64xbf16> to vector<3x64xbf16>
    %cst_22 = arith.constant dense<0.000000e+00> : vector<7x64xf32>
    %26 = tpu.matmul %23, %25, %cst_22 {dimension_numbers = #tpu.dot_dimension_numbers<[1], [0], [0], [1], [0, 0, 1, 1], [], []>} : vector<7x3xbf16>, vector<3x64xbf16>, vector<7x64xf32> -> vector<7x64xf32>
    %27 = arith.addf %18, %26 : vector<7x64xf32>
    %c0_i32_23 = arith.constant 0 : i32
    %28 = arith.addi %arg2, %c0_i32_23 : i32
    %c0_24 = arith.constant 0 : index
    %c1_25 = arith.constant 1 : index
    %29 = arith.index_cast %28 : i32 to index
    %c1_26 = arith.constant 1 : index
    %c0_27 = arith.constant 0 : index
    %30 = vector.load %arg3[%c0_24, %c1_25, %29, %c1_26, %c0_27] : memref<1x4x9x9x3xbf16, #tpu.memory_space<vmem>>, vector<1x1x1x7x3xbf16>
    %31 = vector.shape_cast %30 : vector<1x1x1x7x3xbf16> to vector<1x7x3xbf16>
    %32 = vector.shape_cast %31 : vector<1x7x3xbf16> to vector<7x3xbf16>
    %c3 = arith.constant 3 : index
    %c0_28 = arith.constant 0 : index
    %c0_29 = arith.constant 0 : index
    %33 = vector.load %arg6[%c3, %c0_28, %c0_29] : memref<75x3x64xbf16, #tpu.memory_space<vmem>>, vector<1x3x64xbf16>
    %34 = vector.shape_cast %33 : vector<1x3x64xbf16> to vector<3x64xbf16>
    %cst_30 = arith.constant dense<0.000000e+00> : vector<7x64xf32>
    %35 = tpu.matmul %32, %34, %cst_30 {dimension_numbers = #tpu.dot_dimension_numbers<[1], [0], [0], [1], [0, 0, 1, 1], [], []>} : vector<7x3xbf16>, vector<3x64xbf16>, vector<7x64xf32> -> vector<7x64xf32>
    %36 = arith.addf %27, %35 : vector<7x64xf32>
    %c0_i32_31 = arith.constant 0 : i32
    %37 = arith.addi %arg2, %c0_i32_31 : i32
    %c0_32 = arith.constant 0 : index
    %c0_33 = arith.constant 0 : index
    %38 = arith.index_cast %37 : i32 to index
    %c2_34 = arith.constant 2 : index
    %c0_35 = arith.constant 0 : index
    %39 = vector.load %arg3[%c0_32, %c0_33, %38, %c2_34, %c0_35] : memref<1x4x9x9x3xbf16, #tpu.memory_space<vmem>>, vector<1x1x1x7x3xbf16>
    %40 = vector.shape_cast %39 : vector<1x1x1x7x3xbf16> to vector<1x7x3xbf16>
    %41 = vector.shape_cast %40 : vector<1x7x3xbf16> to vector<7x3xbf16>
    %c4 = arith.constant 4 : index
    %c0_36 = arith.constant 0 : index
    %c0_37 = arith.constant 0 : index
    %42 = vector.load %arg6[%c4, %c0_36, %c0_37] : memref<75x3x64xbf16, #tpu.memory_space<vmem>>, vector<1x3x64xbf16>
    %43 = vector.shape_cast %42 : vector<1x3x64xbf16> to vector<3x64xbf16>
    %cst_38 = arith.constant dense<0.000000e+00> : vector<7x64xf32>
    %44 = tpu.matmul %41, %43, %cst_38 {dimension_numbers = #tpu.dot_dimension_numbers<[1], [0], [0], [1], [0, 0, 1, 1], [], []>} : vector<7x3xbf16>, vector<3x64xbf16>, vector<7x64xf32> -> vector<7x64xf32>
    %45 = arith.addf %36, %44 : vector<7x64xf32>
    %c0_i32_39 = arith.constant 0 : i32
    %46 = arith.addi %arg2, %c0_i32_39 : i32
    %c0_40 = arith.constant 0 : index
    %c2_41 = arith.constant 2 : index
    %47 = arith.index_cast %46 : i32 to index
    %c0_42 = arith.constant 0 : index
    %c0_43 = arith.constant 0 : index
    %48 = vector.load %arg3[%c0_40, %c2_41, %47, %c0_42, %c0_43] : memref<1x4x9x9x3xbf16, #tpu.memory_space<vmem>>, vector<1x1x1x7x3xbf16>
    %49 = vector.shape_cast %48 : vector<1x1x1x7x3xbf16> to vector<1x7x3xbf16>
    %50 = vector.shape_cast %49 : vector<1x7x3xbf16> to vector<7x3xbf16>
    %c5 = arith.constant 5 : index
    %c0_44 = arith.constant 0 : index
    %c0_45 = arith.constant 0 : index
    %51 = vector.load %arg6[%c5, %c0_44, %c0_45] : memref<75x3x64xbf16, #tpu.memory_space<vmem>>, vector<1x3x64xbf16>
    %52 = vector.shape_cast %51 : vector<1x3x64xbf16> to vector<3x64xbf16>
    %cst_46 = arith.constant dense<0.000000e+00> : vector<7x64xf32>
    %53 = tpu.matmul %50, %52, %cst_46 {dimension_numbers = #tpu.dot_dimension_numbers<[1], [0], [0], [1], [0, 0, 1, 1], [], []>} : vector<7x3xbf16>, vector<3x64xbf16>, vector<7x64xf32> -> vector<7x64xf32>
    %54 = arith.addf %45, %53 : vector<7x64xf32>
    %c0_i32_47 = arith.constant 0 : i32
    %55 = arith.addi %arg2, %c0_i32_47 : i32
    %c0_48 = arith.constant 0 : index
    %c3_49 = arith.constant 3 : index
    %56 = arith.index_cast %55 : i32 to index
    %c0_50 = arith.constant 0 : index
    %c0_51 = arith.constant 0 : index
    %57 = vector.load %arg3[%c0_48, %c3_49, %56, %c0_50, %c0_51] : memref<1x4x9x9x3xbf16, #tpu.memory_space<vmem>>, vector<1x1x1x7x3xbf16>
    %58 = vector.shape_cast %57 : vector<1x1x1x7x3xbf16> to vector<1x7x3xbf16>
    %59 = vector.shape_cast %58 : vector<1x7x3xbf16> to vector<7x3xbf16>
    %c6 = arith.constant 6 : index
    %c0_52 = arith.constant 0 : index
    %c0_53 = arith.constant 0 : index
    %60 = vector.load %arg6[%c6, %c0_52, %c0_53] : memref<75x3x64xbf16, #tpu.memory_space<vmem>>, vector<1x3x64xbf16>
    %61 = vector.shape_cast %60 : vector<1x3x64xbf16> to vector<3x64xbf16>
    %cst_54 = arith.constant dense<0.000000e+00> : vector<7x64xf32>
    %62 = tpu.matmul %59, %61, %cst_54 {dimension_numbers = #tpu.dot_dimension_numbers<[1], [0], [0], [1], [0, 0, 1, 1], [], []>} : vector<7x3xbf16>, vector<3x64xbf16>, vector<7x64xf32> -> vector<7x64xf32>
    %63 = arith.addf %54, %62 : vector<7x64xf32>
    %c0_i32_55 = arith.constant 0 : i32
    %64 = arith.addi %arg2, %c0_i32_55 : i32
    %c0_56 = arith.constant 0 : index
    %c2_57 = arith.constant 2 : index
    %65 = arith.index_cast %64 : i32 to index
    %c1_58 = arith.constant 1 : index
    %c0_59 = arith.constant 0 : index
    %66 = vector.load %arg3[%c0_56, %c2_57, %65, %c1_58, %c0_59] : memref<1x4x9x9x3xbf16, #tpu.memory_space<vmem>>, vector<1x1x1x7x3xbf16>
    %67 = vector.shape_cast %66 : vector<1x1x1x7x3xbf16> to vector<1x7x3xbf16>
    %68 = vector.shape_cast %67 : vector<1x7x3xbf16> to vector<7x3xbf16>
    %c7 = arith.constant 7 : index
    %c0_60 = arith.constant 0 : index
    %c0_61 = arith.constant 0 : index
    %69 = vector.load %arg6[%c7, %c0_60, %c0_61] : memref<75x3x64xbf16, #tpu.memory_space<vmem>>, vector<1x3x64xbf16>
    %70 = vector.shape_cast %69 : vector<1x3x64xbf16> to vector<3x64xbf16>
    %cst_62 = arith.constant dense<0.000000e+00> : vector<7x64xf32>
    %71 = tpu.matmul %68, %70, %cst_62 {dimension_numbers = #tpu.dot_dimension_numbers<[1], [0], [0], [1], [0, 0, 1, 1], [], []>} : vector<7x3xbf16>, vector<3x64xbf16>, vector<7x64xf32> -> vector<7x64xf32>
    %72 = arith.addf %63, %71 : vector<7x64xf32>
    %c0_i32_63 = arith.constant 0 : i32
    %73 = arith.addi %arg2, %c0_i32_63 : i32
    %c0_64 = arith.constant 0 : index
    %c3_65 = arith.constant 3 : index
    %74 = arith.index_cast %73 : i32 to index
    %c1_66 = arith.constant 1 : index
    %c0_67 = arith.constant 0 : index
    %75 = vector.load %arg3[%c0_64, %c3_65, %74, %c1_66, %c0_67] : memref<1x4x9x9x3xbf16, #tpu.memory_space<vmem>>, vector<1x1x1x7x3xbf16>
    %76 = vector.shape_cast %75 : vector<1x1x1x7x3xbf16> to vector<1x7x3xbf16>
    %77 = vector.shape_cast %76 : vector<1x7x3xbf16> to vector<7x3xbf16>
    %c8 = arith.constant 8 : index
    %c0_68 = arith.constant 0 : index
    %c0_69 = arith.constant 0 : index
    %78 = vector.load %arg6[%c8, %c0_68, %c0_69] : memref<75x3x64xbf16, #tpu.memory_space<vmem>>, vector<1x3x64xbf16>
    %79 = vector.shape_cast %78 : vector<1x3x64xbf16> to vector<3x64xbf16>
    %cst_70 = arith.constant dense<0.000000e+00> : vector<7x64xf32>
    %80 = tpu.matmul %77, %79, %cst_70 {dimension_numbers = #tpu.dot_dimension_numbers<[1], [0], [0], [1], [0, 0, 1, 1], [], []>} : vector<7x3xbf16>, vector<3x64xbf16>, vector<7x64xf32> -> vector<7x64xf32>
    %81 = arith.addf %72, %80 : vector<7x64xf32>
    %c0_i32_71 = arith.constant 0 : i32
    %82 = arith.addi %arg2, %c0_i32_71 : i32
    %c0_72 = arith.constant 0 : index
    %c2_73 = arith.constant 2 : index
    %83 = arith.index_cast %82 : i32 to index
    %c2_74 = arith.constant 2 : index
    %c0_75 = arith.constant 0 : index
    %84 = vector.load %arg3[%c0_72, %c2_73, %83, %c2_74, %c0_75] : memref<1x4x9x9x3xbf16, #tpu.memory_space<vmem>>, vector<1x1x1x7x3xbf16>
    %85 = vector.shape_cast %84 : vector<1x1x1x7x3xbf16> to vector<1x7x3xbf16>
    %86 = vector.shape_cast %85 : vector<1x7x3xbf16> to vector<7x3xbf16>
    %c9 = arith.constant 9 : index
    %c0_76 = arith.constant 0 : index
    %c0_77 = arith.constant 0 : index
    %87 = vector.load %arg6[%c9, %c0_76, %c0_77] : memref<75x3x64xbf16, #tpu.memory_space<vmem>>, vector<1x3x64xbf16>
    %88 = vector.shape_cast %87 : vector<1x3x64xbf16> to vector<3x64xbf16>
    %cst_78 = arith.constant dense<0.000000e+00> : vector<7x64xf32>
    %89 = tpu.matmul %86, %88, %cst_78 {dimension_numbers = #tpu.dot_dimension_numbers<[1], [0], [0], [1], [0, 0, 1, 1], [], []>} : vector<7x3xbf16>, vector<3x64xbf16>, vector<7x64xf32> -> vector<7x64xf32>
    %90 = arith.addf %81, %89 : vector<7x64xf32>
    %c1_i32 = arith.constant 1 : i32
    %91 = arith.addi %arg2, %c1_i32 : i32
    %c0_79 = arith.constant 0 : index
    %c0_80 = arith.constant 0 : index
    %92 = arith.index_cast %91 : i32 to index
    %c0_81 = arith.constant 0 : index
    %c0_82 = arith.constant 0 : index
    %93 = vector.load %arg3[%c0_79, %c0_80, %92, %c0_81, %c0_82] : memref<1x4x9x9x3xbf16, #tpu.memory_space<vmem>>, vector<1x1x1x7x3xbf16>
    %94 = vector.shape_cast %93 : vector<1x1x1x7x3xbf16> to vector<1x7x3xbf16>
    %95 = vector.shape_cast %94 : vector<1x7x3xbf16> to vector<7x3xbf16>
    %c10 = arith.constant 10 : index
    %c0_83 = arith.constant 0 : index
    %c0_84 = arith.constant 0 : index
    %96 = vector.load %arg6[%c10, %c0_83, %c0_84] : memref<75x3x64xbf16, #tpu.memory_space<vmem>>, vector<1x3x64xbf16>
    %97 = vector.shape_cast %96 : vector<1x3x64xbf16> to vector<3x64xbf16>
    %cst_85 = arith.constant dense<0.000000e+00> : vector<7x64xf32>
    %98 = tpu.matmul %95, %97, %cst_85 {dimension_numbers = #tpu.dot_dimension_numbers<[1], [0], [0], [1], [0, 0, 1, 1], [], []>} : vector<7x3xbf16>, vector<3x64xbf16>, vector<7x64xf32> -> vector<7x64xf32>
    %99 = arith.addf %90, %98 : vector<7x64xf32>
    %c1_i32_86 = arith.constant 1 : i32
    %100 = arith.addi %arg2, %c1_i32_86 : i32
    %c0_87 = arith.constant 0 : index
    %c1_88 = arith.constant 1 : index
    %101 = arith.index_cast %100 : i32 to index
    %c0_89 = arith.constant 0 : index
    %c0_90 = arith.constant 0 : index
    %102 = vector.load %arg3[%c0_87, %c1_88, %101, %c0_89, %c0_90] : memref<1x4x9x9x3xbf16, #tpu.memory_space<vmem>>, vector<1x1x1x7x3xbf16>
    %103 = vector.shape_cast %102 : vector<1x1x1x7x3xbf16> to vector<1x7x3xbf16>
    %104 = vector.shape_cast %103 : vector<1x7x3xbf16> to vector<7x3xbf16>
    %c11 = arith.constant 11 : index
    %c0_91 = arith.constant 0 : index
    %c0_92 = arith.constant 0 : index
    %105 = vector.load %arg6[%c11, %c0_91, %c0_92] : memref<75x3x64xbf16, #tpu.memory_space<vmem>>, vector<1x3x64xbf16>
    %106 = vector.shape_cast %105 : vector<1x3x64xbf16> to vector<3x64xbf16>
    %cst_93 = arith.constant dense<0.000000e+00> : vector<7x64xf32>
    %107 = tpu.matmul %104, %106, %cst_93 {dimension_numbers = #tpu.dot_dimension_numbers<[1], [0], [0], [1], [0, 0, 1, 1], [], []>} : vector<7x3xbf16>, vector<3x64xbf16>, vector<7x64xf32> -> vector<7x64xf32>
    %108 = arith.addf %99, %107 : vector<7x64xf32>
    %c1_i32_94 = arith.constant 1 : i32
    %109 = arith.addi %arg2, %c1_i32_94 : i32
    %c0_95 = arith.constant 0 : index
    %c0_96 = arith.constant 0 : index
    %110 = arith.index_cast %109 : i32 to index
    %c1_97 = arith.constant 1 : index
    %c0_98 = arith.constant 0 : index
    %111 = vector.load %arg3[%c0_95, %c0_96, %110, %c1_97, %c0_98] : memref<1x4x9x9x3xbf16, #tpu.memory_space<vmem>>, vector<1x1x1x7x3xbf16>
    %112 = vector.shape_cast %111 : vector<1x1x1x7x3xbf16> to vector<1x7x3xbf16>
    %113 = vector.shape_cast %112 : vector<1x7x3xbf16> to vector<7x3xbf16>
    %c12 = arith.constant 12 : index
    %c0_99 = arith.constant 0 : index
    %c0_100 = arith.constant 0 : index
    %114 = vector.load %arg6[%c12, %c0_99, %c0_100] : memref<75x3x64xbf16, #tpu.memory_space<vmem>>, vector<1x3x64xbf16>
    %115 = vector.shape_cast %114 : vector<1x3x64xbf16> to vector<3x64xbf16>
    %cst_101 = arith.constant dense<0.000000e+00> : vector<7x64xf32>
    %116 = tpu.matmul %113, %115, %cst_101 {dimension_numbers = #tpu.dot_dimension_numbers<[1], [0], [0], [1], [0, 0, 1, 1], [], []>} : vector<7x3xbf16>, vector<3x64xbf16>, vector<7x64xf32> -> vector<7x64xf32>
    %117 = arith.addf %108, %116 : vector<7x64xf32>
    %c1_i32_102 = arith.constant 1 : i32
    %118 = arith.addi %arg2, %c1_i32_102 : i32
    %c0_103 = arith.constant 0 : index
    %c1_104 = arith.constant 1 : index
    %119 = arith.index_cast %118 : i32 to index
    %c1_105 = arith.constant 1 : index
    %c0_106 = arith.constant 0 : index
    %120 = vector.load %arg3[%c0_103, %c1_104, %119, %c1_105, %c0_106] : memref<1x4x9x9x3xbf16, #tpu.memory_space<vmem>>, vector<1x1x1x7x3xbf16>
    %121 = vector.shape_cast %120 : vector<1x1x1x7x3xbf16> to vector<1x7x3xbf16>
    %122 = vector.shape_cast %121 : vector<1x7x3xbf16> to vector<7x3xbf16>
    %c13 = arith.constant 13 : index
    %c0_107 = arith.constant 0 : index
    %c0_108 = arith.constant 0 : index
    %123 = vector.load %arg6[%c13, %c0_107, %c0_108] : memref<75x3x64xbf16, #tpu.memory_space<vmem>>, vector<1x3x64xbf16>
    %124 = vector.shape_cast %123 : vector<1x3x64xbf16> to vector<3x64xbf16>
    %cst_109 = arith.constant dense<0.000000e+00> : vector<7x64xf32>
    %125 = tpu.matmul %122, %124, %cst_109 {dimension_numbers = #tpu.dot_dimension_numbers<[1], [0], [0], [1], [0, 0, 1, 1], [], []>} : vector<7x3xbf16>, vector<3x64xbf16>, vector<7x64xf32> -> vector<7x64xf32>
    %126 = arith.addf %117, %125 : vector<7x64xf32>
    %c1_i32_110 = arith.constant 1 : i32
    %127 = arith.addi %arg2, %c1_i32_110 : i32
    %c0_111 = arith.constant 0 : index
    %c0_112 = arith.constant 0 : index
    %128 = arith.index_cast %127 : i32 to index
    %c2_113 = arith.constant 2 : index
    %c0_114 = arith.constant 0 : index
    %129 = vector.load %arg3[%c0_111, %c0_112, %128, %c2_113, %c0_114] : memref<1x4x9x9x3xbf16, #tpu.memory_space<vmem>>, vector<1x1x1x7x3xbf16>
    %130 = vector.shape_cast %129 : vector<1x1x1x7x3xbf16> to vector<1x7x3xbf16>
    %131 = vector.shape_cast %130 : vector<1x7x3xbf16> to vector<7x3xbf16>
    %c14 = arith.constant 14 : index
    %c0_115 = arith.constant 0 : index
    %c0_116 = arith.constant 0 : index
    %132 = vector.load %arg6[%c14, %c0_115, %c0_116] : memref<75x3x64xbf16, #tpu.memory_space<vmem>>, vector<1x3x64xbf16>
    %133 = vector.shape_cast %132 : vector<1x3x64xbf16> to vector<3x64xbf16>
    %cst_117 = arith.constant dense<0.000000e+00> : vector<7x64xf32>
    %134 = tpu.matmul %131, %133, %cst_117 {dimension_numbers = #tpu.dot_dimension_numbers<[1], [0], [0], [1], [0, 0, 1, 1], [], []>} : vector<7x3xbf16>, vector<3x64xbf16>, vector<7x64xf32> -> vector<7x64xf32>
    %135 = arith.addf %126, %134 : vector<7x64xf32>
    %c1_i32_118 = arith.constant 1 : i32
    %136 = arith.addi %arg2, %c1_i32_118 : i32
    %c0_119 = arith.constant 0 : index
    %c2_120 = arith.constant 2 : index
    %137 = arith.index_cast %136 : i32 to index
    %c0_121 = arith.constant 0 : index
    %c0_122 = arith.constant 0 : index
    %138 = vector.load %arg3[%c0_119, %c2_120, %137, %c0_121, %c0_122] : memref<1x4x9x9x3xbf16, #tpu.memory_space<vmem>>, vector<1x1x1x7x3xbf16>
    %139 = vector.shape_cast %138 : vector<1x1x1x7x3xbf16> to vector<1x7x3xbf16>
    %140 = vector.shape_cast %139 : vector<1x7x3xbf16> to vector<7x3xbf16>
    %c15 = arith.constant 15 : index
    %c0_123 = arith.constant 0 : index
    %c0_124 = arith.constant 0 : index
    %141 = vector.load %arg6[%c15, %c0_123, %c0_124] : memref<75x3x64xbf16, #tpu.memory_space<vmem>>, vector<1x3x64xbf16>
    %142 = vector.shape_cast %141 : vector<1x3x64xbf16> to vector<3x64xbf16>
    %cst_125 = arith.constant dense<0.000000e+00> : vector<7x64xf32>
    %143 = tpu.matmul %140, %142, %cst_125 {dimension_numbers = #tpu.dot_dimension_numbers<[1], [0], [0], [1], [0, 0, 1, 1], [], []>} : vector<7x3xbf16>, vector<3x64xbf16>, vector<7x64xf32> -> vector<7x64xf32>
    %144 = arith.addf %135, %143 : vector<7x64xf32>
    %c1_i32_126 = arith.constant 1 : i32
    %145 = arith.addi %arg2, %c1_i32_126 : i32
    %c0_127 = arith.constant 0 : index
    %c3_128 = arith.constant 3 : index
    %146 = arith.index_cast %145 : i32 to index
    %c0_129 = arith.constant 0 : index
    %c0_130 = arith.constant 0 : index
    %147 = vector.load %arg3[%c0_127, %c3_128, %146, %c0_129, %c0_130] : memref<1x4x9x9x3xbf16, #tpu.memory_space<vmem>>, vector<1x1x1x7x3xbf16>
    %148 = vector.shape_cast %147 : vector<1x1x1x7x3xbf16> to vector<1x7x3xbf16>
    %149 = vector.shape_cast %148 : vector<1x7x3xbf16> to vector<7x3xbf16>
    %c16 = arith.constant 16 : index
    %c0_131 = arith.constant 0 : index
    %c0_132 = arith.constant 0 : index
    %150 = vector.load %arg6[%c16, %c0_131, %c0_132] : memref<75x3x64xbf16, #tpu.memory_space<vmem>>, vector<1x3x64xbf16>
    %151 = vector.shape_cast %150 : vector<1x3x64xbf16> to vector<3x64xbf16>
    %cst_133 = arith.constant dense<0.000000e+00> : vector<7x64xf32>
    %152 = tpu.matmul %149, %151, %cst_133 {dimension_numbers = #tpu.dot_dimension_numbers<[1], [0], [0], [1], [0, 0, 1, 1], [], []>} : vector<7x3xbf16>, vector<3x64xbf16>, vector<7x64xf32> -> vector<7x64xf32>
    %153 = arith.addf %144, %152 : vector<7x64xf32>
    %c1_i32_134 = arith.constant 1 : i32
    %154 = arith.addi %arg2, %c1_i32_134 : i32
    %c0_135 = arith.constant 0 : index
    %c2_136 = arith.constant 2 : index
    %155 = arith.index_cast %154 : i32 to index
    %c1_137 = arith.constant 1 : index
    %c0_138 = arith.constant 0 : index
    %156 = vector.load %arg3[%c0_135, %c2_136, %155, %c1_137, %c0_138] : memref<1x4x9x9x3xbf16, #tpu.memory_space<vmem>>, vector<1x1x1x7x3xbf16>
    %157 = vector.shape_cast %156 : vector<1x1x1x7x3xbf16> to vector<1x7x3xbf16>
    %158 = vector.shape_cast %157 : vector<1x7x3xbf16> to vector<7x3xbf16>
    %c17 = arith.constant 17 : index
    %c0_139 = arith.constant 0 : index
    %c0_140 = arith.constant 0 : index
    %159 = vector.load %arg6[%c17, %c0_139, %c0_140] : memref<75x3x64xbf16, #tpu.memory_space<vmem>>, vector<1x3x64xbf16>
    %160 = vector.shape_cast %159 : vector<1x3x64xbf16> to vector<3x64xbf16>
    %cst_141 = arith.constant dense<0.000000e+00> : vector<7x64xf32>
    %161 = tpu.matmul %158, %160, %cst_141 {dimension_numbers = #tpu.dot_dimension_numbers<[1], [0], [0], [1], [0, 0, 1, 1], [], []>} : vector<7x3xbf16>, vector<3x64xbf16>, vector<7x64xf32> -> vector<7x64xf32>
    %162 = arith.addf %153, %161 : vector<7x64xf32>
    %c1_i32_142 = arith.constant 1 : i32
    %163 = arith.addi %arg2, %c1_i32_142 : i32
    %c0_143 = arith.constant 0 : index
    %c3_144 = arith.constant 3 : index
    %164 = arith.index_cast %163 : i32 to index
    %c1_145 = arith.constant 1 : index
    %c0_146 = arith.constant 0 : index
    %165 = vector.load %arg3[%c0_143, %c3_144, %164, %c1_145, %c0_146] : memref<1x4x9x9x3xbf16, #tpu.memory_space<vmem>>, vector<1x1x1x7x3xbf16>
    %166 = vector.shape_cast %165 : vector<1x1x1x7x3xbf16> to vector<1x7x3xbf16>
    %167 = vector.shape_cast %166 : vector<1x7x3xbf16> to vector<7x3xbf16>
    %c18 = arith.constant 18 : index
    %c0_147 = arith.constant 0 : index
    %c0_148 = arith.constant 0 : index
    %168 = vector.load %arg6[%c18, %c0_147, %c0_148] : memref<75x3x64xbf16, #tpu.memory_space<vmem>>, vector<1x3x64xbf16>
    %169 = vector.shape_cast %168 : vector<1x3x64xbf16> to vector<3x64xbf16>
    %cst_149 = arith.constant dense<0.000000e+00> : vector<7x64xf32>
    %170 = tpu.matmul %167, %169, %cst_149 {dimension_numbers = #tpu.dot_dimension_numbers<[1], [0], [0], [1], [0, 0, 1, 1], [], []>} : vector<7x3xbf16>, vector<3x64xbf16>, vector<7x64xf32> -> vector<7x64xf32>
    %171 = arith.addf %162, %170 : vector<7x64xf32>
    %c1_i32_150 = arith.constant 1 : i32
    %172 = arith.addi %arg2, %c1_i32_150 : i32
    %c0_151 = arith.constant 0 : index
    %c2_152 = arith.constant 2 : index
    %173 = arith.index_cast %172 : i32 to index
    %c2_153 = arith.constant 2 : index
    %c0_154 = arith.constant 0 : index
    %174 = vector.load %arg3[%c0_151, %c2_152, %173, %c2_153, %c0_154] : memref<1x4x9x9x3xbf16, #tpu.memory_space<vmem>>, vector<1x1x1x7x3xbf16>
    %175 = vector.shape_cast %174 : vector<1x1x1x7x3xbf16> to vector<1x7x3xbf16>
    %176 = vector.shape_cast %175 : vector<1x7x3xbf16> to vector<7x3xbf16>
    %c19 = arith.constant 19 : index
    %c0_155 = arith.constant 0 : index
    %c0_156 = arith.constant 0 : index
    %177 = vector.load %arg6[%c19, %c0_155, %c0_156] : memref<75x3x64xbf16, #tpu.memory_space<vmem>>, vector<1x3x64xbf16>
    %178 = vector.shape_cast %177 : vector<1x3x64xbf16> to vector<3x64xbf16>
    %cst_157 = arith.constant dense<0.000000e+00> : vector<7x64xf32>
    %179 = tpu.matmul %176, %178, %cst_157 {dimension_numbers = #tpu.dot_dimension_numbers<[1], [0], [0], [1], [0, 0, 1, 1], [], []>} : vector<7x3xbf16>, vector<3x64xbf16>, vector<7x64xf32> -> vector<7x64xf32>
    %180 = arith.addf %171, %179 : vector<7x64xf32>
    %c2_i32 = arith.constant 2 : i32
    %181 = arith.addi %arg2, %c2_i32 : i32
    %c0_158 = arith.constant 0 : index
    %c0_159 = arith.constant 0 : index
    %182 = arith.index_cast %181 : i32 to index
    %c0_160 = arith.constant 0 : index
    %c0_161 = arith.constant 0 : index
    %183 = vector.load %arg3[%c0_158, %c0_159, %182, %c0_160, %c0_161] : memref<1x4x9x9x3xbf16, #tpu.memory_space<vmem>>, vector<1x1x1x7x3xbf16>
    %184 = vector.shape_cast %183 : vector<1x1x1x7x3xbf16> to vector<1x7x3xbf16>
    %185 = vector.shape_cast %184 : vector<1x7x3xbf16> to vector<7x3xbf16>
    %c20 = arith.constant 20 : index
    %c0_162 = arith.constant 0 : index
    %c0_163 = arith.constant 0 : index
    %186 = vector.load %arg6[%c20, %c0_162, %c0_163] : memref<75x3x64xbf16, #tpu.memory_space<vmem>>, vector<1x3x64xbf16>
    %187 = vector.shape_cast %186 : vector<1x3x64xbf16> to vector<3x64xbf16>
    %cst_164 = arith.constant dense<0.000000e+00> : vector<7x64xf32>
    %188 = tpu.matmul %185, %187, %cst_164 {dimension_numbers = #tpu.dot_dimension_numbers<[1], [0], [0], [1], [0, 0, 1, 1], [], []>} : vector<7x3xbf16>, vector<3x64xbf16>, vector<7x64xf32> -> vector<7x64xf32>
    %189 = arith.addf %180, %188 : vector<7x64xf32>
    %c2_i32_165 = arith.constant 2 : i32
    %190 = arith.addi %arg2, %c2_i32_165 : i32
    %c0_166 = arith.constant 0 : index
    %c1_167 = arith.constant 1 : index
    %191 = arith.index_cast %190 : i32 to index
    %c0_168 = arith.constant 0 : index
    %c0_169 = arith.constant 0 : index
    %192 = vector.load %arg3[%c0_166, %c1_167, %191, %c0_168, %c0_169] : memref<1x4x9x9x3xbf16, #tpu.memory_space<vmem>>, vector<1x1x1x7x3xbf16>
    %193 = vector.shape_cast %192 : vector<1x1x1x7x3xbf16> to vector<1x7x3xbf16>
    %194 = vector.shape_cast %193 : vector<1x7x3xbf16> to vector<7x3xbf16>
    %c21 = arith.constant 21 : index
    %c0_170 = arith.constant 0 : index
    %c0_171 = arith.constant 0 : index
    %195 = vector.load %arg6[%c21, %c0_170, %c0_171] : memref<75x3x64xbf16, #tpu.memory_space<vmem>>, vector<1x3x64xbf16>
    %196 = vector.shape_cast %195 : vector<1x3x64xbf16> to vector<3x64xbf16>
    %cst_172 = arith.constant dense<0.000000e+00> : vector<7x64xf32>
    %197 = tpu.matmul %194, %196, %cst_172 {dimension_numbers = #tpu.dot_dimension_numbers<[1], [0], [0], [1], [0, 0, 1, 1], [], []>} : vector<7x3xbf16>, vector<3x64xbf16>, vector<7x64xf32> -> vector<7x64xf32>
    %198 = arith.addf %189, %197 : vector<7x64xf32>
    %c2_i32_173 = arith.constant 2 : i32
    %199 = arith.addi %arg2, %c2_i32_173 : i32
    %c0_174 = arith.constant 0 : index
    %c0_175 = arith.constant 0 : index
    %200 = arith.index_cast %199 : i32 to index
    %c1_176 = arith.constant 1 : index
    %c0_177 = arith.constant 0 : index
    %201 = vector.load %arg3[%c0_174, %c0_175, %200, %c1_176, %c0_177] : memref<1x4x9x9x3xbf16, #tpu.memory_space<vmem>>, vector<1x1x1x7x3xbf16>
    %202 = vector.shape_cast %201 : vector<1x1x1x7x3xbf16> to vector<1x7x3xbf16>
    %203 = vector.shape_cast %202 : vector<1x7x3xbf16> to vector<7x3xbf16>
    %c22 = arith.constant 22 : index
    %c0_178 = arith.constant 0 : index
    %c0_179 = arith.constant 0 : index
    %204 = vector.load %arg6[%c22, %c0_178, %c0_179] : memref<75x3x64xbf16, #tpu.memory_space<vmem>>, vector<1x3x64xbf16>
    %205 = vector.shape_cast %204 : vector<1x3x64xbf16> to vector<3x64xbf16>
    %cst_180 = arith.constant dense<0.000000e+00> : vector<7x64xf32>
    %206 = tpu.matmul %203, %205, %cst_180 {dimension_numbers = #tpu.dot_dimension_numbers<[1], [0], [0], [1], [0, 0, 1, 1], [], []>} : vector<7x3xbf16>, vector<3x64xbf16>, vector<7x64xf32> -> vector<7x64xf32>
    %207 = arith.addf %198, %206 : vector<7x64xf32>
    %c2_i32_181 = arith.constant 2 : i32
    %208 = arith.addi %arg2, %c2_i32_181 : i32
    %c0_182 = arith.constant 0 : index
    %c1_183 = arith.constant 1 : index
    %209 = arith.index_cast %208 : i32 to index
    %c1_184 = arith.constant 1 : index
    %c0_185 = arith.constant 0 : index
    %210 = vector.load %arg3[%c0_182, %c1_183, %209, %c1_184, %c0_185] : memref<1x4x9x9x3xbf16, #tpu.memory_space<vmem>>, vector<1x1x1x7x3xbf16>
    %211 = vector.shape_cast %210 : vector<1x1x1x7x3xbf16> to vector<1x7x3xbf16>
    %212 = vector.shape_cast %211 : vector<1x7x3xbf16> to vector<7x3xbf16>
    %c23 = arith.constant 23 : index
    %c0_186 = arith.constant 0 : index
    %c0_187 = arith.constant 0 : index
    %213 = vector.load %arg6[%c23, %c0_186, %c0_187] : memref<75x3x64xbf16, #tpu.memory_space<vmem>>, vector<1x3x64xbf16>
    %214 = vector.shape_cast %213 : vector<1x3x64xbf16> to vector<3x64xbf16>
    %cst_188 = arith.constant dense<0.000000e+00> : vector<7x64xf32>
    %215 = tpu.matmul %212, %214, %cst_188 {dimension_numbers = #tpu.dot_dimension_numbers<[1], [0], [0], [1], [0, 0, 1, 1], [], []>} : vector<7x3xbf16>, vector<3x64xbf16>, vector<7x64xf32> -> vector<7x64xf32>
    %216 = arith.addf %207, %215 : vector<7x64xf32>
    %c2_i32_189 = arith.constant 2 : i32
    %217 = arith.addi %arg2, %c2_i32_189 : i32
    %c0_190 = arith.constant 0 : index
    %c0_191 = arith.constant 0 : index
    %218 = arith.index_cast %217 : i32 to index
    %c2_192 = arith.constant 2 : index
    %c0_193 = arith.constant 0 : index
    %219 = vector.load %arg3[%c0_190, %c0_191, %218, %c2_192, %c0_193] : memref<1x4x9x9x3xbf16, #tpu.memory_space<vmem>>, vector<1x1x1x7x3xbf16>
    %220 = vector.shape_cast %219 : vector<1x1x1x7x3xbf16> to vector<1x7x3xbf16>
    %221 = vector.shape_cast %220 : vector<1x7x3xbf16> to vector<7x3xbf16>
    %c24 = arith.constant 24 : index
    %c0_194 = arith.constant 0 : index
    %c0_195 = arith.constant 0 : index
    %222 = vector.load %arg6[%c24, %c0_194, %c0_195] : memref<75x3x64xbf16, #tpu.memory_space<vmem>>, vector<1x3x64xbf16>
    %223 = vector.shape_cast %222 : vector<1x3x64xbf16> to vector<3x64xbf16>
    %cst_196 = arith.constant dense<0.000000e+00> : vector<7x64xf32>
    %224 = tpu.matmul %221, %223, %cst_196 {dimension_numbers = #tpu.dot_dimension_numbers<[1], [0], [0], [1], [0, 0, 1, 1], [], []>} : vector<7x3xbf16>, vector<3x64xbf16>, vector<7x64xf32> -> vector<7x64xf32>
    %225 = arith.addf %216, %224 : vector<7x64xf32>
    %c0_i32_197 = arith.constant 0 : i32
    %226 = arith.addi %arg2, %c0_i32_197 : i32
    %c0_198 = arith.constant 0 : index
    %c0_199 = arith.constant 0 : index
    %227 = arith.index_cast %226 : i32 to index
    %c0_200 = arith.constant 0 : index
    %c0_201 = arith.constant 0 : index
    %228 = vector.load %arg4[%c0_198, %c0_199, %227, %c0_200, %c0_201] : memref<1x4x9x9x3xbf16, #tpu.memory_space<vmem>>, vector<1x1x1x7x3xbf16>
    %229 = vector.shape_cast %228 : vector<1x1x1x7x3xbf16> to vector<1x7x3xbf16>
    %230 = vector.shape_cast %229 : vector<1x7x3xbf16> to vector<7x3xbf16>
    %c25 = arith.constant 25 : index
    %c0_202 = arith.constant 0 : index
    %c0_203 = arith.constant 0 : index
    %231 = vector.load %arg6[%c25, %c0_202, %c0_203] : memref<75x3x64xbf16, #tpu.memory_space<vmem>>, vector<1x3x64xbf16>
    %232 = vector.shape_cast %231 : vector<1x3x64xbf16> to vector<3x64xbf16>
    %cst_204 = arith.constant dense<0.000000e+00> : vector<7x64xf32>
    %233 = tpu.matmul %230, %232, %cst_204 {dimension_numbers = #tpu.dot_dimension_numbers<[1], [0], [0], [1], [0, 0, 1, 1], [], []>} : vector<7x3xbf16>, vector<3x64xbf16>, vector<7x64xf32> -> vector<7x64xf32>
    %234 = arith.addf %225, %233 : vector<7x64xf32>
    %c0_i32_205 = arith.constant 0 : i32
    %235 = arith.addi %arg2, %c0_i32_205 : i32
    %c0_206 = arith.constant 0 : index
    %c1_207 = arith.constant 1 : index
    %236 = arith.index_cast %235 : i32 to index
    %c0_208 = arith.constant 0 : index
    %c0_209 = arith.constant 0 : index
    %237 = vector.load %arg4[%c0_206, %c1_207, %236, %c0_208, %c0_209] : memref<1x4x9x9x3xbf16, #tpu.memory_space<vmem>>, vector<1x1x1x7x3xbf16>
    %238 = vector.shape_cast %237 : vector<1x1x1x7x3xbf16> to vector<1x7x3xbf16>
    %239 = vector.shape_cast %238 : vector<1x7x3xbf16> to vector<7x3xbf16>
    %c26 = arith.constant 26 : index
    %c0_210 = arith.constant 0 : index
    %c0_211 = arith.constant 0 : index
    %240 = vector.load %arg6[%c26, %c0_210, %c0_211] : memref<75x3x64xbf16, #tpu.memory_space<vmem>>, vector<1x3x64xbf16>
    %241 = vector.shape_cast %240 : vector<1x3x64xbf16> to vector<3x64xbf16>
    %cst_212 = arith.constant dense<0.000000e+00> : vector<7x64xf32>
    %242 = tpu.matmul %239, %241, %cst_212 {dimension_numbers = #tpu.dot_dimension_numbers<[1], [0], [0], [1], [0, 0, 1, 1], [], []>} : vector<7x3xbf16>, vector<3x64xbf16>, vector<7x64xf32> -> vector<7x64xf32>
    %243 = arith.addf %234, %242 : vector<7x64xf32>
    %c0_i32_213 = arith.constant 0 : i32
    %244 = arith.addi %arg2, %c0_i32_213 : i32
    %c0_214 = arith.constant 0 : index
    %c0_215 = arith.constant 0 : index
    %245 = arith.index_cast %244 : i32 to index
    %c1_216 = arith.constant 1 : index
    %c0_217 = arith.constant 0 : index
    %246 = vector.load %arg4[%c0_214, %c0_215, %245, %c1_216, %c0_217] : memref<1x4x9x9x3xbf16, #tpu.memory_space<vmem>>, vector<1x1x1x7x3xbf16>
    %247 = vector.shape_cast %246 : vector<1x1x1x7x3xbf16> to vector<1x7x3xbf16>
    %248 = vector.shape_cast %247 : vector<1x7x3xbf16> to vector<7x3xbf16>
    %c27 = arith.constant 27 : index
    %c0_218 = arith.constant 0 : index
    %c0_219 = arith.constant 0 : index
    %249 = vector.load %arg6[%c27, %c0_218, %c0_219] : memref<75x3x64xbf16, #tpu.memory_space<vmem>>, vector<1x3x64xbf16>
    %250 = vector.shape_cast %249 : vector<1x3x64xbf16> to vector<3x64xbf16>
    %cst_220 = arith.constant dense<0.000000e+00> : vector<7x64xf32>
    %251 = tpu.matmul %248, %250, %cst_220 {dimension_numbers = #tpu.dot_dimension_numbers<[1], [0], [0], [1], [0, 0, 1, 1], [], []>} : vector<7x3xbf16>, vector<3x64xbf16>, vector<7x64xf32> -> vector<7x64xf32>
    %252 = arith.addf %243, %251 : vector<7x64xf32>
    %c0_i32_221 = arith.constant 0 : i32
    %253 = arith.addi %arg2, %c0_i32_221 : i32
    %c0_222 = arith.constant 0 : index
    %c1_223 = arith.constant 1 : index
    %254 = arith.index_cast %253 : i32 to index
    %c1_224 = arith.constant 1 : index
    %c0_225 = arith.constant 0 : index
    %255 = vector.load %arg4[%c0_222, %c1_223, %254, %c1_224, %c0_225] : memref<1x4x9x9x3xbf16, #tpu.memory_space<vmem>>, vector<1x1x1x7x3xbf16>
    %256 = vector.shape_cast %255 : vector<1x1x1x7x3xbf16> to vector<1x7x3xbf16>
    %257 = vector.shape_cast %256 : vector<1x7x3xbf16> to vector<7x3xbf16>
    %c28 = arith.constant 28 : index
    %c0_226 = arith.constant 0 : index
    %c0_227 = arith.constant 0 : index
    %258 = vector.load %arg6[%c28, %c0_226, %c0_227] : memref<75x3x64xbf16, #tpu.memory_space<vmem>>, vector<1x3x64xbf16>
    %259 = vector.shape_cast %258 : vector<1x3x64xbf16> to vector<3x64xbf16>
    %cst_228 = arith.constant dense<0.000000e+00> : vector<7x64xf32>
    %260 = tpu.matmul %257, %259, %cst_228 {dimension_numbers = #tpu.dot_dimension_numbers<[1], [0], [0], [1], [0, 0, 1, 1], [], []>} : vector<7x3xbf16>, vector<3x64xbf16>, vector<7x64xf32> -> vector<7x64xf32>
    %261 = arith.addf %252, %260 : vector<7x64xf32>
    %c0_i32_229 = arith.constant 0 : i32
    %262 = arith.addi %arg2, %c0_i32_229 : i32
    %c0_230 = arith.constant 0 : index
    %c0_231 = arith.constant 0 : index
    %263 = arith.index_cast %262 : i32 to index
    %c2_232 = arith.constant 2 : index
    %c0_233 = arith.constant 0 : index
    %264 = vector.load %arg4[%c0_230, %c0_231, %263, %c2_232, %c0_233] : memref<1x4x9x9x3xbf16, #tpu.memory_space<vmem>>, vector<1x1x1x7x3xbf16>
    %265 = vector.shape_cast %264 : vector<1x1x1x7x3xbf16> to vector<1x7x3xbf16>
    %266 = vector.shape_cast %265 : vector<1x7x3xbf16> to vector<7x3xbf16>
    %c29 = arith.constant 29 : index
    %c0_234 = arith.constant 0 : index
    %c0_235 = arith.constant 0 : index
    %267 = vector.load %arg6[%c29, %c0_234, %c0_235] : memref<75x3x64xbf16, #tpu.memory_space<vmem>>, vector<1x3x64xbf16>
    %268 = vector.shape_cast %267 : vector<1x3x64xbf16> to vector<3x64xbf16>
    %cst_236 = arith.constant dense<0.000000e+00> : vector<7x64xf32>
    %269 = tpu.matmul %266, %268, %cst_236 {dimension_numbers = #tpu.dot_dimension_numbers<[1], [0], [0], [1], [0, 0, 1, 1], [], []>} : vector<7x3xbf16>, vector<3x64xbf16>, vector<7x64xf32> -> vector<7x64xf32>
    %270 = arith.addf %261, %269 : vector<7x64xf32>
    %c0_i32_237 = arith.constant 0 : i32
    %271 = arith.addi %arg2, %c0_i32_237 : i32
    %c0_238 = arith.constant 0 : index
    %c2_239 = arith.constant 2 : index
    %272 = arith.index_cast %271 : i32 to index
    %c0_240 = arith.constant 0 : index
    %c0_241 = arith.constant 0 : index
    %273 = vector.load %arg4[%c0_238, %c2_239, %272, %c0_240, %c0_241] : memref<1x4x9x9x3xbf16, #tpu.memory_space<vmem>>, vector<1x1x1x7x3xbf16>
    %274 = vector.shape_cast %273 : vector<1x1x1x7x3xbf16> to vector<1x7x3xbf16>
    %275 = vector.shape_cast %274 : vector<1x7x3xbf16> to vector<7x3xbf16>
    %c30 = arith.constant 30 : index
    %c0_242 = arith.constant 0 : index
    %c0_243 = arith.constant 0 : index
    %276 = vector.load %arg6[%c30, %c0_242, %c0_243] : memref<75x3x64xbf16, #tpu.memory_space<vmem>>, vector<1x3x64xbf16>
    %277 = vector.shape_cast %276 : vector<1x3x64xbf16> to vector<3x64xbf16>
    %cst_244 = arith.constant dense<0.000000e+00> : vector<7x64xf32>
    %278 = tpu.matmul %275, %277, %cst_244 {dimension_numbers = #tpu.dot_dimension_numbers<[1], [0], [0], [1], [0, 0, 1, 1], [], []>} : vector<7x3xbf16>, vector<3x64xbf16>, vector<7x64xf32> -> vector<7x64xf32>
    %279 = arith.addf %270, %278 : vector<7x64xf32>
    %c0_i32_245 = arith.constant 0 : i32
    %280 = arith.addi %arg2, %c0_i32_245 : i32
    %c0_246 = arith.constant 0 : index
    %c3_247 = arith.constant 3 : index
    %281 = arith.index_cast %280 : i32 to index
    %c0_248 = arith.constant 0 : index
    %c0_249 = arith.constant 0 : index
    %282 = vector.load %arg4[%c0_246, %c3_247, %281, %c0_248, %c0_249] : memref<1x4x9x9x3xbf16, #tpu.memory_space<vmem>>, vector<1x1x1x7x3xbf16>
    %283 = vector.shape_cast %282 : vector<1x1x1x7x3xbf16> to vector<1x7x3xbf16>
    %284 = vector.shape_cast %283 : vector<1x7x3xbf16> to vector<7x3xbf16>
    %c31 = arith.constant 31 : index
    %c0_250 = arith.constant 0 : index
    %c0_251 = arith.constant 0 : index
    %285 = vector.load %arg6[%c31, %c0_250, %c0_251] : memref<75x3x64xbf16, #tpu.memory_space<vmem>>, vector<1x3x64xbf16>
    %286 = vector.shape_cast %285 : vector<1x3x64xbf16> to vector<3x64xbf16>
    %cst_252 = arith.constant dense<0.000000e+00> : vector<7x64xf32>
    %287 = tpu.matmul %284, %286, %cst_252 {dimension_numbers = #tpu.dot_dimension_numbers<[1], [0], [0], [1], [0, 0, 1, 1], [], []>} : vector<7x3xbf16>, vector<3x64xbf16>, vector<7x64xf32> -> vector<7x64xf32>
    %288 = arith.addf %279, %287 : vector<7x64xf32>
    %c0_i32_253 = arith.constant 0 : i32
    %289 = arith.addi %arg2, %c0_i32_253 : i32
    %c0_254 = arith.constant 0 : index
    %c2_255 = arith.constant 2 : index
    %290 = arith.index_cast %289 : i32 to index
    %c1_256 = arith.constant 1 : index
    %c0_257 = arith.constant 0 : index
    %291 = vector.load %arg4[%c0_254, %c2_255, %290, %c1_256, %c0_257] : memref<1x4x9x9x3xbf16, #tpu.memory_space<vmem>>, vector<1x1x1x7x3xbf16>
    %292 = vector.shape_cast %291 : vector<1x1x1x7x3xbf16> to vector<1x7x3xbf16>
    %293 = vector.shape_cast %292 : vector<1x7x3xbf16> to vector<7x3xbf16>
    %c32 = arith.constant 32 : index
    %c0_258 = arith.constant 0 : index
    %c0_259 = arith.constant 0 : index
    %294 = vector.load %arg6[%c32, %c0_258, %c0_259] : memref<75x3x64xbf16, #tpu.memory_space<vmem>>, vector<1x3x64xbf16>
    %295 = vector.shape_cast %294 : vector<1x3x64xbf16> to vector<3x64xbf16>
    %cst_260 = arith.constant dense<0.000000e+00> : vector<7x64xf32>
    %296 = tpu.matmul %293, %295, %cst_260 {dimension_numbers = #tpu.dot_dimension_numbers<[1], [0], [0], [1], [0, 0, 1, 1], [], []>} : vector<7x3xbf16>, vector<3x64xbf16>, vector<7x64xf32> -> vector<7x64xf32>
    %297 = arith.addf %288, %296 : vector<7x64xf32>
    %c0_i32_261 = arith.constant 0 : i32
    %298 = arith.addi %arg2, %c0_i32_261 : i32
    %c0_262 = arith.constant 0 : index
    %c3_263 = arith.constant 3 : index
    %299 = arith.index_cast %298 : i32 to index
    %c1_264 = arith.constant 1 : index
    %c0_265 = arith.constant 0 : index
    %300 = vector.load %arg4[%c0_262, %c3_263, %299, %c1_264, %c0_265] : memref<1x4x9x9x3xbf16, #tpu.memory_space<vmem>>, vector<1x1x1x7x3xbf16>
    %301 = vector.shape_cast %300 : vector<1x1x1x7x3xbf16> to vector<1x7x3xbf16>
    %302 = vector.shape_cast %301 : vector<1x7x3xbf16> to vector<7x3xbf16>
    %c33 = arith.constant 33 : index
    %c0_266 = arith.constant 0 : index
    %c0_267 = arith.constant 0 : index
    %303 = vector.load %arg6[%c33, %c0_266, %c0_267] : memref<75x3x64xbf16, #tpu.memory_space<vmem>>, vector<1x3x64xbf16>
    %304 = vector.shape_cast %303 : vector<1x3x64xbf16> to vector<3x64xbf16>
    %cst_268 = arith.constant dense<0.000000e+00> : vector<7x64xf32>
    %305 = tpu.matmul %302, %304, %cst_268 {dimension_numbers = #tpu.dot_dimension_numbers<[1], [0], [0], [1], [0, 0, 1, 1], [], []>} : vector<7x3xbf16>, vector<3x64xbf16>, vector<7x64xf32> -> vector<7x64xf32>
    %306 = arith.addf %297, %305 : vector<7x64xf32>
    %c0_i32_269 = arith.constant 0 : i32
    %307 = arith.addi %arg2, %c0_i32_269 : i32
    %c0_270 = arith.constant 0 : index
    %c2_271 = arith.constant 2 : index
    %308 = arith.index_cast %307 : i32 to index
    %c2_272 = arith.constant 2 : index
    %c0_273 = arith.constant 0 : index
    %309 = vector.load %arg4[%c0_270, %c2_271, %308, %c2_272, %c0_273] : memref<1x4x9x9x3xbf16, #tpu.memory_space<vmem>>, vector<1x1x1x7x3xbf16>
    %310 = vector.shape_cast %309 : vector<1x1x1x7x3xbf16> to vector<1x7x3xbf16>
    %311 = vector.shape_cast %310 : vector<1x7x3xbf16> to vector<7x3xbf16>
    %c34 = arith.constant 34 : index
    %c0_274 = arith.constant 0 : index
    %c0_275 = arith.constant 0 : index
    %312 = vector.load %arg6[%c34, %c0_274, %c0_275] : memref<75x3x64xbf16, #tpu.memory_space<vmem>>, vector<1x3x64xbf16>
    %313 = vector.shape_cast %312 : vector<1x3x64xbf16> to vector<3x64xbf16>
    %cst_276 = arith.constant dense<0.000000e+00> : vector<7x64xf32>
    %314 = tpu.matmul %311, %313, %cst_276 {dimension_numbers = #tpu.dot_dimension_numbers<[1], [0], [0], [1], [0, 0, 1, 1], [], []>} : vector<7x3xbf16>, vector<3x64xbf16>, vector<7x64xf32> -> vector<7x64xf32>
    %315 = arith.addf %306, %314 : vector<7x64xf32>
    %c1_i32_277 = arith.constant 1 : i32
    %316 = arith.addi %arg2, %c1_i32_277 : i32
    %c0_278 = arith.constant 0 : index
    %c0_279 = arith.constant 0 : index
    %317 = arith.index_cast %316 : i32 to index
    %c0_280 = arith.constant 0 : index
    %c0_281 = arith.constant 0 : index
    %318 = vector.load %arg4[%c0_278, %c0_279, %317, %c0_280, %c0_281] : memref<1x4x9x9x3xbf16, #tpu.memory_space<vmem>>, vector<1x1x1x7x3xbf16>
    %319 = vector.shape_cast %318 : vector<1x1x1x7x3xbf16> to vector<1x7x3xbf16>
    %320 = vector.shape_cast %319 : vector<1x7x3xbf16> to vector<7x3xbf16>
    %c35 = arith.constant 35 : index
    %c0_282 = arith.constant 0 : index
    %c0_283 = arith.constant 0 : index
    %321 = vector.load %arg6[%c35, %c0_282, %c0_283] : memref<75x3x64xbf16, #tpu.memory_space<vmem>>, vector<1x3x64xbf16>
    %322 = vector.shape_cast %321 : vector<1x3x64xbf16> to vector<3x64xbf16>
    %cst_284 = arith.constant dense<0.000000e+00> : vector<7x64xf32>
    %323 = tpu.matmul %320, %322, %cst_284 {dimension_numbers = #tpu.dot_dimension_numbers<[1], [0], [0], [1], [0, 0, 1, 1], [], []>} : vector<7x3xbf16>, vector<3x64xbf16>, vector<7x64xf32> -> vector<7x64xf32>
    %324 = arith.addf %315, %323 : vector<7x64xf32>
    %c1_i32_285 = arith.constant 1 : i32
    %325 = arith.addi %arg2, %c1_i32_285 : i32
    %c0_286 = arith.constant 0 : index
    %c1_287 = arith.constant 1 : index
    %326 = arith.index_cast %325 : i32 to index
    %c0_288 = arith.constant 0 : index
    %c0_289 = arith.constant 0 : index
    %327 = vector.load %arg4[%c0_286, %c1_287, %326, %c0_288, %c0_289] : memref<1x4x9x9x3xbf16, #tpu.memory_space<vmem>>, vector<1x1x1x7x3xbf16>
    %328 = vector.shape_cast %327 : vector<1x1x1x7x3xbf16> to vector<1x7x3xbf16>
    %329 = vector.shape_cast %328 : vector<1x7x3xbf16> to vector<7x3xbf16>
    %c36 = arith.constant 36 : index
    %c0_290 = arith.constant 0 : index
    %c0_291 = arith.constant 0 : index
    %330 = vector.load %arg6[%c36, %c0_290, %c0_291] : memref<75x3x64xbf16, #tpu.memory_space<vmem>>, vector<1x3x64xbf16>
    %331 = vector.shape_cast %330 : vector<1x3x64xbf16> to vector<3x64xbf16>
    %cst_292 = arith.constant dense<0.000000e+00> : vector<7x64xf32>
    %332 = tpu.matmul %329, %331, %cst_292 {dimension_numbers = #tpu.dot_dimension_numbers<[1], [0], [0], [1], [0, 0, 1, 1], [], []>} : vector<7x3xbf16>, vector<3x64xbf16>, vector<7x64xf32> -> vector<7x64xf32>
    %333 = arith.addf %324, %332 : vector<7x64xf32>
    %c1_i32_293 = arith.constant 1 : i32
    %334 = arith.addi %arg2, %c1_i32_293 : i32
    %c0_294 = arith.constant 0 : index
    %c0_295 = arith.constant 0 : index
    %335 = arith.index_cast %334 : i32 to index
    %c1_296 = arith.constant 1 : index
    %c0_297 = arith.constant 0 : index
    %336 = vector.load %arg4[%c0_294, %c0_295, %335, %c1_296, %c0_297] : memref<1x4x9x9x3xbf16, #tpu.memory_space<vmem>>, vector<1x1x1x7x3xbf16>
    %337 = vector.shape_cast %336 : vector<1x1x1x7x3xbf16> to vector<1x7x3xbf16>
    %338 = vector.shape_cast %337 : vector<1x7x3xbf16> to vector<7x3xbf16>
    %c37 = arith.constant 37 : index
    %c0_298 = arith.constant 0 : index
    %c0_299 = arith.constant 0 : index
    %339 = vector.load %arg6[%c37, %c0_298, %c0_299] : memref<75x3x64xbf16, #tpu.memory_space<vmem>>, vector<1x3x64xbf16>
    %340 = vector.shape_cast %339 : vector<1x3x64xbf16> to vector<3x64xbf16>
    %cst_300 = arith.constant dense<0.000000e+00> : vector<7x64xf32>
    %341 = tpu.matmul %338, %340, %cst_300 {dimension_numbers = #tpu.dot_dimension_numbers<[1], [0], [0], [1], [0, 0, 1, 1], [], []>} : vector<7x3xbf16>, vector<3x64xbf16>, vector<7x64xf32> -> vector<7x64xf32>
    %342 = arith.addf %333, %341 : vector<7x64xf32>
    %c1_i32_301 = arith.constant 1 : i32
    %343 = arith.addi %arg2, %c1_i32_301 : i32
    %c0_302 = arith.constant 0 : index
    %c1_303 = arith.constant 1 : index
    %344 = arith.index_cast %343 : i32 to index
    %c1_304 = arith.constant 1 : index
    %c0_305 = arith.constant 0 : index
    %345 = vector.load %arg4[%c0_302, %c1_303, %344, %c1_304, %c0_305] : memref<1x4x9x9x3xbf16, #tpu.memory_space<vmem>>, vector<1x1x1x7x3xbf16>
    %346 = vector.shape_cast %345 : vector<1x1x1x7x3xbf16> to vector<1x7x3xbf16>
    %347 = vector.shape_cast %346 : vector<1x7x3xbf16> to vector<7x3xbf16>
    %c38 = arith.constant 38 : index
    %c0_306 = arith.constant 0 : index
    %c0_307 = arith.constant 0 : index
    %348 = vector.load %arg6[%c38, %c0_306, %c0_307] : memref<75x3x64xbf16, #tpu.memory_space<vmem>>, vector<1x3x64xbf16>
    %349 = vector.shape_cast %348 : vector<1x3x64xbf16> to vector<3x64xbf16>
    %cst_308 = arith.constant dense<0.000000e+00> : vector<7x64xf32>
    %350 = tpu.matmul %347, %349, %cst_308 {dimension_numbers = #tpu.dot_dimension_numbers<[1], [0], [0], [1], [0, 0, 1, 1], [], []>} : vector<7x3xbf16>, vector<3x64xbf16>, vector<7x64xf32> -> vector<7x64xf32>
    %351 = arith.addf %342, %350 : vector<7x64xf32>
    %c1_i32_309 = arith.constant 1 : i32
    %352 = arith.addi %arg2, %c1_i32_309 : i32
    %c0_310 = arith.constant 0 : index
    %c0_311 = arith.constant 0 : index
    %353 = arith.index_cast %352 : i32 to index
    %c2_312 = arith.constant 2 : index
    %c0_313 = arith.constant 0 : index
    %354 = vector.load %arg4[%c0_310, %c0_311, %353, %c2_312, %c0_313] : memref<1x4x9x9x3xbf16, #tpu.memory_space<vmem>>, vector<1x1x1x7x3xbf16>
    %355 = vector.shape_cast %354 : vector<1x1x1x7x3xbf16> to vector<1x7x3xbf16>
    %356 = vector.shape_cast %355 : vector<1x7x3xbf16> to vector<7x3xbf16>
    %c39 = arith.constant 39 : index
    %c0_314 = arith.constant 0 : index
    %c0_315 = arith.constant 0 : index
    %357 = vector.load %arg6[%c39, %c0_314, %c0_315] : memref<75x3x64xbf16, #tpu.memory_space<vmem>>, vector<1x3x64xbf16>
    %358 = vector.shape_cast %357 : vector<1x3x64xbf16> to vector<3x64xbf16>
    %cst_316 = arith.constant dense<0.000000e+00> : vector<7x64xf32>
    %359 = tpu.matmul %356, %358, %cst_316 {dimension_numbers = #tpu.dot_dimension_numbers<[1], [0], [0], [1], [0, 0, 1, 1], [], []>} : vector<7x3xbf16>, vector<3x64xbf16>, vector<7x64xf32> -> vector<7x64xf32>
    %360 = arith.addf %351, %359 : vector<7x64xf32>
    %c1_i32_317 = arith.constant 1 : i32
    %361 = arith.addi %arg2, %c1_i32_317 : i32
    %c0_318 = arith.constant 0 : index
    %c2_319 = arith.constant 2 : index
    %362 = arith.index_cast %361 : i32 to index
    %c0_320 = arith.constant 0 : index
    %c0_321 = arith.constant 0 : index
    %363 = vector.load %arg4[%c0_318, %c2_319, %362, %c0_320, %c0_321] : memref<1x4x9x9x3xbf16, #tpu.memory_space<vmem>>, vector<1x1x1x7x3xbf16>
    %364 = vector.shape_cast %363 : vector<1x1x1x7x3xbf16> to vector<1x7x3xbf16>
    %365 = vector.shape_cast %364 : vector<1x7x3xbf16> to vector<7x3xbf16>
    %c40 = arith.constant 40 : index
    %c0_322 = arith.constant 0 : index
    %c0_323 = arith.constant 0 : index
    %366 = vector.load %arg6[%c40, %c0_322, %c0_323] : memref<75x3x64xbf16, #tpu.memory_space<vmem>>, vector<1x3x64xbf16>
    %367 = vector.shape_cast %366 : vector<1x3x64xbf16> to vector<3x64xbf16>
    %cst_324 = arith.constant dense<0.000000e+00> : vector<7x64xf32>
    %368 = tpu.matmul %365, %367, %cst_324 {dimension_numbers = #tpu.dot_dimension_numbers<[1], [0], [0], [1], [0, 0, 1, 1], [], []>} : vector<7x3xbf16>, vector<3x64xbf16>, vector<7x64xf32> -> vector<7x64xf32>
    %369 = arith.addf %360, %368 : vector<7x64xf32>
    %c1_i32_325 = arith.constant 1 : i32
    %370 = arith.addi %arg2, %c1_i32_325 : i32
    %c0_326 = arith.constant 0 : index
    %c3_327 = arith.constant 3 : index
    %371 = arith.index_cast %370 : i32 to index
    %c0_328 = arith.constant 0 : index
    %c0_329 = arith.constant 0 : index
    %372 = vector.load %arg4[%c0_326, %c3_327, %371, %c0_328, %c0_329] : memref<1x4x9x9x3xbf16, #tpu.memory_space<vmem>>, vector<1x1x1x7x3xbf16>
    %373 = vector.shape_cast %372 : vector<1x1x1x7x3xbf16> to vector<1x7x3xbf16>
    %374 = vector.shape_cast %373 : vector<1x7x3xbf16> to vector<7x3xbf16>
    %c41 = arith.constant 41 : index
    %c0_330 = arith.constant 0 : index
    %c0_331 = arith.constant 0 : index
    %375 = vector.load %arg6[%c41, %c0_330, %c0_331] : memref<75x3x64xbf16, #tpu.memory_space<vmem>>, vector<1x3x64xbf16>
    %376 = vector.shape_cast %375 : vector<1x3x64xbf16> to vector<3x64xbf16>
    %cst_332 = arith.constant dense<0.000000e+00> : vector<7x64xf32>
    %377 = tpu.matmul %374, %376, %cst_332 {dimension_numbers = #tpu.dot_dimension_numbers<[1], [0], [0], [1], [0, 0, 1, 1], [], []>} : vector<7x3xbf16>, vector<3x64xbf16>, vector<7x64xf32> -> vector<7x64xf32>
    %378 = arith.addf %369, %377 : vector<7x64xf32>
    %c1_i32_333 = arith.constant 1 : i32
    %379 = arith.addi %arg2, %c1_i32_333 : i32
    %c0_334 = arith.constant 0 : index
    %c2_335 = arith.constant 2 : index
    %380 = arith.index_cast %379 : i32 to index
    %c1_336 = arith.constant 1 : index
    %c0_337 = arith.constant 0 : index
    %381 = vector.load %arg4[%c0_334, %c2_335, %380, %c1_336, %c0_337] : memref<1x4x9x9x3xbf16, #tpu.memory_space<vmem>>, vector<1x1x1x7x3xbf16>
    %382 = vector.shape_cast %381 : vector<1x1x1x7x3xbf16> to vector<1x7x3xbf16>
    %383 = vector.shape_cast %382 : vector<1x7x3xbf16> to vector<7x3xbf16>
    %c42 = arith.constant 42 : index
    %c0_338 = arith.constant 0 : index
    %c0_339 = arith.constant 0 : index
    %384 = vector.load %arg6[%c42, %c0_338, %c0_339] : memref<75x3x64xbf16, #tpu.memory_space<vmem>>, vector<1x3x64xbf16>
    %385 = vector.shape_cast %384 : vector<1x3x64xbf16> to vector<3x64xbf16>
    %cst_340 = arith.constant dense<0.000000e+00> : vector<7x64xf32>
    %386 = tpu.matmul %383, %385, %cst_340 {dimension_numbers = #tpu.dot_dimension_numbers<[1], [0], [0], [1], [0, 0, 1, 1], [], []>} : vector<7x3xbf16>, vector<3x64xbf16>, vector<7x64xf32> -> vector<7x64xf32>
    %387 = arith.addf %378, %386 : vector<7x64xf32>
    %c1_i32_341 = arith.constant 1 : i32
    %388 = arith.addi %arg2, %c1_i32_341 : i32
    %c0_342 = arith.constant 0 : index
    %c3_343 = arith.constant 3 : index
    %389 = arith.index_cast %388 : i32 to index
    %c1_344 = arith.constant 1 : index
    %c0_345 = arith.constant 0 : index
    %390 = vector.load %arg4[%c0_342, %c3_343, %389, %c1_344, %c0_345] : memref<1x4x9x9x3xbf16, #tpu.memory_space<vmem>>, vector<1x1x1x7x3xbf16>
    %391 = vector.shape_cast %390 : vector<1x1x1x7x3xbf16> to vector<1x7x3xbf16>
    %392 = vector.shape_cast %391 : vector<1x7x3xbf16> to vector<7x3xbf16>
    %c43 = arith.constant 43 : index
    %c0_346 = arith.constant 0 : index
    %c0_347 = arith.constant 0 : index
    %393 = vector.load %arg6[%c43, %c0_346, %c0_347] : memref<75x3x64xbf16, #tpu.memory_space<vmem>>, vector<1x3x64xbf16>
    %394 = vector.shape_cast %393 : vector<1x3x64xbf16> to vector<3x64xbf16>
    %cst_348 = arith.constant dense<0.000000e+00> : vector<7x64xf32>
    %395 = tpu.matmul %392, %394, %cst_348 {dimension_numbers = #tpu.dot_dimension_numbers<[1], [0], [0], [1], [0, 0, 1, 1], [], []>} : vector<7x3xbf16>, vector<3x64xbf16>, vector<7x64xf32> -> vector<7x64xf32>
    %396 = arith.addf %387, %395 : vector<7x64xf32>
    %c1_i32_349 = arith.constant 1 : i32
    %397 = arith.addi %arg2, %c1_i32_349 : i32
    %c0_350 = arith.constant 0 : index
    %c2_351 = arith.constant 2 : index
    %398 = arith.index_cast %397 : i32 to index
    %c2_352 = arith.constant 2 : index
    %c0_353 = arith.constant 0 : index
    %399 = vector.load %arg4[%c0_350, %c2_351, %398, %c2_352, %c0_353] : memref<1x4x9x9x3xbf16, #tpu.memory_space<vmem>>, vector<1x1x1x7x3xbf16>
    %400 = vector.shape_cast %399 : vector<1x1x1x7x3xbf16> to vector<1x7x3xbf16>
    %401 = vector.shape_cast %400 : vector<1x7x3xbf16> to vector<7x3xbf16>
    %c44 = arith.constant 44 : index
    %c0_354 = arith.constant 0 : index
    %c0_355 = arith.constant 0 : index
    %402 = vector.load %arg6[%c44, %c0_354, %c0_355] : memref<75x3x64xbf16, #tpu.memory_space<vmem>>, vector<1x3x64xbf16>
    %403 = vector.shape_cast %402 : vector<1x3x64xbf16> to vector<3x64xbf16>
    %cst_356 = arith.constant dense<0.000000e+00> : vector<7x64xf32>
    %404 = tpu.matmul %401, %403, %cst_356 {dimension_numbers = #tpu.dot_dimension_numbers<[1], [0], [0], [1], [0, 0, 1, 1], [], []>} : vector<7x3xbf16>, vector<3x64xbf16>, vector<7x64xf32> -> vector<7x64xf32>
    %405 = arith.addf %396, %404 : vector<7x64xf32>
    %c2_i32_357 = arith.constant 2 : i32
    %406 = arith.addi %arg2, %c2_i32_357 : i32
    %c0_358 = arith.constant 0 : index
    %c0_359 = arith.constant 0 : index
    %407 = arith.index_cast %406 : i32 to index
    %c0_360 = arith.constant 0 : index
    %c0_361 = arith.constant 0 : index
    %408 = vector.load %arg4[%c0_358, %c0_359, %407, %c0_360, %c0_361] : memref<1x4x9x9x3xbf16, #tpu.memory_space<vmem>>, vector<1x1x1x7x3xbf16>
    %409 = vector.shape_cast %408 : vector<1x1x1x7x3xbf16> to vector<1x7x3xbf16>
    %410 = vector.shape_cast %409 : vector<1x7x3xbf16> to vector<7x3xbf16>
    %c45 = arith.constant 45 : index
    %c0_362 = arith.constant 0 : index
    %c0_363 = arith.constant 0 : index
    %411 = vector.load %arg6[%c45, %c0_362, %c0_363] : memref<75x3x64xbf16, #tpu.memory_space<vmem>>, vector<1x3x64xbf16>
    %412 = vector.shape_cast %411 : vector<1x3x64xbf16> to vector<3x64xbf16>
    %cst_364 = arith.constant dense<0.000000e+00> : vector<7x64xf32>
    %413 = tpu.matmul %410, %412, %cst_364 {dimension_numbers = #tpu.dot_dimension_numbers<[1], [0], [0], [1], [0, 0, 1, 1], [], []>} : vector<7x3xbf16>, vector<3x64xbf16>, vector<7x64xf32> -> vector<7x64xf32>
    %414 = arith.addf %405, %413 : vector<7x64xf32>
    %c2_i32_365 = arith.constant 2 : i32
    %415 = arith.addi %arg2, %c2_i32_365 : i32
    %c0_366 = arith.constant 0 : index
    %c1_367 = arith.constant 1 : index
    %416 = arith.index_cast %415 : i32 to index
    %c0_368 = arith.constant 0 : index
    %c0_369 = arith.constant 0 : index
    %417 = vector.load %arg4[%c0_366, %c1_367, %416, %c0_368, %c0_369] : memref<1x4x9x9x3xbf16, #tpu.memory_space<vmem>>, vector<1x1x1x7x3xbf16>
    %418 = vector.shape_cast %417 : vector<1x1x1x7x3xbf16> to vector<1x7x3xbf16>
    %419 = vector.shape_cast %418 : vector<1x7x3xbf16> to vector<7x3xbf16>
    %c46 = arith.constant 46 : index
    %c0_370 = arith.constant 0 : index
    %c0_371 = arith.constant 0 : index
    %420 = vector.load %arg6[%c46, %c0_370, %c0_371] : memref<75x3x64xbf16, #tpu.memory_space<vmem>>, vector<1x3x64xbf16>
    %421 = vector.shape_cast %420 : vector<1x3x64xbf16> to vector<3x64xbf16>
    %cst_372 = arith.constant dense<0.000000e+00> : vector<7x64xf32>
    %422 = tpu.matmul %419, %421, %cst_372 {dimension_numbers = #tpu.dot_dimension_numbers<[1], [0], [0], [1], [0, 0, 1, 1], [], []>} : vector<7x3xbf16>, vector<3x64xbf16>, vector<7x64xf32> -> vector<7x64xf32>
    %423 = arith.addf %414, %422 : vector<7x64xf32>
    %c2_i32_373 = arith.constant 2 : i32
    %424 = arith.addi %arg2, %c2_i32_373 : i32
    %c0_374 = arith.constant 0 : index
    %c0_375 = arith.constant 0 : index
    %425 = arith.index_cast %424 : i32 to index
    %c1_376 = arith.constant 1 : index
    %c0_377 = arith.constant 0 : index
    %426 = vector.load %arg4[%c0_374, %c0_375, %425, %c1_376, %c0_377] : memref<1x4x9x9x3xbf16, #tpu.memory_space<vmem>>, vector<1x1x1x7x3xbf16>
    %427 = vector.shape_cast %426 : vector<1x1x1x7x3xbf16> to vector<1x7x3xbf16>
    %428 = vector.shape_cast %427 : vector<1x7x3xbf16> to vector<7x3xbf16>
    %c47 = arith.constant 47 : index
    %c0_378 = arith.constant 0 : index
    %c0_379 = arith.constant 0 : index
    %429 = vector.load %arg6[%c47, %c0_378, %c0_379] : memref<75x3x64xbf16, #tpu.memory_space<vmem>>, vector<1x3x64xbf16>
    %430 = vector.shape_cast %429 : vector<1x3x64xbf16> to vector<3x64xbf16>
    %cst_380 = arith.constant dense<0.000000e+00> : vector<7x64xf32>
    %431 = tpu.matmul %428, %430, %cst_380 {dimension_numbers = #tpu.dot_dimension_numbers<[1], [0], [0], [1], [0, 0, 1, 1], [], []>} : vector<7x3xbf16>, vector<3x64xbf16>, vector<7x64xf32> -> vector<7x64xf32>
    %432 = arith.addf %423, %431 : vector<7x64xf32>
    %c2_i32_381 = arith.constant 2 : i32
    %433 = arith.addi %arg2, %c2_i32_381 : i32
    %c0_382 = arith.constant 0 : index
    %c1_383 = arith.constant 1 : index
    %434 = arith.index_cast %433 : i32 to index
    %c1_384 = arith.constant 1 : index
    %c0_385 = arith.constant 0 : index
    %435 = vector.load %arg4[%c0_382, %c1_383, %434, %c1_384, %c0_385] : memref<1x4x9x9x3xbf16, #tpu.memory_space<vmem>>, vector<1x1x1x7x3xbf16>
    %436 = vector.shape_cast %435 : vector<1x1x1x7x3xbf16> to vector<1x7x3xbf16>
    %437 = vector.shape_cast %436 : vector<1x7x3xbf16> to vector<7x3xbf16>
    %c48 = arith.constant 48 : index
    %c0_386 = arith.constant 0 : index
    %c0_387 = arith.constant 0 : index
    %438 = vector.load %arg6[%c48, %c0_386, %c0_387] : memref<75x3x64xbf16, #tpu.memory_space<vmem>>, vector<1x3x64xbf16>
    %439 = vector.shape_cast %438 : vector<1x3x64xbf16> to vector<3x64xbf16>
    %cst_388 = arith.constant dense<0.000000e+00> : vector<7x64xf32>
    %440 = tpu.matmul %437, %439, %cst_388 {dimension_numbers = #tpu.dot_dimension_numbers<[1], [0], [0], [1], [0, 0, 1, 1], [], []>} : vector<7x3xbf16>, vector<3x64xbf16>, vector<7x64xf32> -> vector<7x64xf32>
    %441 = arith.addf %432, %440 : vector<7x64xf32>
    %c2_i32_389 = arith.constant 2 : i32
    %442 = arith.addi %arg2, %c2_i32_389 : i32
    %c0_390 = arith.constant 0 : index
    %c0_391 = arith.constant 0 : index
    %443 = arith.index_cast %442 : i32 to index
    %c2_392 = arith.constant 2 : index
    %c0_393 = arith.constant 0 : index
    %444 = vector.load %arg4[%c0_390, %c0_391, %443, %c2_392, %c0_393] : memref<1x4x9x9x3xbf16, #tpu.memory_space<vmem>>, vector<1x1x1x7x3xbf16>
    %445 = vector.shape_cast %444 : vector<1x1x1x7x3xbf16> to vector<1x7x3xbf16>
    %446 = vector.shape_cast %445 : vector<1x7x3xbf16> to vector<7x3xbf16>
    %c49 = arith.constant 49 : index
    %c0_394 = arith.constant 0 : index
    %c0_395 = arith.constant 0 : index
    %447 = vector.load %arg6[%c49, %c0_394, %c0_395] : memref<75x3x64xbf16, #tpu.memory_space<vmem>>, vector<1x3x64xbf16>
    %448 = vector.shape_cast %447 : vector<1x3x64xbf16> to vector<3x64xbf16>
    %cst_396 = arith.constant dense<0.000000e+00> : vector<7x64xf32>
    %449 = tpu.matmul %446, %448, %cst_396 {dimension_numbers = #tpu.dot_dimension_numbers<[1], [0], [0], [1], [0, 0, 1, 1], [], []>} : vector<7x3xbf16>, vector<3x64xbf16>, vector<7x64xf32> -> vector<7x64xf32>
    %450 = arith.addf %441, %449 : vector<7x64xf32>
    %c0_i32_397 = arith.constant 0 : i32
    %451 = arith.addi %arg2, %c0_i32_397 : i32
    %c0_398 = arith.constant 0 : index
    %c0_399 = arith.constant 0 : index
    %452 = arith.index_cast %451 : i32 to index
    %c0_400 = arith.constant 0 : index
    %c0_401 = arith.constant 0 : index
    %453 = vector.load %arg5[%c0_398, %c0_399, %452, %c0_400, %c0_401] : memref<1x4x9x9x3xbf16, #tpu.memory_space<vmem>>, vector<1x1x1x7x3xbf16>
    %454 = vector.shape_cast %453 : vector<1x1x1x7x3xbf16> to vector<1x7x3xbf16>
    %455 = vector.shape_cast %454 : vector<1x7x3xbf16> to vector<7x3xbf16>
    %c50 = arith.constant 50 : index
    %c0_402 = arith.constant 0 : index
    %c0_403 = arith.constant 0 : index
    %456 = vector.load %arg6[%c50, %c0_402, %c0_403] : memref<75x3x64xbf16, #tpu.memory_space<vmem>>, vector<1x3x64xbf16>
    %457 = vector.shape_cast %456 : vector<1x3x64xbf16> to vector<3x64xbf16>
    %cst_404 = arith.constant dense<0.000000e+00> : vector<7x64xf32>
    %458 = tpu.matmul %455, %457, %cst_404 {dimension_numbers = #tpu.dot_dimension_numbers<[1], [0], [0], [1], [0, 0, 1, 1], [], []>} : vector<7x3xbf16>, vector<3x64xbf16>, vector<7x64xf32> -> vector<7x64xf32>
    %459 = arith.addf %450, %458 : vector<7x64xf32>
    %c0_i32_405 = arith.constant 0 : i32
    %460 = arith.addi %arg2, %c0_i32_405 : i32
    %c0_406 = arith.constant 0 : index
    %c1_407 = arith.constant 1 : index
    %461 = arith.index_cast %460 : i32 to index
    %c0_408 = arith.constant 0 : index
    %c0_409 = arith.constant 0 : index
    %462 = vector.load %arg5[%c0_406, %c1_407, %461, %c0_408, %c0_409] : memref<1x4x9x9x3xbf16, #tpu.memory_space<vmem>>, vector<1x1x1x7x3xbf16>
    %463 = vector.shape_cast %462 : vector<1x1x1x7x3xbf16> to vector<1x7x3xbf16>
    %464 = vector.shape_cast %463 : vector<1x7x3xbf16> to vector<7x3xbf16>
    %c51 = arith.constant 51 : index
    %c0_410 = arith.constant 0 : index
    %c0_411 = arith.constant 0 : index
    %465 = vector.load %arg6[%c51, %c0_410, %c0_411] : memref<75x3x64xbf16, #tpu.memory_space<vmem>>, vector<1x3x64xbf16>
    %466 = vector.shape_cast %465 : vector<1x3x64xbf16> to vector<3x64xbf16>
    %cst_412 = arith.constant dense<0.000000e+00> : vector<7x64xf32>
    %467 = tpu.matmul %464, %466, %cst_412 {dimension_numbers = #tpu.dot_dimension_numbers<[1], [0], [0], [1], [0, 0, 1, 1], [], []>} : vector<7x3xbf16>, vector<3x64xbf16>, vector<7x64xf32> -> vector<7x64xf32>
    %468 = arith.addf %459, %467 : vector<7x64xf32>
    %c0_i32_413 = arith.constant 0 : i32
    %469 = arith.addi %arg2, %c0_i32_413 : i32
    %c0_414 = arith.constant 0 : index
    %c0_415 = arith.constant 0 : index
    %470 = arith.index_cast %469 : i32 to index
    %c1_416 = arith.constant 1 : index
    %c0_417 = arith.constant 0 : index
    %471 = vector.load %arg5[%c0_414, %c0_415, %470, %c1_416, %c0_417] : memref<1x4x9x9x3xbf16, #tpu.memory_space<vmem>>, vector<1x1x1x7x3xbf16>
    %472 = vector.shape_cast %471 : vector<1x1x1x7x3xbf16> to vector<1x7x3xbf16>
    %473 = vector.shape_cast %472 : vector<1x7x3xbf16> to vector<7x3xbf16>
    %c52 = arith.constant 52 : index
    %c0_418 = arith.constant 0 : index
    %c0_419 = arith.constant 0 : index
    %474 = vector.load %arg6[%c52, %c0_418, %c0_419] : memref<75x3x64xbf16, #tpu.memory_space<vmem>>, vector<1x3x64xbf16>
    %475 = vector.shape_cast %474 : vector<1x3x64xbf16> to vector<3x64xbf16>
    %cst_420 = arith.constant dense<0.000000e+00> : vector<7x64xf32>
    %476 = tpu.matmul %473, %475, %cst_420 {dimension_numbers = #tpu.dot_dimension_numbers<[1], [0], [0], [1], [0, 0, 1, 1], [], []>} : vector<7x3xbf16>, vector<3x64xbf16>, vector<7x64xf32> -> vector<7x64xf32>
    %477 = arith.addf %468, %476 : vector<7x64xf32>
    %c0_i32_421 = arith.constant 0 : i32
    %478 = arith.addi %arg2, %c0_i32_421 : i32
    %c0_422 = arith.constant 0 : index
    %c1_423 = arith.constant 1 : index
    %479 = arith.index_cast %478 : i32 to index
    %c1_424 = arith.constant 1 : index
    %c0_425 = arith.constant 0 : index
    %480 = vector.load %arg5[%c0_422, %c1_423, %479, %c1_424, %c0_425] : memref<1x4x9x9x3xbf16, #tpu.memory_space<vmem>>, vector<1x1x1x7x3xbf16>
    %481 = vector.shape_cast %480 : vector<1x1x1x7x3xbf16> to vector<1x7x3xbf16>
    %482 = vector.shape_cast %481 : vector<1x7x3xbf16> to vector<7x3xbf16>
    %c53 = arith.constant 53 : index
    %c0_426 = arith.constant 0 : index
    %c0_427 = arith.constant 0 : index
    %483 = vector.load %arg6[%c53, %c0_426, %c0_427] : memref<75x3x64xbf16, #tpu.memory_space<vmem>>, vector<1x3x64xbf16>
    %484 = vector.shape_cast %483 : vector<1x3x64xbf16> to vector<3x64xbf16>
    %cst_428 = arith.constant dense<0.000000e+00> : vector<7x64xf32>
    %485 = tpu.matmul %482, %484, %cst_428 {dimension_numbers = #tpu.dot_dimension_numbers<[1], [0], [0], [1], [0, 0, 1, 1], [], []>} : vector<7x3xbf16>, vector<3x64xbf16>, vector<7x64xf32> -> vector<7x64xf32>
    %486 = arith.addf %477, %485 : vector<7x64xf32>
    %c0_i32_429 = arith.constant 0 : i32
    %487 = arith.addi %arg2, %c0_i32_429 : i32
    %c0_430 = arith.constant 0 : index
    %c0_431 = arith.constant 0 : index
    %488 = arith.index_cast %487 : i32 to index
    %c2_432 = arith.constant 2 : index
    %c0_433 = arith.constant 0 : index
    %489 = vector.load %arg5[%c0_430, %c0_431, %488, %c2_432, %c0_433] : memref<1x4x9x9x3xbf16, #tpu.memory_space<vmem>>, vector<1x1x1x7x3xbf16>
    %490 = vector.shape_cast %489 : vector<1x1x1x7x3xbf16> to vector<1x7x3xbf16>
    %491 = vector.shape_cast %490 : vector<1x7x3xbf16> to vector<7x3xbf16>
    %c54 = arith.constant 54 : index
    %c0_434 = arith.constant 0 : index
    %c0_435 = arith.constant 0 : index
    %492 = vector.load %arg6[%c54, %c0_434, %c0_435] : memref<75x3x64xbf16, #tpu.memory_space<vmem>>, vector<1x3x64xbf16>
    %493 = vector.shape_cast %492 : vector<1x3x64xbf16> to vector<3x64xbf16>
    %cst_436 = arith.constant dense<0.000000e+00> : vector<7x64xf32>
    %494 = tpu.matmul %491, %493, %cst_436 {dimension_numbers = #tpu.dot_dimension_numbers<[1], [0], [0], [1], [0, 0, 1, 1], [], []>} : vector<7x3xbf16>, vector<3x64xbf16>, vector<7x64xf32> -> vector<7x64xf32>
    %495 = arith.addf %486, %494 : vector<7x64xf32>
    %c0_i32_437 = arith.constant 0 : i32
    %496 = arith.addi %arg2, %c0_i32_437 : i32
    %c0_438 = arith.constant 0 : index
    %c2_439 = arith.constant 2 : index
    %497 = arith.index_cast %496 : i32 to index
    %c0_440 = arith.constant 0 : index
    %c0_441 = arith.constant 0 : index
    %498 = vector.load %arg5[%c0_438, %c2_439, %497, %c0_440, %c0_441] : memref<1x4x9x9x3xbf16, #tpu.memory_space<vmem>>, vector<1x1x1x7x3xbf16>
    %499 = vector.shape_cast %498 : vector<1x1x1x7x3xbf16> to vector<1x7x3xbf16>
    %500 = vector.shape_cast %499 : vector<1x7x3xbf16> to vector<7x3xbf16>
    %c55 = arith.constant 55 : index
    %c0_442 = arith.constant 0 : index
    %c0_443 = arith.constant 0 : index
    %501 = vector.load %arg6[%c55, %c0_442, %c0_443] : memref<75x3x64xbf16, #tpu.memory_space<vmem>>, vector<1x3x64xbf16>
    %502 = vector.shape_cast %501 : vector<1x3x64xbf16> to vector<3x64xbf16>
    %cst_444 = arith.constant dense<0.000000e+00> : vector<7x64xf32>
    %503 = tpu.matmul %500, %502, %cst_444 {dimension_numbers = #tpu.dot_dimension_numbers<[1], [0], [0], [1], [0, 0, 1, 1], [], []>} : vector<7x3xbf16>, vector<3x64xbf16>, vector<7x64xf32> -> vector<7x64xf32>
    %504 = arith.addf %495, %503 : vector<7x64xf32>
    %c0_i32_445 = arith.constant 0 : i32
    %505 = arith.addi %arg2, %c0_i32_445 : i32
    %c0_446 = arith.constant 0 : index
    %c3_447 = arith.constant 3 : index
    %506 = arith.index_cast %505 : i32 to index
    %c0_448 = arith.constant 0 : index
    %c0_449 = arith.constant 0 : index
    %507 = vector.load %arg5[%c0_446, %c3_447, %506, %c0_448, %c0_449] : memref<1x4x9x9x3xbf16, #tpu.memory_space<vmem>>, vector<1x1x1x7x3xbf16>
    %508 = vector.shape_cast %507 : vector<1x1x1x7x3xbf16> to vector<1x7x3xbf16>
    %509 = vector.shape_cast %508 : vector<1x7x3xbf16> to vector<7x3xbf16>
    %c56 = arith.constant 56 : index
    %c0_450 = arith.constant 0 : index
    %c0_451 = arith.constant 0 : index
    %510 = vector.load %arg6[%c56, %c0_450, %c0_451] : memref<75x3x64xbf16, #tpu.memory_space<vmem>>, vector<1x3x64xbf16>
    %511 = vector.shape_cast %510 : vector<1x3x64xbf16> to vector<3x64xbf16>
    %cst_452 = arith.constant dense<0.000000e+00> : vector<7x64xf32>
    %512 = tpu.matmul %509, %511, %cst_452 {dimension_numbers = #tpu.dot_dimension_numbers<[1], [0], [0], [1], [0, 0, 1, 1], [], []>} : vector<7x3xbf16>, vector<3x64xbf16>, vector<7x64xf32> -> vector<7x64xf32>
    %513 = arith.addf %504, %512 : vector<7x64xf32>
    %c0_i32_453 = arith.constant 0 : i32
    %514 = arith.addi %arg2, %c0_i32_453 : i32
    %c0_454 = arith.constant 0 : index
    %c2_455 = arith.constant 2 : index
    %515 = arith.index_cast %514 : i32 to index
    %c1_456 = arith.constant 1 : index
    %c0_457 = arith.constant 0 : index
    %516 = vector.load %arg5[%c0_454, %c2_455, %515, %c1_456, %c0_457] : memref<1x4x9x9x3xbf16, #tpu.memory_space<vmem>>, vector<1x1x1x7x3xbf16>
    %517 = vector.shape_cast %516 : vector<1x1x1x7x3xbf16> to vector<1x7x3xbf16>
    %518 = vector.shape_cast %517 : vector<1x7x3xbf16> to vector<7x3xbf16>
    %c57 = arith.constant 57 : index
    %c0_458 = arith.constant 0 : index
    %c0_459 = arith.constant 0 : index
    %519 = vector.load %arg6[%c57, %c0_458, %c0_459] : memref<75x3x64xbf16, #tpu.memory_space<vmem>>, vector<1x3x64xbf16>
    %520 = vector.shape_cast %519 : vector<1x3x64xbf16> to vector<3x64xbf16>
    %cst_460 = arith.constant dense<0.000000e+00> : vector<7x64xf32>
    %521 = tpu.matmul %518, %520, %cst_460 {dimension_numbers = #tpu.dot_dimension_numbers<[1], [0], [0], [1], [0, 0, 1, 1], [], []>} : vector<7x3xbf16>, vector<3x64xbf16>, vector<7x64xf32> -> vector<7x64xf32>
    %522 = arith.addf %513, %521 : vector<7x64xf32>
    %c0_i32_461 = arith.constant 0 : i32
    %523 = arith.addi %arg2, %c0_i32_461 : i32
    %c0_462 = arith.constant 0 : index
    %c3_463 = arith.constant 3 : index
    %524 = arith.index_cast %523 : i32 to index
    %c1_464 = arith.constant 1 : index
    %c0_465 = arith.constant 0 : index
    %525 = vector.load %arg5[%c0_462, %c3_463, %524, %c1_464, %c0_465] : memref<1x4x9x9x3xbf16, #tpu.memory_space<vmem>>, vector<1x1x1x7x3xbf16>
    %526 = vector.shape_cast %525 : vector<1x1x1x7x3xbf16> to vector<1x7x3xbf16>
    %527 = vector.shape_cast %526 : vector<1x7x3xbf16> to vector<7x3xbf16>
    %c58 = arith.constant 58 : index
    %c0_466 = arith.constant 0 : index
    %c0_467 = arith.constant 0 : index
    %528 = vector.load %arg6[%c58, %c0_466, %c0_467] : memref<75x3x64xbf16, #tpu.memory_space<vmem>>, vector<1x3x64xbf16>
    %529 = vector.shape_cast %528 : vector<1x3x64xbf16> to vector<3x64xbf16>
    %cst_468 = arith.constant dense<0.000000e+00> : vector<7x64xf32>
    %530 = tpu.matmul %527, %529, %cst_468 {dimension_numbers = #tpu.dot_dimension_numbers<[1], [0], [0], [1], [0, 0, 1, 1], [], []>} : vector<7x3xbf16>, vector<3x64xbf16>, vector<7x64xf32> -> vector<7x64xf32>
    %531 = arith.addf %522, %530 : vector<7x64xf32>
    %c0_i32_469 = arith.constant 0 : i32
    %532 = arith.addi %arg2, %c0_i32_469 : i32
    %c0_470 = arith.constant 0 : index
    %c2_471 = arith.constant 2 : index
    %533 = arith.index_cast %532 : i32 to index
    %c2_472 = arith.constant 2 : index
    %c0_473 = arith.constant 0 : index
    %534 = vector.load %arg5[%c0_470, %c2_471, %533, %c2_472, %c0_473] : memref<1x4x9x9x3xbf16, #tpu.memory_space<vmem>>, vector<1x1x1x7x3xbf16>
    %535 = vector.shape_cast %534 : vector<1x1x1x7x3xbf16> to vector<1x7x3xbf16>
    %536 = vector.shape_cast %535 : vector<1x7x3xbf16> to vector<7x3xbf16>
    %c59 = arith.constant 59 : index
    %c0_474 = arith.constant 0 : index
    %c0_475 = arith.constant 0 : index
    %537 = vector.load %arg6[%c59, %c0_474, %c0_475] : memref<75x3x64xbf16, #tpu.memory_space<vmem>>, vector<1x3x64xbf16>
    %538 = vector.shape_cast %537 : vector<1x3x64xbf16> to vector<3x64xbf16>
    %cst_476 = arith.constant dense<0.000000e+00> : vector<7x64xf32>
    %539 = tpu.matmul %536, %538, %cst_476 {dimension_numbers = #tpu.dot_dimension_numbers<[1], [0], [0], [1], [0, 0, 1, 1], [], []>} : vector<7x3xbf16>, vector<3x64xbf16>, vector<7x64xf32> -> vector<7x64xf32>
    %540 = arith.addf %531, %539 : vector<7x64xf32>
    %c1_i32_477 = arith.constant 1 : i32
    %541 = arith.addi %arg2, %c1_i32_477 : i32
    %c0_478 = arith.constant 0 : index
    %c0_479 = arith.constant 0 : index
    %542 = arith.index_cast %541 : i32 to index
    %c0_480 = arith.constant 0 : index
    %c0_481 = arith.constant 0 : index
    %543 = vector.load %arg5[%c0_478, %c0_479, %542, %c0_480, %c0_481] : memref<1x4x9x9x3xbf16, #tpu.memory_space<vmem>>, vector<1x1x1x7x3xbf16>
    %544 = vector.shape_cast %543 : vector<1x1x1x7x3xbf16> to vector<1x7x3xbf16>
    %545 = vector.shape_cast %544 : vector<1x7x3xbf16> to vector<7x3xbf16>
    %c60 = arith.constant 60 : index
    %c0_482 = arith.constant 0 : index
    %c0_483 = arith.constant 0 : index
    %546 = vector.load %arg6[%c60, %c0_482, %c0_483] : memref<75x3x64xbf16, #tpu.memory_space<vmem>>, vector<1x3x64xbf16>
    %547 = vector.shape_cast %546 : vector<1x3x64xbf16> to vector<3x64xbf16>
    %cst_484 = arith.constant dense<0.000000e+00> : vector<7x64xf32>
    %548 = tpu.matmul %545, %547, %cst_484 {dimension_numbers = #tpu.dot_dimension_numbers<[1], [0], [0], [1], [0, 0, 1, 1], [], []>} : vector<7x3xbf16>, vector<3x64xbf16>, vector<7x64xf32> -> vector<7x64xf32>
    %549 = arith.addf %540, %548 : vector<7x64xf32>
    %c1_i32_485 = arith.constant 1 : i32
    %550 = arith.addi %arg2, %c1_i32_485 : i32
    %c0_486 = arith.constant 0 : index
    %c1_487 = arith.constant 1 : index
    %551 = arith.index_cast %550 : i32 to index
    %c0_488 = arith.constant 0 : index
    %c0_489 = arith.constant 0 : index
    %552 = vector.load %arg5[%c0_486, %c1_487, %551, %c0_488, %c0_489] : memref<1x4x9x9x3xbf16, #tpu.memory_space<vmem>>, vector<1x1x1x7x3xbf16>
    %553 = vector.shape_cast %552 : vector<1x1x1x7x3xbf16> to vector<1x7x3xbf16>
    %554 = vector.shape_cast %553 : vector<1x7x3xbf16> to vector<7x3xbf16>
    %c61 = arith.constant 61 : index
    %c0_490 = arith.constant 0 : index
    %c0_491 = arith.constant 0 : index
    %555 = vector.load %arg6[%c61, %c0_490, %c0_491] : memref<75x3x64xbf16, #tpu.memory_space<vmem>>, vector<1x3x64xbf16>
    %556 = vector.shape_cast %555 : vector<1x3x64xbf16> to vector<3x64xbf16>
    %cst_492 = arith.constant dense<0.000000e+00> : vector<7x64xf32>
    %557 = tpu.matmul %554, %556, %cst_492 {dimension_numbers = #tpu.dot_dimension_numbers<[1], [0], [0], [1], [0, 0, 1, 1], [], []>} : vector<7x3xbf16>, vector<3x64xbf16>, vector<7x64xf32> -> vector<7x64xf32>
    %558 = arith.addf %549, %557 : vector<7x64xf32>
    %c1_i32_493 = arith.constant 1 : i32
    %559 = arith.addi %arg2, %c1_i32_493 : i32
    %c0_494 = arith.constant 0 : index
    %c0_495 = arith.constant 0 : index
    %560 = arith.index_cast %559 : i32 to index
    %c1_496 = arith.constant 1 : index
    %c0_497 = arith.constant 0 : index
    %561 = vector.load %arg5[%c0_494, %c0_495, %560, %c1_496, %c0_497] : memref<1x4x9x9x3xbf16, #tpu.memory_space<vmem>>, vector<1x1x1x7x3xbf16>
    %562 = vector.shape_cast %561 : vector<1x1x1x7x3xbf16> to vector<1x7x3xbf16>
    %563 = vector.shape_cast %562 : vector<1x7x3xbf16> to vector<7x3xbf16>
    %c62 = arith.constant 62 : index
    %c0_498 = arith.constant 0 : index
    %c0_499 = arith.constant 0 : index
    %564 = vector.load %arg6[%c62, %c0_498, %c0_499] : memref<75x3x64xbf16, #tpu.memory_space<vmem>>, vector<1x3x64xbf16>
    %565 = vector.shape_cast %564 : vector<1x3x64xbf16> to vector<3x64xbf16>
    %cst_500 = arith.constant dense<0.000000e+00> : vector<7x64xf32>
    %566 = tpu.matmul %563, %565, %cst_500 {dimension_numbers = #tpu.dot_dimension_numbers<[1], [0], [0], [1], [0, 0, 1, 1], [], []>} : vector<7x3xbf16>, vector<3x64xbf16>, vector<7x64xf32> -> vector<7x64xf32>
    %567 = arith.addf %558, %566 : vector<7x64xf32>
    %c1_i32_501 = arith.constant 1 : i32
    %568 = arith.addi %arg2, %c1_i32_501 : i32
    %c0_502 = arith.constant 0 : index
    %c1_503 = arith.constant 1 : index
    %569 = arith.index_cast %568 : i32 to index
    %c1_504 = arith.constant 1 : index
    %c0_505 = arith.constant 0 : index
    %570 = vector.load %arg5[%c0_502, %c1_503, %569, %c1_504, %c0_505] : memref<1x4x9x9x3xbf16, #tpu.memory_space<vmem>>, vector<1x1x1x7x3xbf16>
    %571 = vector.shape_cast %570 : vector<1x1x1x7x3xbf16> to vector<1x7x3xbf16>
    %572 = vector.shape_cast %571 : vector<1x7x3xbf16> to vector<7x3xbf16>
    %c63 = arith.constant 63 : index
    %c0_506 = arith.constant 0 : index
    %c0_507 = arith.constant 0 : index
    %573 = vector.load %arg6[%c63, %c0_506, %c0_507] : memref<75x3x64xbf16, #tpu.memory_space<vmem>>, vector<1x3x64xbf16>
    %574 = vector.shape_cast %573 : vector<1x3x64xbf16> to vector<3x64xbf16>
    %cst_508 = arith.constant dense<0.000000e+00> : vector<7x64xf32>
    %575 = tpu.matmul %572, %574, %cst_508 {dimension_numbers = #tpu.dot_dimension_numbers<[1], [0], [0], [1], [0, 0, 1, 1], [], []>} : vector<7x3xbf16>, vector<3x64xbf16>, vector<7x64xf32> -> vector<7x64xf32>
    %576 = arith.addf %567, %575 : vector<7x64xf32>
    %c1_i32_509 = arith.constant 1 : i32
    %577 = arith.addi %arg2, %c1_i32_509 : i32
    %c0_510 = arith.constant 0 : index
    %c0_511 = arith.constant 0 : index
    %578 = arith.index_cast %577 : i32 to index
    %c2_512 = arith.constant 2 : index
    %c0_513 = arith.constant 0 : index
    %579 = vector.load %arg5[%c0_510, %c0_511, %578, %c2_512, %c0_513] : memref<1x4x9x9x3xbf16, #tpu.memory_space<vmem>>, vector<1x1x1x7x3xbf16>
    %580 = vector.shape_cast %579 : vector<1x1x1x7x3xbf16> to vector<1x7x3xbf16>
    %581 = vector.shape_cast %580 : vector<1x7x3xbf16> to vector<7x3xbf16>
    %c64 = arith.constant 64 : index
    %c0_514 = arith.constant 0 : index
    %c0_515 = arith.constant 0 : index
    %582 = vector.load %arg6[%c64, %c0_514, %c0_515] : memref<75x3x64xbf16, #tpu.memory_space<vmem>>, vector<1x3x64xbf16>
    %583 = vector.shape_cast %582 : vector<1x3x64xbf16> to vector<3x64xbf16>
    %cst_516 = arith.constant dense<0.000000e+00> : vector<7x64xf32>
    %584 = tpu.matmul %581, %583, %cst_516 {dimension_numbers = #tpu.dot_dimension_numbers<[1], [0], [0], [1], [0, 0, 1, 1], [], []>} : vector<7x3xbf16>, vector<3x64xbf16>, vector<7x64xf32> -> vector<7x64xf32>
    %585 = arith.addf %576, %584 : vector<7x64xf32>
    %c1_i32_517 = arith.constant 1 : i32
    %586 = arith.addi %arg2, %c1_i32_517 : i32
    %c0_518 = arith.constant 0 : index
    %c2_519 = arith.constant 2 : index
    %587 = arith.index_cast %586 : i32 to index
    %c0_520 = arith.constant 0 : index
    %c0_521 = arith.constant 0 : index
    %588 = vector.load %arg5[%c0_518, %c2_519, %587, %c0_520, %c0_521] : memref<1x4x9x9x3xbf16, #tpu.memory_space<vmem>>, vector<1x1x1x7x3xbf16>
    %589 = vector.shape_cast %588 : vector<1x1x1x7x3xbf16> to vector<1x7x3xbf16>
    %590 = vector.shape_cast %589 : vector<1x7x3xbf16> to vector<7x3xbf16>
    %c65 = arith.constant 65 : index
    %c0_522 = arith.constant 0 : index
    %c0_523 = arith.constant 0 : index
    %591 = vector.load %arg6[%c65, %c0_522, %c0_523] : memref<75x3x64xbf16, #tpu.memory_space<vmem>>, vector<1x3x64xbf16>
    %592 = vector.shape_cast %591 : vector<1x3x64xbf16> to vector<3x64xbf16>
    %cst_524 = arith.constant dense<0.000000e+00> : vector<7x64xf32>
    %593 = tpu.matmul %590, %592, %cst_524 {dimension_numbers = #tpu.dot_dimension_numbers<[1], [0], [0], [1], [0, 0, 1, 1], [], []>} : vector<7x3xbf16>, vector<3x64xbf16>, vector<7x64xf32> -> vector<7x64xf32>
    %594 = arith.addf %585, %593 : vector<7x64xf32>
    %c1_i32_525 = arith.constant 1 : i32
    %595 = arith.addi %arg2, %c1_i32_525 : i32
    %c0_526 = arith.constant 0 : index
    %c3_527 = arith.constant 3 : index
    %596 = arith.index_cast %595 : i32 to index
    %c0_528 = arith.constant 0 : index
    %c0_529 = arith.constant 0 : index
    %597 = vector.load %arg5[%c0_526, %c3_527, %596, %c0_528, %c0_529] : memref<1x4x9x9x3xbf16, #tpu.memory_space<vmem>>, vector<1x1x1x7x3xbf16>
    %598 = vector.shape_cast %597 : vector<1x1x1x7x3xbf16> to vector<1x7x3xbf16>
    %599 = vector.shape_cast %598 : vector<1x7x3xbf16> to vector<7x3xbf16>
    %c66 = arith.constant 66 : index
    %c0_530 = arith.constant 0 : index
    %c0_531 = arith.constant 0 : index
    %600 = vector.load %arg6[%c66, %c0_530, %c0_531] : memref<75x3x64xbf16, #tpu.memory_space<vmem>>, vector<1x3x64xbf16>
    %601 = vector.shape_cast %600 : vector<1x3x64xbf16> to vector<3x64xbf16>
    %cst_532 = arith.constant dense<0.000000e+00> : vector<7x64xf32>
    %602 = tpu.matmul %599, %601, %cst_532 {dimension_numbers = #tpu.dot_dimension_numbers<[1], [0], [0], [1], [0, 0, 1, 1], [], []>} : vector<7x3xbf16>, vector<3x64xbf16>, vector<7x64xf32> -> vector<7x64xf32>
    %603 = arith.addf %594, %602 : vector<7x64xf32>
    %c1_i32_533 = arith.constant 1 : i32
    %604 = arith.addi %arg2, %c1_i32_533 : i32
    %c0_534 = arith.constant 0 : index
    %c2_535 = arith.constant 2 : index
    %605 = arith.index_cast %604 : i32 to index
    %c1_536 = arith.constant 1 : index
    %c0_537 = arith.constant 0 : index
    %606 = vector.load %arg5[%c0_534, %c2_535, %605, %c1_536, %c0_537] : memref<1x4x9x9x3xbf16, #tpu.memory_space<vmem>>, vector<1x1x1x7x3xbf16>
    %607 = vector.shape_cast %606 : vector<1x1x1x7x3xbf16> to vector<1x7x3xbf16>
    %608 = vector.shape_cast %607 : vector<1x7x3xbf16> to vector<7x3xbf16>
    %c67 = arith.constant 67 : index
    %c0_538 = arith.constant 0 : index
    %c0_539 = arith.constant 0 : index
    %609 = vector.load %arg6[%c67, %c0_538, %c0_539] : memref<75x3x64xbf16, #tpu.memory_space<vmem>>, vector<1x3x64xbf16>
    %610 = vector.shape_cast %609 : vector<1x3x64xbf16> to vector<3x64xbf16>
    %cst_540 = arith.constant dense<0.000000e+00> : vector<7x64xf32>
    %611 = tpu.matmul %608, %610, %cst_540 {dimension_numbers = #tpu.dot_dimension_numbers<[1], [0], [0], [1], [0, 0, 1, 1], [], []>} : vector<7x3xbf16>, vector<3x64xbf16>, vector<7x64xf32> -> vector<7x64xf32>
    %612 = arith.addf %603, %611 : vector<7x64xf32>
    %c1_i32_541 = arith.constant 1 : i32
    %613 = arith.addi %arg2, %c1_i32_541 : i32
    %c0_542 = arith.constant 0 : index
    %c3_543 = arith.constant 3 : index
    %614 = arith.index_cast %613 : i32 to index
    %c1_544 = arith.constant 1 : index
    %c0_545 = arith.constant 0 : index
    %615 = vector.load %arg5[%c0_542, %c3_543, %614, %c1_544, %c0_545] : memref<1x4x9x9x3xbf16, #tpu.memory_space<vmem>>, vector<1x1x1x7x3xbf16>
    %616 = vector.shape_cast %615 : vector<1x1x1x7x3xbf16> to vector<1x7x3xbf16>
    %617 = vector.shape_cast %616 : vector<1x7x3xbf16> to vector<7x3xbf16>
    %c68 = arith.constant 68 : index
    %c0_546 = arith.constant 0 : index
    %c0_547 = arith.constant 0 : index
    %618 = vector.load %arg6[%c68, %c0_546, %c0_547] : memref<75x3x64xbf16, #tpu.memory_space<vmem>>, vector<1x3x64xbf16>
    %619 = vector.shape_cast %618 : vector<1x3x64xbf16> to vector<3x64xbf16>
    %cst_548 = arith.constant dense<0.000000e+00> : vector<7x64xf32>
    %620 = tpu.matmul %617, %619, %cst_548 {dimension_numbers = #tpu.dot_dimension_numbers<[1], [0], [0], [1], [0, 0, 1, 1], [], []>} : vector<7x3xbf16>, vector<3x64xbf16>, vector<7x64xf32> -> vector<7x64xf32>
    %621 = arith.addf %612, %620 : vector<7x64xf32>
    %c1_i32_549 = arith.constant 1 : i32
    %622 = arith.addi %arg2, %c1_i32_549 : i32
    %c0_550 = arith.constant 0 : index
    %c2_551 = arith.constant 2 : index
    %623 = arith.index_cast %622 : i32 to index
    %c2_552 = arith.constant 2 : index
    %c0_553 = arith.constant 0 : index
    %624 = vector.load %arg5[%c0_550, %c2_551, %623, %c2_552, %c0_553] : memref<1x4x9x9x3xbf16, #tpu.memory_space<vmem>>, vector<1x1x1x7x3xbf16>
    %625 = vector.shape_cast %624 : vector<1x1x1x7x3xbf16> to vector<1x7x3xbf16>
    %626 = vector.shape_cast %625 : vector<1x7x3xbf16> to vector<7x3xbf16>
    %c69 = arith.constant 69 : index
    %c0_554 = arith.constant 0 : index
    %c0_555 = arith.constant 0 : index
    %627 = vector.load %arg6[%c69, %c0_554, %c0_555] : memref<75x3x64xbf16, #tpu.memory_space<vmem>>, vector<1x3x64xbf16>
    %628 = vector.shape_cast %627 : vector<1x3x64xbf16> to vector<3x64xbf16>
    %cst_556 = arith.constant dense<0.000000e+00> : vector<7x64xf32>
    %629 = tpu.matmul %626, %628, %cst_556 {dimension_numbers = #tpu.dot_dimension_numbers<[1], [0], [0], [1], [0, 0, 1, 1], [], []>} : vector<7x3xbf16>, vector<3x64xbf16>, vector<7x64xf32> -> vector<7x64xf32>
    %630 = arith.addf %621, %629 : vector<7x64xf32>
    %c2_i32_557 = arith.constant 2 : i32
    %631 = arith.addi %arg2, %c2_i32_557 : i32
    %c0_558 = arith.constant 0 : index
    %c0_559 = arith.constant 0 : index
    %632 = arith.index_cast %631 : i32 to index
    %c0_560 = arith.constant 0 : index
    %c0_561 = arith.constant 0 : index
    %633 = vector.load %arg5[%c0_558, %c0_559, %632, %c0_560, %c0_561] : memref<1x4x9x9x3xbf16, #tpu.memory_space<vmem>>, vector<1x1x1x7x3xbf16>
    %634 = vector.shape_cast %633 : vector<1x1x1x7x3xbf16> to vector<1x7x3xbf16>
    %635 = vector.shape_cast %634 : vector<1x7x3xbf16> to vector<7x3xbf16>
    %c70 = arith.constant 70 : index
    %c0_562 = arith.constant 0 : index
    %c0_563 = arith.constant 0 : index
    %636 = vector.load %arg6[%c70, %c0_562, %c0_563] : memref<75x3x64xbf16, #tpu.memory_space<vmem>>, vector<1x3x64xbf16>
    %637 = vector.shape_cast %636 : vector<1x3x64xbf16> to vector<3x64xbf16>
    %cst_564 = arith.constant dense<0.000000e+00> : vector<7x64xf32>
    %638 = tpu.matmul %635, %637, %cst_564 {dimension_numbers = #tpu.dot_dimension_numbers<[1], [0], [0], [1], [0, 0, 1, 1], [], []>} : vector<7x3xbf16>, vector<3x64xbf16>, vector<7x64xf32> -> vector<7x64xf32>
    %639 = arith.addf %630, %638 : vector<7x64xf32>
    %c2_i32_565 = arith.constant 2 : i32
    %640 = arith.addi %arg2, %c2_i32_565 : i32
    %c0_566 = arith.constant 0 : index
    %c1_567 = arith.constant 1 : index
    %641 = arith.index_cast %640 : i32 to index
    %c0_568 = arith.constant 0 : index
    %c0_569 = arith.constant 0 : index
    %642 = vector.load %arg5[%c0_566, %c1_567, %641, %c0_568, %c0_569] : memref<1x4x9x9x3xbf16, #tpu.memory_space<vmem>>, vector<1x1x1x7x3xbf16>
    %643 = vector.shape_cast %642 : vector<1x1x1x7x3xbf16> to vector<1x7x3xbf16>
    %644 = vector.shape_cast %643 : vector<1x7x3xbf16> to vector<7x3xbf16>
    %c71 = arith.constant 71 : index
    %c0_570 = arith.constant 0 : index
    %c0_571 = arith.constant 0 : index
    %645 = vector.load %arg6[%c71, %c0_570, %c0_571] : memref<75x3x64xbf16, #tpu.memory_space<vmem>>, vector<1x3x64xbf16>
    %646 = vector.shape_cast %645 : vector<1x3x64xbf16> to vector<3x64xbf16>
    %cst_572 = arith.constant dense<0.000000e+00> : vector<7x64xf32>
    %647 = tpu.matmul %644, %646, %cst_572 {dimension_numbers = #tpu.dot_dimension_numbers<[1], [0], [0], [1], [0, 0, 1, 1], [], []>} : vector<7x3xbf16>, vector<3x64xbf16>, vector<7x64xf32> -> vector<7x64xf32>
    %648 = arith.addf %639, %647 : vector<7x64xf32>
    %c2_i32_573 = arith.constant 2 : i32
    %649 = arith.addi %arg2, %c2_i32_573 : i32
    %c0_574 = arith.constant 0 : index
    %c0_575 = arith.constant 0 : index
    %650 = arith.index_cast %649 : i32 to index
    %c1_576 = arith.constant 1 : index
    %c0_577 = arith.constant 0 : index
    %651 = vector.load %arg5[%c0_574, %c0_575, %650, %c1_576, %c0_577] : memref<1x4x9x9x3xbf16, #tpu.memory_space<vmem>>, vector<1x1x1x7x3xbf16>
    %652 = vector.shape_cast %651 : vector<1x1x1x7x3xbf16> to vector<1x7x3xbf16>
    %653 = vector.shape_cast %652 : vector<1x7x3xbf16> to vector<7x3xbf16>
    %c72 = arith.constant 72 : index
    %c0_578 = arith.constant 0 : index
    %c0_579 = arith.constant 0 : index
    %654 = vector.load %arg6[%c72, %c0_578, %c0_579] : memref<75x3x64xbf16, #tpu.memory_space<vmem>>, vector<1x3x64xbf16>
    %655 = vector.shape_cast %654 : vector<1x3x64xbf16> to vector<3x64xbf16>
    %cst_580 = arith.constant dense<0.000000e+00> : vector<7x64xf32>
    %656 = tpu.matmul %653, %655, %cst_580 {dimension_numbers = #tpu.dot_dimension_numbers<[1], [0], [0], [1], [0, 0, 1, 1], [], []>} : vector<7x3xbf16>, vector<3x64xbf16>, vector<7x64xf32> -> vector<7x64xf32>
    %657 = arith.addf %648, %656 : vector<7x64xf32>
    %c2_i32_581 = arith.constant 2 : i32
    %658 = arith.addi %arg2, %c2_i32_581 : i32
    %c0_582 = arith.constant 0 : index
    %c1_583 = arith.constant 1 : index
    %659 = arith.index_cast %658 : i32 to index
    %c1_584 = arith.constant 1 : index
    %c0_585 = arith.constant 0 : index
    %660 = vector.load %arg5[%c0_582, %c1_583, %659, %c1_584, %c0_585] : memref<1x4x9x9x3xbf16, #tpu.memory_space<vmem>>, vector<1x1x1x7x3xbf16>
    %661 = vector.shape_cast %660 : vector<1x1x1x7x3xbf16> to vector<1x7x3xbf16>
    %662 = vector.shape_cast %661 : vector<1x7x3xbf16> to vector<7x3xbf16>
    %c73 = arith.constant 73 : index
    %c0_586 = arith.constant 0 : index
    %c0_587 = arith.constant 0 : index
    %663 = vector.load %arg6[%c73, %c0_586, %c0_587] : memref<75x3x64xbf16, #tpu.memory_space<vmem>>, vector<1x3x64xbf16>
    %664 = vector.shape_cast %663 : vector<1x3x64xbf16> to vector<3x64xbf16>
    %cst_588 = arith.constant dense<0.000000e+00> : vector<7x64xf32>
    %665 = tpu.matmul %662, %664, %cst_588 {dimension_numbers = #tpu.dot_dimension_numbers<[1], [0], [0], [1], [0, 0, 1, 1], [], []>} : vector<7x3xbf16>, vector<3x64xbf16>, vector<7x64xf32> -> vector<7x64xf32>
    %666 = arith.addf %657, %665 : vector<7x64xf32>
    %c2_i32_589 = arith.constant 2 : i32
    %667 = arith.addi %arg2, %c2_i32_589 : i32
    %c0_590 = arith.constant 0 : index
    %c0_591 = arith.constant 0 : index
    %668 = arith.index_cast %667 : i32 to index
    %c2_592 = arith.constant 2 : index
    %c0_593 = arith.constant 0 : index
    %669 = vector.load %arg5[%c0_590, %c0_591, %668, %c2_592, %c0_593] : memref<1x4x9x9x3xbf16, #tpu.memory_space<vmem>>, vector<1x1x1x7x3xbf16>
    %670 = vector.shape_cast %669 : vector<1x1x1x7x3xbf16> to vector<1x7x3xbf16>
    %671 = vector.shape_cast %670 : vector<1x7x3xbf16> to vector<7x3xbf16>
    %c74 = arith.constant 74 : index
    %c0_594 = arith.constant 0 : index
    %c0_595 = arith.constant 0 : index
    %672 = vector.load %arg6[%c74, %c0_594, %c0_595] : memref<75x3x64xbf16, #tpu.memory_space<vmem>>, vector<1x3x64xbf16>
    %673 = vector.shape_cast %672 : vector<1x3x64xbf16> to vector<3x64xbf16>
    %cst_596 = arith.constant dense<0.000000e+00> : vector<7x64xf32>
    %674 = tpu.matmul %671, %673, %cst_596 {dimension_numbers = #tpu.dot_dimension_numbers<[1], [0], [0], [1], [0, 0, 1, 1], [], []>} : vector<7x3xbf16>, vector<3x64xbf16>, vector<7x64xf32> -> vector<7x64xf32>
    %675 = arith.addf %666, %674 : vector<7x64xf32>
    %cst_597 = arith.constant 0.000000e+00 : f32
    %676 = vector.broadcast %cst_597 : f32 to vector<7x64xf32>
    %677 = arith.cmpf ogt, %675, %676 : vector<7x64xf32>
    %cst_598 = arith.constant 2.000000e-01 : f32
    %678 = vector.broadcast %cst_598 : f32 to vector<7x64xf32>
    %679 = arith.mulf %678, %675 : vector<7x64xf32>
    %680 = arith.select %677, %675, %679 : vector<7x64xi1>, vector<7x64xf32>
    %681 = arith.truncf %680 : vector<7x64xf32> to vector<7x64xbf16>
    %c0_599 = arith.constant 0 : index
    %c0_600 = arith.constant 0 : index
    %c0_601 = arith.constant 0 : index
    %c0_602 = arith.constant 0 : index
    %682 = vector.load %arg7[%c0_599, %c0_600, %c0_601, %c0_602] : memref<1x1x7x64xbf16, #tpu.memory_space<vmem>>, vector<1x1x7x64xbf16>
    %683 = vector.shape_cast %682 : vector<1x1x7x64xbf16> to vector<7x64xbf16>
    %684 = vector.shape_cast %681 : vector<7x64xbf16> to vector<1x1x7x64xbf16>
    tpu.vector_store %arg7[%c0_599, %c0_600, %c0_601, %c0_602], %684 {strides = array<i32>} : memref<1x1x7x64xbf16, #tpu.memory_space<vmem>>, vector<1x1x7x64xbf16>,
    return
  }
  func.func @transform_0(%arg0: i32, %arg1: i32, %arg2: i32) -> (i32, i32, i32, i32, i32) {
    %c0_i32 = arith.constant 0 : i32
    %0 = arith.addi %arg1, %c0_i32 : i32
    %c0_i32_0 = arith.constant 0 : i32
    %c0_i32_1 = arith.constant 0 : i32
    %c0_i32_2 = arith.constant 0 : i32
    %c0_i32_3 = arith.constant 0 : i32
    %c0_i32_4 = arith.constant 0 : i32
    return %0, %c0_i32_0, %c0_i32_1, %c0_i32_2, %c0_i32_3 : i32, i32, i32, i32, i32
  }
  func.func @transform_1(%arg0: i32, %arg1: i32, %arg2: i32) -> (i32, i32, i32, i32, i32) {
    %c1_i32 = arith.constant 1 : i32
    %0 = arith.addi %arg1, %c1_i32 : i32
    %c0_i32 = arith.constant 0 : i32
    %c0_i32_0 = arith.constant 0 : i32
    %c0_i32_1 = arith.constant 0 : i32
    %c0_i32_2 = arith.constant 0 : i32
    %c0_i32_3 = arith.constant 0 : i32
    return %0, %c0_i32, %c0_i32_0, %c0_i32_1, %c0_i32_2 : i32, i32, i32, i32, i32
  }
  func.func @transform_2(%arg0: i32, %arg1: i32, %arg2: i32) -> (i32, i32, i32, i32, i32) {
    %c2_i32 = arith.constant 2 : i32
    %0 = arith.addi %arg1, %c2_i32 : i32
    %c0_i32 = arith.constant 0 : i32
    %c0_i32_0 = arith.constant 0 : i32
    %c0_i32_1 = arith.constant 0 : i32
    %c0_i32_2 = arith.constant 0 : i32
    %c0_i32_3 = arith.constant 0 : i32
    return %0, %c0_i32, %c0_i32_0, %c0_i32_1, %c0_i32_2 : i32, i32, i32, i32, i32
  }
  func.func @transform_3(%arg0: i32, %arg1: i32, %arg2: i32) -> (i32, i32, i32) {
    %c0_i32 = arith.constant 0 : i32
    %c0_i32_0 = arith.constant 0 : i32
    %c0_i32_1 = arith.constant 0 : i32
    return %c0_i32, %c0_i32_0, %arg0 : i32, i32, i32
  }
  func.func @transform_4(%arg0: i32, %arg1: i32, %arg2: i32) -> (i32, i32, i32, i32) {
    %c0_i32 = arith.constant 0 : i32
    %c0_i32_0 = arith.constant 0 : i32
    return %arg1, %arg2, %c0_i32, %arg0 : i32, i32, i32, i32
  }
}

</mosaic_0001>

<bundles_post_ra>
// kernel: tpu_custom_call.1
= control target key start
LH: loop header
LB: loop body
LE: loop exit
PB: predicated region body
PF: predicated region fallthrough
CT: control target
= control target key end

     0   :  { %s3204_s15 = smov 0   ;;  %s3206_s16 = smov 0   ;;  %s3722_s0 = inlined_call_operand.vmem [shape: bf16[6,4,9,9,3], index: 0, kind: input, shape index: {}]   ;;  %s3723_s1 = inlined_call_operand.vmem [shape: bf16[6,4,9,9,3], index: 1, kind: input, shape index: {}]   ;;  %s3724_s2 = inlined_call_operand.vmem [shape: bf16[6,4,9,9,3], index: 2, kind: input, shape index: {}]   ;;  %s3725_s3 = inlined_call_operand.vmem [shape: bf16[75,3,64], index: 3, kind: input, shape index: {}]   ;;  %s3726_s4 = inlined_call_operand.vmem [shape: bf16[4,7,7,64], index: 4, kind: output, shape index: {}]  }
   0x1   :  { %s3208_s17 = smov 0   ;;  %s3210_s18 = smov 0  }
   0x2   :  { %s3212_s19 = smov 0  }
   0x3 LB: > { %s26_s20 = sadd.s32 1, %s3168_s17  ;;  %s29_s21 = sadd.s32 1, %s3172_s18  ;;  %s3176_s19 = sphi %s3212_s19, %s14_s19   ;;  %s3172_s18 = sphi %s3210_s18, %s3730_s18   ;;  %s3168_s17 = sphi %s3208_s17, %s3729_s17   ;;  %s3164_s16 = sphi %s3206_s16, %s3728_s16   ;;  %s3160_s15 = sphi %s3204_s15, %s3727_s15  }
   0x4   : > { %p27_p0 = scmp.ge.s32.totalorder %s26_s20, 7  ;;  %p2735_p1 = scmp.ge.s32.totalorder %s3176_s19, 1 }
   0x5   : > { %p222_p2 = scmp.lt.s32.totalorder %s3176_s19, 29 }
   0x6   : > { %s3732_s20 = smov (%p27_p0, %s26_s20), 0  ;;  %s3734_s21 = smov (!%p27_p0, %s29_s21), %s3172_s18 }
   0x7   : > { %p223_p3 = pnand %p2735_p1, %p222_p2  ;;  %p31_p4 = scmp.ge.s32.totalorder %s3734_s21, 4 }
   0x8   : > { %p270_p5 = scmp.lt.s32.totalorder (!%p223_p3), %s3164_s16, 5  ;;  %s3265_s10 = sshll.u32 (!%p223_p3), %s3160_s15, 3 }
   0x9   : > { %s3736_s21 = smov (%p31_p4, %s3734_s21), 0  ;;  %226 = sbr.rel (%p223_p3) target bundleno = 460 (0x1cc), region = 36 }
   0xa   : > { %s275_s27 = sadd.s32 (!%p223_p3), 1, %s3164_s16  ;;  %p293_p8 = scmp.lt.s32.totalorder (!%p223_p3), %s3164_s16, 3 }
   0xb   : > { %p276_p6 = scmp.lt.s32.totalorder (!%p223_p3), %s275_s27, 5  ;;  %p295_p9 = scmp.lt.s32.totalorder (!%p223_p3), %s3160_s15, 6 }
   0xe   : > { %v2745_v0 = vld [vmem:[%s3725_s3 + $0x2] sm:$0x3]  ;;  %vm320_vm0 = vcmask 1040384   ;;  %vm321_vm1 = vcmask 1041408   ;;  %v3178_v1 = vmov 65535   ;;  %s271_s26 = scalar_select %p270_p5, %s3164_s16, 5 }
   0xf   : > { %v322_v2 = vsel %vm320_vm0, 4294967295, %v3178_v1  ;;  %v309_v3 = vld [vmem:[%s3725_s3] sm:$0x3]  ;;  %v2748_v5 = vld [vmem:[%s3725_s3 + $0x4] sm:$0x3]  ;;  %vm316_vm2 = vcmask 23552  }
  0x10   : > { %v3245_v4 = vsel %vm321_vm1, %v322_v2, 0  ;;  %v2750_v6 = vld [vmem:[%s3725_s3 + $0x6] sm:$0x3]  ;;  %v2766_v11 = vld [vmem:[%s3725_s3 + $0xc] sm:$0x3]  ;;  %s3093_s9 = smul.u32 288, %s271_s26 }
  0x11   : > { %v325_v7 = vand.u32 %v2745_v0, %v3245_v4  ;;  %v344_v8 = vand.u32 %v3245_v4, %v309_v3  ;;  %v375_v9 = vand.u32 %v2748_v5, %v3245_v4  ;;  %v407_v10 = vand.u32 %v2750_v6, %v3245_v4  ;;  %v2752_v12 = vld [vmem:[%s3725_s3 + $0x8] sm:$0x3]  ;;  %v2761_v15 = vld [vmem:[%s3725_s3 + $0xa] sm:$0x3]  ;;  %v2768_v16 = vld [vmem:[%s3725_s3 + $0xe] sm:$0x3] }
  0x12   : > { %v489_v13 = vand.u32 %v2766_v11, %v3245_v4  ;;  %v437_v14 = vand.u32 %v2752_v12, %v3245_v4  ;;  %v463_v17 = vand.u32 %v2761_v15, %v3245_v4  ;;  %v521_v18 = vand.u32 %v2768_v16, %v3245_v4  ;;  %v2770_v19 = vld [vmem:[%s3725_s3 + $0x10] sm:$0x3]  ;;  %s274_s26 = scalar_lea.vmem %s3722_s0, %s3093_s9  ;;  %v2774_v21 = vld [vmem:[%s3725_s3 + $0x12] sm:$0x3]  ;;  %v2782_v30 = vld [vmem:[%s3725_s3 + $0x14] sm:$0x3] }
  0x13   : > { %334 = vmatpush.bf16.msra.mxu0 %v325_v7  ;;  %353 = vmatpush.bf16.msra.mxu1 %v344_v8  ;;  %v553_v20 = vand.u32 %v2770_v19, %v3245_v4  ;;  %s3288_s29 = scalar_lea.vmem %s274_s26, %s3265_s10  ;;  %v583_v22 = vand.u32 %v2774_v21, %v3245_v4  ;;  %v2787_v35 = vld [vmem:[%s3725_s3 + $0x16] sm:$0x3]  ;;  %v610_v41 = vand.u32 %v2782_v30, %v3245_v4  ;;  %v2789_v48 = vld [vmem:[%s3725_s3 + $0x18] sm:$0x3]  ;;  %v2791_v49 = vld [vmem:[%s3725_s3 + $0x1a] sm:$0x3] }
  0x14   : > { %384 = vmatpush.bf16.msra.mxu2 %v375_v9  ;;  %416 = vmatpush.bf16.msra.mxu3 %v407_v10  ;;  %v2744_v23 = vld [vmem:[%s3288_s29 + $0x48] sm:$0xf]  ;;  %v308_v24 = vld [vmem:[%s3288_s29] sm:$0xf]  ;;  %v2760_v29 = vld [vmem:[%s3288_s29 + $0x90] sm:$0xf]  ;;  %v636_v42 = vand.u32 %v2787_v35, %v3245_v4  ;;  %v668_v52 = vand.u32 %v2789_v48, %v3245_v4  ;;  %v700_v53 = vand.u32 %v2791_v49, %v3245_v4 }
  0x15   : > { %v394_v25 = vunpack.c.l.b16 %v2744_v23  ;;  %v362_v26 = vunpack.c.l.b16 %v308_v24  ;;  %v2755_v36 = vld [vmem:[%s3288_s29] sm:$0xe]  ;;  %v3056_v37 = vld [vmem:[%s3288_s29] sm:$0x10]  ;;  %v508_v40 = vunpack.c.l.b16 %v2760_v29  ;;  %v2765_v46 = vld [vmem:[%s3288_s29 + $0xd8] sm:$0xf] }
  0x16   : > { %2746 = vmatmul.msk.bf16.vlgmr.msra.gmra.mxu0 %vm316_vm2, %v2744_v23  ;;  %2747 = vmatmul.msk.bf16.vlgmr.msra.gmra.mxu1 %vm316_vm2, %v308_v24  ;;  %v2756_v45 = vor.u32 %v3056_v37, %v2755_v36  ;;  %v540_v51 = vunpack.c.l.b16 %v2765_v46  ;;  %v2795_v59 = vld [vmem:[%s3725_s3 + $0x1c] sm:$0x3]  ;;  %v2804_v60 = vld [vmem:[%s3725_s3 + $0x1e] sm:$0x3]  ;;  %v2777_v61 = vld [vmem:[%s3288_s29 + $0x90] sm:$0xe] }
  0x17   : > { %446 = vmatpush.bf16.msrb.mxu0 %v437_v14  ;;  %472 = vmatpush.bf16.msrb.mxu1 %v463_v17  ;;  %v395_v27 = vpack.c.b16 %v394_v25, %v394_v25  ;;  %v363_v28 = vpack.c.b16 %v362_v26, %v362_v26  ;;  %v509_v47 = vpack.c.b16 %v508_v40, %v508_v40  ;;  %v3059_v62 = vld [vmem:[%s3288_s29 + $0x90] sm:$0x10]  ;;  %v2781_v6 = vld [vmem:[%s3288_s29 + $0x8] sm:$0xf]  ;;  %v2786_v7 = vld [vmem:[%s3288_s29 + $0x50] sm:$0xf] }
  0x18   : > { %498 = vmatpush.bf16.msrb.mxu2 %v489_v13  ;;  %530 = vmatpush.bf16.msrb.mxu3 %v521_v18  ;;  %v432_v50 = vrot.slane %v2756_v45, 1  ;;  %v541_v55 = vpack.c.b16 %v540_v51, %v540_v51  ;;  %v730_v0 = vand.u32 %v2795_v59, %v3245_v4  ;;  %v756_v1 = vand.u32 %v2804_v60, %v3245_v4  ;;  %v2809_v8 = vld [vmem:[%s3725_s3 + $0x20] sm:$0x3]  ;;  %v2811_v9 = vld [vmem:[%s3725_s3 + $0x22] sm:$0x3]  ;;  %s3738_s27 = smov (!%p276_p6, %s275_s27), 5 }
  0x19   : > { %v397_v31 = vshrl.u32 %v395_v27, 16  ;;  %v399_v32 = vshll.u32 %v395_v27, 16  ;;  %v365_v33 = vshrl.u32 %v363_v28, 16  ;;  %v367_v34 = vshll.u32 %v363_v28, 16  ;;  %v2817_v21 = vld [vmem:[%s3725_s3 + $0x26] sm:$0x3] }
  0x1a   : > { %v513_v54 = vshll.u32 %v509_v47, 16  ;;  %v511_v56 = vshrl.u32 %v509_v47, 16  ;;  %v545_v58 = vshll.u32 %v541_v55, 16  ;;  %v543_v2 = vshrl.u32 %v541_v55, 16  ;;  %v2803_v28 = vld [vmem:[%s3288_s29 + $0x98] sm:$0xf] }
  0x1b   : > { %562 = vmatpush.bf16.msra.mxu0 %v553_v20  ;;  %592 = vmatpush.bf16.msra.mxu1 %v583_v22  ;;  %v401_v38 = vrot.slane %v399_v32, 1  ;;  %v369_v39 = vrot.slane %v367_v34, 1  ;;  %v2778_v5 = vor.u32 %v3059_v62, %v2777_v61  ;;  %v655_v12 = vunpack.c.l.b16 %v2781_v6  ;;  %v2813_v20 = vld [vmem:[%s3725_s3 + $0x24] sm:$0x3]  ;;  %v2830_v30 = vld [vmem:[%s3725_s3 + $0x2a] sm:$0x3] }
  0x1c   : > { %v515_v57 = vrot.slane %v513_v54, 1  ;;  %v547_v3 = vrot.slane %v545_v58, 1  ;;  %v687_v13 = vunpack.c.l.b16 %v2786_v7  ;;  %v782_v14 = vand.u32 %v2809_v8, %v3245_v4  ;;  %v2798_v36 = vld [vmem:[%s3288_s29 + $0x8] sm:$0xe]  ;;  %v3061_v37 = vld [vmem:[%s3288_s29 + $0x8] sm:$0x10] }
  0x1d   : > { %v370_v43 = vor.u32 %v369_v39, %v365_v33  ;;  %v402_v44 = vor.u32 %v401_v38, %v397_v31  ;;  %v578_v11 = vrot.slane %v2778_v5, 1  ;;  %v814_v15 = vand.u32 %v2811_v9, %v3245_v4  ;;  %v2808_v40 = vld [vmem:[%s3288_s29 + $0xe0] sm:$0xf]  ;;  %v2838_v51 = vld [vmem:[%s3725_s3 + $0x30] sm:$0x3]  ;;  %s3094_s7 = smul.u32 288, %s3738_s27 }
  0x1e   : > { %v516_v63 = vor.u32 %v515_v57, %v511_v56  ;;  %v548_v10 = vor.u32 %v547_v3, %v543_v2  ;;  %v656_v16 = vpack.c.b16 %v655_v12, %v655_v12  ;;  %v688_v17 = vpack.c.b16 %v687_v13, %v687_v13  ;;  %v2820_v57 = vld [vmem:[%s3288_s29 + $0x98] sm:$0xe]  ;;  %v3064_v58 = vld [vmem:[%s3288_s29 + $0x98] sm:$0x10]  ;;  %v2824_v62 = vld [vmem:[%s3288_s29 + $0x10] sm:$0xf] }
  0x1f   : > { %2749 = vmatmul.msk.bf16.vlgmr.msra.gmra.mxu2 %vm316_vm2, %v370_v43  ;;  %2751 = vmatmul.msk.bf16.vlgmr.msra.gmra.mxu3 %vm316_vm2, %v402_v44  ;;  %v846_v22 = vand.u32 %v2813_v20, %v3245_v4  ;;  %v876_v23 = vand.u32 %v2817_v21, %v3245_v4  ;;  %v801_v33 = vunpack.c.l.b16 %v2803_v28  ;;  %v929_v35 = vand.u32 %v2830_v30, %v3245_v4  ;;  %v2834_v43 = vld [vmem:[%s3725_s3 + $0x2e] sm:$0x3]  ;;  %v2856_v12 = vld [vmem:[%s3725_s3 + $0x3a] sm:$0x3]  ;;  %s280_s22 = scalar_lea.vmem %s3723_s1, %s3094_s7  ;;  %s3744_s15 = smov (!%p295_p9, %s3160_s15), 6 }
  0x20   : > { %619 = vmatpush.bf16.msra.mxu2 %v610_v41  ;;  %645 = vmatpush.bf16.msra.mxu3 %v636_v42  ;;  %v660_v18 = vshll.u32 %v656_v16, 16  ;;  %v692_v19 = vshll.u32 %v688_v17, 16  ;;  %v658_v24 = vshrl.u32 %v656_v16, 16  ;;  %v690_v26 = vshrl.u32 %v688_v17, 16  ;;  %v2832_v42 = vld [vmem:[%s3725_s3 + $0x2c] sm:$0x3]  ;;  %s3416_s23 = scalar_lea.vmem %s280_s22, %s3265_s10 }
  0x21   : > { %v802_v38 = vpack.c.b16 %v801_v33, %v801_v33  ;;  %v2799_v39 = vor.u32 %v3061_v37, %v2798_v36  ;;  %v833_v45 = vunpack.c.l.b16 %v2808_v40  ;;  %v993_v47 = vand.u32 %v2834_v43, %v3245_v4  ;;  %v1041_v21 = vld [vmem:[%s3416_s23] sm:$0xf] }
  0x22   : > { %v662_v25 = vrot.slane %v660_v18, 1  ;;  %v694_v27 = vrot.slane %v692_v19, 1  ;;  %v1023_v54 = vand.u32 %v2838_v51, %v3245_v4  ;;  %v2821_v61 = vor.u32 %v3064_v58, %v2820_v57  ;;  %v2891_v57 = vld [vmem:[%s3725_s3 + $0x48] sm:$0x3] }
  0x23   : > { %v806_v41 = vshll.u32 %v802_v38, 16  ;;  %v725_v44 = vrot.slane %v2799_v39, 1  ;;  %v804_v48 = vshrl.u32 %v802_v38, 16  ;;  %v948_v5 = vunpack.c.l.b16 %v2824_v62 }
  0x24   : > { %v663_v31 = vor.u32 %v662_v25, %v658_v24  ;;  %v695_v32 = vor.u32 %v694_v27, %v690_v26  ;;  %v871_v3 = vrot.slane %v2821_v61, 1  ;;  %v2841_v24 = vld [vmem:[%s3288_s29 + $0x10] sm:$0xe]  ;;  %v3066_v25 = vld [vmem:[%s3288_s29 + $0x10] sm:$0x10]  ;;  %vm2483_vm3 = vcmask 519168  }
  0x25   : > { %v808_v49 = vrot.slane %v806_v41, 1  ;;  %v949_v9 = vpack.c.b16 %v948_v5, %v948_v5  ;;  %vm2484_vm4 = vsmask.f32 3328 }
  0x26   : > { %2757 = vmatmul.msk.bf16.vlgmr.msrb.gmra.mxu0 %vm316_vm2, %v432_v50  ;;  %2762 = vmatmul.msk.bf16.vlgmr.msrb.gmra.mxu1 %vm316_vm2, %v2760_v29  ;;  %v2825_v29 = vld [vmem:[%s3725_s3 + $0x28] sm:$0x3]  ;;  %v834_v50 = vpack.c.b16 %v833_v45, %v833_v45  ;;  %v2878_v45 = vld [vmem:[%s3725_s3 + $0x44] sm:$0x3]  ;;  %vm2485_vm6 = vmand %vm2483_vm3, %vm2484_vm4 }
  0x27   : > { %677 = vmatpush.bf16.msrb.mxu0 %v668_v52  ;;  %709 = vmatpush.bf16.msrb.mxu1 %v700_v53  ;;  %v903_v34 = vand.u32 %v2825_v29, %v3245_v4  ;;  %v2845_v52 = vld [vmem:[%s3725_s3 + $0x32] sm:$0x3]  ;;  %v809_v53 = vor.u32 %v808_v49, %v804_v48  ;;  %v951_v17 = vshrl.u32 %v949_v9, 16  ;;  %v3069_v48 = vld [vmem:[%s3416_s23] sm:$0x10] }
  0x28   : > { %v1048_v55 = vand.u32 %v2845_v52, %v3245_v4  ;;  %v838_v56 = vshll.u32 %v834_v50, 16  ;;  %v836_v59 = vshrl.u32 %v834_v50, 16  ;;  %v1311_v50 = vand.u32 %v2878_v45, %v3245_v4 }
  0x2a   : > { %v840_v60 = vrot.slane %v838_v56, 1  ;;  %v2869_v56 = vld [vmem:[%s3416_s23 + $0xd8] sm:$0xf] }
  0x2b   : > { %v1268_v61 = vunpack.c.l.b16 %v2869_v56 }
  0x2c   : > { %v841_v2 = vor.u32 %v840_v60, %v836_v59 }
  0x2f   : > { %2767 = vmatmul.msk.bf16.vlgmr.msrb.gmra.mxu2 %vm316_vm2, %v2765_v46  ;;  %2769 = vmatmul.msk.bf16.vlgmr.msrb.gmra.mxu3 %vm316_vm2, %v516_v63  ;;  %v961_v46 = vand.u32 %v2832_v42, %v3245_v4  ;;  %v2829_v63 = vld [vmem:[%s3288_s29 + $0x58] sm:$0xf]  ;;  %s282_s29 = sadd.s32 2, %s3164_s16  ;;  %s3742_s16 = smov (!%p293_p8, %s3164_s16), 3 }
  0x30   : > { %739 = vmatpush.bf16.msrb.mxu2 %v730_v0  ;;  %765 = vmatpush.bf16.msrb.mxu3 %v756_v1  ;;  %v2850_v0 = vld [vmem:[%s3725_s3 + $0x34] sm:$0x3]  ;;  %v2852_v1 = vld [vmem:[%s3725_s3 + $0x36] sm:$0x3]  ;;  %p283_p7 = scmp.lt.s32.totalorder %s282_s29, 5 }
  0x31   : > { %v1105_v8 = vand.u32 %v2852_v1, %v3245_v4 }
  0x32   : > { %s3740_s29 = smov (!%p283_p7, %s282_s29), 5 }
  0x33   : > { %s3095_s14 = smul.u32 288, %s3740_s29 }
  0x35   : > { %s287_s25 = scalar_lea.vmem %s3724_s2, %s3095_s14 }
  0x36   : > { %2771 = vmatmul.msk.bf16.vlgmr.msra.gmra.mxu0 %vm316_vm2, %v548_v10  ;;  %2779 = vmatmul.msk.bf16.vlgmr.msra.gmra.mxu1 %vm316_vm2, %v578_v11  ;;  %v2854_v11 = vld [vmem:[%s3725_s3 + $0x38] sm:$0x3]  ;;  %s3571_s29 = scalar_lea.vmem %s287_s25, %s3265_s10 }
  0x37   : > { %791 = vmatpush.bf16.msra.mxu0 %v782_v14  ;;  %823 = vmatpush.bf16.msra.mxu1 %v814_v15  ;;  %v1137_v13 = vand.u32 %v2854_v11, %v3245_v4  ;;  %v1167_v14 = vand.u32 %v2856_v12, %v3245_v4  ;;  %v953_v15 = vshll.u32 %v949_v9, 16 }
  0x39   : > { %v955_v18 = vrot.slane %v953_v15, 1  ;;  %v2908_v15 = vld [vmem:[%s3725_s3 + $0x50] sm:$0x3] }
  0x3b   : > { %v956_v26 = vor.u32 %v955_v18, %v951_v17 }
  0x3f   : > { %2783 = vmatmul.msk.bf16.vlgmr.msra.gmra.mxu2 %vm316_vm2, %v2781_v6  ;;  %2788 = vmatmul.msk.bf16.vlgmr.msra.gmra.mxu3 %vm316_vm2, %v2786_v7  ;;  %v980_v6 = vunpack.c.l.b16 %v2829_v63  ;;  %v1073_v7 = vand.u32 %v2850_v0, %v3245_v4 }
  0x40   : > { %855 = vmatpush.bf16.msra.mxu2 %v846_v22  ;;  %885 = vmatpush.bf16.msra.mxu3 %v876_v23  ;;  %v2865_v22 = vld [vmem:[%s3725_s3 + $0x3c] sm:$0x3]  ;;  %v2870_v23 = vld [vmem:[%s3725_s3 + $0x3e] sm:$0x3] }
  0x41   : > { %v981_v10 = vpack.c.b16 %v980_v6, %v980_v6  ;;  %v1192_v29 = vand.u32 %v2865_v22, %v3245_v4  ;;  %v1217_v30 = vand.u32 %v2870_v23, %v3245_v4  ;;  %v2895_v6 = vld [vmem:[%s3725_s3 + $0x4c] sm:$0x3]  ;;  %v2913_v23 = vld [vmem:[%s3725_s3 + $0x52] sm:$0x3] }
  0x43   : > { %v985_v16 = vshll.u32 %v981_v10, 16  ;;  %v983_v19 = vshrl.u32 %v981_v10, 16 }
  0x45   : > { %v987_v20 = vrot.slane %v985_v16, 1 }
  0x46   : > { %2790 = vmatmul.msk.bf16.vlgmr.msrb.gmra.mxu0 %vm316_vm2, %v663_v31  ;;  %2792 = vmatmul.msk.bf16.vlgmr.msrb.gmra.mxu1 %vm316_vm2, %v695_v32  ;;  %v2842_v31 = vor.u32 %v3066_v25, %v2841_v24  ;;  %v2849_v32 = vld [vmem:[%s3416_s23 + $0x48] sm:$0xf]  ;;  %v2881_v24 = vld [vmem:[%s3416_s23 + $0x90] sm:$0xe]  ;;  %v3072_v25 = vld [vmem:[%s3416_s23 + $0x90] sm:$0x10] }
  0x47   : > { %912 = vmatpush.bf16.msrb.mxu0 %v903_v34  ;;  %938 = vmatpush.bf16.msrb.mxu1 %v929_v35  ;;  %v988_v27 = vor.u32 %v987_v20, %v983_v19  ;;  %v2872_v34 = vld [vmem:[%s3725_s3 + $0x40] sm:$0x3]  ;;  %v2874_v35 = vld [vmem:[%s3725_s3 + $0x42] sm:$0x3]  ;;  %v1124_v37 = vunpack.c.l.b16 %v2849_v32 }
  0x48   : > { %v1018_v36 = vrot.slane %v2842_v31, 1  ;;  %v1249_v38 = vand.u32 %v2872_v34, %v3245_v4  ;;  %v1281_v39 = vand.u32 %v2874_v35, %v3245_v4  ;;  %v2915_v31 = vld [vmem:[%s3725_s3 + $0x54] sm:$0x3] }
  0x49   : > { %v1125_v41 = vpack.c.b16 %v1124_v37, %v1124_v37  ;;  %v1537_v37 = vand.u32 %v2915_v31, %v3245_v4  ;;  %v2928_v31 = vld [vmem:[%s3416_s23 + $0x10] sm:$0xf] }
  0x4b   : > { %v1127_v52 = vshrl.u32 %v1125_v41, 16 }
  0x4f   : > { %2800 = vmatmul.msk.bf16.vlgmr.msrb.gmra.mxu2 %vm316_vm2, %v725_v44  ;;  %2805 = vmatmul.msk.bf16.vlgmr.msrb.gmra.mxu3 %vm316_vm2, %v2803_v28  ;;  %v1092_v28 = vunpack.c.l.b16 %v1041_v21  ;;  %v1129_v44 = vshll.u32 %v1125_v41, 16 }
  0x50   : > { %970 = vmatpush.bf16.msrb.mxu2 %v961_v46  ;;  %1002 = vmatpush.bf16.msrb.mxu3 %v993_v47  ;;  %v2886_v46 = vld [vmem:[%s3725_s3 + $0x46] sm:$0x3]  ;;  %v2859_v47 = vld [vmem:[%s3416_s23] sm:$0xe] }
  0x51   : > { %v1093_v33 = vpack.c.b16 %v1092_v28, %v1092_v28  ;;  %v1336_v51 = vand.u32 %v2886_v46, %v3245_v4  ;;  %v2882_v28 = vor.u32 %v3072_v25, %v2881_v24 }
  0x53   : > { %v1095_v42 = vshrl.u32 %v1093_v33, 16  ;;  %v1306_v35 = vrot.slane %v2882_v28, 1 }
  0x56   : > { %2810 = vmatmul.msk.bf16.vlgmr.msra.gmra.mxu0 %vm316_vm2, %v2808_v40  ;;  %2812 = vmatmul.msk.bf16.vlgmr.msra.gmra.mxu1 %vm316_vm2, %v809_v53  ;;  %v1097_v40 = vshll.u32 %v1093_v33, 16  ;;  %v1131_v53 = vrot.slane %v1129_v44, 1 }
  0x57   : > { %1032 = vmatpush.bf16.msra.mxu0 %v1023_v54  ;;  %1057 = vmatpush.bf16.msra.mxu1 %v1048_v55  ;;  %v2860_v54 = vor.u32 %v3069_v48, %v2859_v47  ;;  %v2864_v55 = vld [vmem:[%s3416_s23 + $0x90] sm:$0xf] }
  0x58   : > { %v1099_v43 = vrot.slane %v1097_v40, 1  ;;  %v1132_v58 = vor.u32 %v1131_v53, %v1127_v52  ;;  %v1236_v60 = vunpack.c.l.b16 %v2864_v55  ;;  %v2902_v52 = vld [vmem:[%s3416_s23 + $0x8] sm:$0xe]  ;;  %v3074_v53 = vld [vmem:[%s3416_s23 + $0x8] sm:$0x10] }
  0x59   : > { %v1162_v59 = vrot.slane %v2860_v54, 1 }
  0x5a   : > { %v1100_v49 = vor.u32 %v1099_v43, %v1095_v42  ;;  %v1237_v1 = vpack.c.b16 %v1236_v60, %v1236_v60  ;;  %v2921_v42 = vld [vmem:[%s3725_s3 + $0x58] sm:$0x3] }
  0x5b   : > { %v1599_v46 = vand.u32 %v2921_v42, %v3245_v4  ;;  %v2907_v60 = vld [vmem:[%s3416_s23 + $0x98] sm:$0xf] }
  0x5c   : > { %v1239_v10 = vshrl.u32 %v1237_v1, 16 }
  0x5f   : > { %2814 = vmatmul.msk.bf16.vlgmr.msra.gmra.mxu2 %vm316_vm2, %v841_v2  ;;  %2822 = vmatmul.msk.bf16.vlgmr.msra.gmra.mxu3 %vm316_vm2, %v871_v3  ;;  %v1269_v2 = vpack.c.b16 %v1268_v61, %v1268_v61  ;;  %v1241_v3 = vshll.u32 %v1237_v1, 16  ;;  %v2912_v61 = vld [vmem:[%s3416_s23 + $0xe0] sm:$0xf] }
  0x60   : > { %1082 = vmatpush.bf16.msra.mxu2 %v1073_v7  ;;  %1114 = vmatpush.bf16.msra.mxu3 %v1105_v8  ;;  %v2899_v7 = vld [vmem:[%s3725_s3 + $0x4e] sm:$0x3]  ;;  %v1425_v8 = vand.u32 %v2895_v6, %v3245_v4 }
  0x61   : > { %v1273_v5 = vshll.u32 %v1269_v2, 16  ;;  %v1455_v9 = vand.u32 %v2899_v7, %v3245_v4  ;;  %v1243_v11 = vrot.slane %v1241_v3, 1  ;;  %v1271_v12 = vshrl.u32 %v1269_v2, 16 }
  0x63   : > { %v1244_v16 = vor.u32 %v1243_v11, %v1239_v10 }
  0x66   : > { %2826 = vmatmul.msk.bf16.vlgmr.msrb.gmra.mxu0 %vm316_vm2, %v2824_v62  ;;  %2831 = vmatmul.msk.bf16.vlgmr.msrb.gmra.mxu1 %vm316_vm2, %v2829_v63  ;;  %v1361_v62 = vand.u32 %v2891_v57, %v3245_v4  ;;  %v2893_v63 = vld [vmem:[%s3725_s3 + $0x4a] sm:$0x3] }
  0x67   : > { %1146 = vmatpush.bf16.msrb.mxu0 %v1137_v13  ;;  %1176 = vmatpush.bf16.msrb.mxu1 %v1167_v14  ;;  %v1393_v0 = vand.u32 %v2893_v63, %v3245_v4  ;;  %v1275_v13 = vrot.slane %v1273_v5, 1  ;;  %v2885_v14 = vld [vmem:[%s3416_s23 + $0x8] sm:$0xf]  ;;  %v2934_v63 = vld [vmem:[%s3725_s3 + $0x5c] sm:$0x3] }
  0x68   : > { %v1380_v18 = vunpack.c.l.b16 %v2885_v14  ;;  %v1649_v10 = vand.u32 %v2934_v63, %v3245_v4 }
  0x69   : > { %v1276_v17 = vor.u32 %v1275_v13, %v1271_v12 }
  0x6f   : > { %2833 = vmatmul.msk.bf16.vlgmr.msrb.gmra.mxu2 %vm316_vm2, %v956_v26  ;;  %2835 = vmatmul.msk.bf16.vlgmr.msrb.gmra.mxu3 %vm316_vm2, %v988_v27  ;;  %v1505_v26 = vand.u32 %v2913_v23, %v3245_v4  ;;  %v1381_v27 = vpack.c.b16 %v1380_v18, %v1380_v18  ;;  %v2942_v23 = vld [vmem:[%s3725_s3 + $0x62] sm:$0x3] }
  0x70   : > { %1201 = vmatpush.bf16.msrb.mxu2 %v1192_v29  ;;  %1226 = vmatpush.bf16.msrb.mxu3 %v1217_v30  ;;  %v2890_v29 = vld [vmem:[%s3416_s23 + $0x50] sm:$0xf]  ;;  %v1743_v24 = vand.u32 %v2942_v23, %v3245_v4 }
  0x71   : > { %v1385_v30 = vshll.u32 %v1381_v27, 16 }
  0x73   : > { %v1387_v40 = vrot.slane %v1385_v30, 1 }
  0x76   : > { %2843 = vmatmul.msk.bf16.vlgmr.msra.gmra.mxu0 %vm316_vm2, %v1018_v36  ;;  %2846 = vmatmul.msk.bf16.vlgmr.msra.gmra.mxu1 %vm316_vm2, %v1041_v21  ;;  %v1480_v21 = vand.u32 %v2908_v15, %v3245_v4  ;;  %v1412_v36 = vunpack.c.l.b16 %v2890_v29 }
  0x77   : > { %1258 = vmatpush.bf16.msra.mxu0 %v1249_v38  ;;  %1290 = vmatpush.bf16.msra.mxu1 %v1281_v39  ;;  %v1383_v39 = vshrl.u32 %v1381_v27, 16 }
  0x78   : > { %v1413_v41 = vpack.c.b16 %v1412_v36, %v1412_v36 }
  0x79   : > { %v1388_v43 = vor.u32 %v1387_v40, %v1383_v39 }
  0x7a   : > { %v1415_v57 = vshrl.u32 %v1413_v41, 16 }
  0x7f   : > { %2851 = vmatmul.msk.bf16.vlgmr.msra.gmra.mxu2 %vm316_vm2, %v2849_v32  ;;  %2853 = vmatmul.msk.bf16.vlgmr.msra.gmra.mxu3 %vm316_vm2, %v1100_v49  ;;  %v2917_v32 = vld [vmem:[%s3725_s3 + $0x56] sm:$0x3] }
  0x80   : > { %1320 = vmatpush.bf16.msra.mxu2 %v1311_v50  ;;  %1345 = vmatpush.bf16.msra.mxu3 %v1336_v51  ;;  %v1569_v38 = vand.u32 %v2917_v32, %v3245_v4  ;;  %v1417_v50 = vshll.u32 %v1413_v41, 16  ;;  %v2929_v51 = vld [vmem:[%s3725_s3 + $0x5a] sm:$0x3] }
  0x81   : > { %v1624_v54 = vand.u32 %v2929_v51, %v3245_v4 }
  0x86   : > { %2855 = vmatmul.msk.bf16.vlgmr.msrb.gmra.mxu0 %vm316_vm2, %v1132_v58  ;;  %2861 = vmatmul.msk.bf16.vlgmr.msrb.gmra.mxu1 %vm316_vm2, %v1162_v59  ;;  %v1419_v58 = vrot.slane %v1417_v50, 1  ;;  %v2903_v59 = vor.u32 %v3074_v53, %v2902_v52 }
  0x87   : > { %1370 = vmatpush.bf16.msrb.mxu0 %v1361_v62  ;;  %1402 = vmatpush.bf16.msrb.mxu1 %v1393_v0  ;;  %v2936_v0 = vld [vmem:[%s3725_s3 + $0x5e] sm:$0x3] }
  0x88   : > { %v1420_v3 = vor.u32 %v1419_v58, %v1415_v57  ;;  %v1450_v7 = vrot.slane %v2903_v59, 1  ;;  %v1681_v11 = vand.u32 %v2936_v0, %v3245_v4  ;;  %v2958_v59 = vld [vmem:[%s3725_s3 + $0x6a] sm:$0x3] }
  0x8f   : > { %2866 = vmatmul.msk.bf16.vlgmr.msrb.gmra.mxu2 %vm316_vm2, %v2864_v55  ;;  %2871 = vmatmul.msk.bf16.vlgmr.msrb.gmra.mxu3 %vm316_vm2, %v2869_v56 }
  0x90   : > { %1434 = vmatpush.bf16.msrb.mxu2 %v1425_v8  ;;  %1464 = vmatpush.bf16.msrb.mxu3 %v1455_v9  ;;  %v1524_v8 = vunpack.c.l.b16 %v2907_v60  ;;  %v1556_v9 = vunpack.c.l.b16 %v2912_v61 }
  0x92   : > { %v1525_v12 = vpack.c.b16 %v1524_v8, %v1524_v8  ;;  %v1557_v13 = vpack.c.b16 %v1556_v9, %v1556_v9  ;;  %v2945_v9 = vld [vmem:[%s3416_s23 + $0x10] sm:$0xe] }
  0x93   : > { %v336_v19 = vpop.f32.mrf.mxu0  ;;  %v355_v20 = vpop.f32.mrf.mxu1 }
  0x94   : > { %v356_v22 = vadd.f32 %v355_v20, %v336_v19 }
  0x96   : > { %2873 = vmatmul.msk.bf16.vlgmr.msra.gmra.mxu0 %vm316_vm2, %v1244_v16  ;;  %2875 = vmatmul.msk.bf16.vlgmr.msra.gmra.mxu1 %vm316_vm2, %v1276_v17 }
  0x97   : > { %1489 = vmatpush.bf16.msra.mxu0 %v1480_v21  ;;  %1514 = vmatpush.bf16.msra.mxu1 %v1505_v26  ;;  %v1529_v21 = vshll.u32 %v1525_v12, 16  ;;  %v1527_v26 = vshrl.u32 %v1525_v12, 16 }
  0x99   : > { %v1531_v28 = vrot.slane %v1529_v21, 1  ;;  %v2974_v21 = vld [vmem:[%s3725_s3 + $0x70] sm:$0x3] }
  0x9b   : > { %v338_v33 = vpop.f32.mrf.mxu0  ;;  %v357_v34 = vpop.f32.mrf.mxu1  ;;  %v1532_v39 = vor.u32 %v1531_v28, %v1527_v26  ;;  %v1937_v28 = vand.u32 %v2974_v21, %v3245_v4 }
  0x9c   : > { %v2949_v33 = vld [vmem:[%s3725_s3 + $0x64] sm:$0x3]  ;;  %v2954_v34 = vld [vmem:[%s3725_s3 + $0x66] sm:$0x3] }
  0x9f   : > { %2883 = vmatmul.msk.bf16.vlgmr.msra.gmra.mxu2 %vm316_vm2, %v1306_v35  ;;  %2887 = vmatmul.msk.bf16.vlgmr.msra.gmra.mxu3 %vm316_vm2, %v2885_v14  ;;  %v2938_v14 = vld [vmem:[%s3725_s3 + $0x60] sm:$0x3] }
  0xa0   : > { %1546 = vmatpush.bf16.msra.mxu2 %v1537_v37  ;;  %1578 = vmatpush.bf16.msra.mxu3 %v1569_v38  ;;  %v1713_v17 = vand.u32 %v2938_v14, %v3245_v4  ;;  %v2924_v37 = vld [vmem:[%s3416_s23 + $0x98] sm:$0xe]  ;;  %v3077_v38 = vld [vmem:[%s3416_s23 + $0x98] sm:$0x10] }
  0xa2   : > { %v386_v44 = vpop.f32.mrf.mxu2  ;;  %v418_v45 = vpop.f32.mrf.mxu3 }
  0xa3   : > { %v390_v47 = vadd.f32 %v386_v44, %v356_v22  ;;  %v448_v48 = vpop.f32.mrf.mxu0  ;;  %v474_v49 = vpop.f32.mrf.mxu1  ;;  %v1561_v22 = vshll.u32 %v1557_v13, 16  ;;  %v1768_v44 = vand.u32 %v2949_v33, %v3245_v4 }
  0xa5   : > { %v422_v55 = vadd.f32 %v418_v45, %v390_v47  ;;  %v1563_v30 = vrot.slane %v1561_v22, 1  ;;  %v1793_v45 = vand.u32 %v2954_v34, %v3245_v4  ;;  %v2933_v47 = vld [vmem:[%s3416_s23 + $0x58] sm:$0xf] }
  0xa6   : > { %2892 = vmatmul.msk.bf16.vlgmr.msrb.gmra.mxu0 %vm316_vm2, %v2890_v29  ;;  %2894 = vmatmul.msk.bf16.vlgmr.msrb.gmra.mxu1 %vm316_vm2, %v1388_v43  ;;  %v1559_v29 = vshrl.u32 %v1557_v13, 16  ;;  %v1668_v43 = vunpack.c.l.b16 %v2928_v31  ;;  %v1700_v51 = vunpack.c.l.b16 %v2933_v47 }
  0xa7   : > { %1608 = vmatpush.bf16.msrb.mxu0 %v1599_v46  ;;  %1633 = vmatpush.bf16.msrb.mxu1 %v1624_v54  ;;  %v452_v56 = vadd.f32 %v448_v48, %v422_v55  ;;  %v2925_v46 = vor.u32 %v3077_v38, %v2924_v37 }
  0xa8   : > { %v1564_v40 = vor.u32 %v1563_v30, %v1559_v29  ;;  %v1669_v48 = vpack.c.b16 %v1668_v43, %v1668_v43 }
  0xa9   : > { %v478_v62 = vadd.f32 %v474_v49, %v452_v56  ;;  %v2956_v49 = vld [vmem:[%s3725_s3 + $0x68] sm:$0x3]  ;;  %v1594_v50 = vrot.slane %v2925_v46, 1 }
  0xaa   : > { %v388_v1 = vpop.f32.mrf.mxu2  ;;  %v420_v2 = vpop.f32.mrf.mxu3  ;;  %v1825_v54 = vand.u32 %v2956_v49, %v3245_v4  ;;  %v1673_v58 = vshll.u32 %v1669_v48, 16  ;;  %v1671_v0 = vshrl.u32 %v1669_v48, 16 }
  0xab   : > { %v450_v5 = vpop.f32.mrf.mxu0  ;;  %v476_v6 = vpop.f32.mrf.mxu1 }
  0xac   : > { %v1675_v1 = vrot.slane %v1673_v58, 1  ;;  %v2960_v5 = vld [vmem:[%s3725_s3 + $0x6c] sm:$0x3]  ;;  %v2969_v6 = vld [vmem:[%s3725_s3 + $0x6e] sm:$0x3] }
  0xad   : > { %v1887_v14 = vand.u32 %v2960_v5, %v3245_v4 }
  0xaf   : > { %2896 = vmatmul.msk.bf16.vlgmr.msrb.gmra.mxu2 %vm316_vm2, %v1420_v3  ;;  %2904 = vmatmul.msk.bf16.vlgmr.msrb.gmra.mxu3 %vm316_vm2, %v1450_v7 }
  0xb0   : > { %1658 = vmatpush.bf16.msrb.mxu2 %v1649_v10  ;;  %1690 = vmatpush.bf16.msrb.mxu3 %v1681_v11  ;;  %v3079_v10 = vld [vmem:[%s3416_s23 + $0x10] sm:$0x10]  ;;  %v1676_v11 = vor.u32 %v1675_v1, %v1671_v0  ;;  %v2995_v0 = vld [vmem:[%s3725_s3 + $0x7a] sm:$0x3]  ;;  %v2963_v1 = vld [vmem:[%s3571_s29] sm:$0xe] }
  0xb2   : > { %v500_v15 = vpop.f32.mrf.mxu2  ;;  %v532_v16 = vpop.f32.mrf.mxu3 }
  0xb3   : > { %v504_v18 = vadd.f32 %v500_v15, %v478_v62  ;;  %v564_v19 = vpop.f32.mrf.mxu0  ;;  %v594_v20 = vpop.f32.mrf.mxu1  ;;  %v1701_v62 = vpack.c.b16 %v1700_v51, %v1700_v51  ;;  %v1912_v15 = vand.u32 %v2969_v6, %v3245_v4 }
  0xb5   : > { %v536_v25 = vadd.f32 %v532_v16, %v504_v18  ;;  %v1705_v3 = vshll.u32 %v1701_v62, 16  ;;  %v1703_v16 = vshrl.u32 %v1701_v62, 16  ;;  %v2946_v18 = vor.u32 %v3079_v10, %v2945_v9  ;;  %v2973_v9 = vld [vmem:[%s3571_s29 + $0xd8] sm:$0xf] }
  0xb6   : > { %2909 = vmatmul.msk.bf16.vlgmr.msra.gmra.mxu0 %vm316_vm2, %v2907_v60  ;;  %2914 = vmatmul.msk.bf16.vlgmr.msra.gmra.mxu1 %vm316_vm2, %v2912_v61  ;;  %v1857_v60 = vand.u32 %v2958_v59, %v3245_v4 }
  0xb7   : > { %1722 = vmatpush.bf16.msra.mxu0 %v1713_v17  ;;  %1752 = vmatpush.bf16.msra.mxu1 %v1743_v24  ;;  %v568_v27 = vadd.f32 %v564_v19, %v536_v25  ;;  %v1707_v17 = vrot.slane %v1705_v3, 1  ;;  %v1761_v19 = vld [vmem:[%s3571_s29] sm:$0xf]  ;;  %v1738_v23 = vrot.slane %v2946_v18, 1  ;;  %v2081_v3 = vand.u32 %v2995_v0, %v3245_v4 }
  0xb8   : > { %v1812_v24 = vunpack.c.l.b16 %v1761_v19 }
  0xb9   : > { %v598_v32 = vadd.f32 %v594_v20, %v568_v27  ;;  %v2953_v20 = vld [vmem:[%s3571_s29 + $0x48] sm:$0xf]  ;;  %v1708_v22 = vor.u32 %v1707_v17, %v1703_v16 }
  0xba   : > { %v502_v35 = vpop.f32.mrf.mxu2  ;;  %v534_v36 = vpop.f32.mrf.mxu3  ;;  %v1844_v25 = vunpack.c.l.b16 %v2953_v20 }
  0xbb   : > { %v566_v41 = vpop.f32.mrf.mxu0  ;;  %v596_v42 = vpop.f32.mrf.mxu1  ;;  %v1813_v35 = vpack.c.b16 %v1812_v24, %v1812_v24 }
  0xbc   : > { %v1845_v36 = vpack.c.b16 %v1844_v25, %v1844_v25  ;;  %v2978_v41 = vld [vmem:[%s3725_s3 + $0x74] sm:$0x3]  ;;  %v2982_v42 = vld [vmem:[%s3725_s3 + $0x76] sm:$0x3]  ;;  %v3003_v25 = vld [vmem:[%s3725_s3 + $0x80] sm:$0x3] }
  0xbd   : > { %v2031_v48 = vand.u32 %v2982_v42, %v3245_v4  ;;  %v1815_v49 = vshrl.u32 %v1813_v35, 16 }
  0xbe   : > { %v1847_v51 = vshrl.u32 %v1845_v36, 16 }
  0xbf   : > { %2916 = vmatmul.msk.bf16.vlgmr.msra.gmra.mxu2 %vm316_vm2, %v1532_v39  ;;  %2918 = vmatmul.msk.bf16.vlgmr.msra.gmra.mxu3 %vm316_vm2, %v1564_v40  ;;  %v1817_v39 = vshll.u32 %v1813_v35, 16  ;;  %v1849_v40 = vshll.u32 %v1845_v36, 16  ;;  %v2985_v35 = vld [vmem:[%s3571_s29 + $0x90] sm:$0xe]  ;;  %v3085_v36 = vld [vmem:[%s3571_s29 + $0x90] sm:$0x10] }
  0xc0   : > { %1777 = vmatpush.bf16.msra.mxu2 %v1768_v44  ;;  %1802 = vmatpush.bf16.msra.mxu3 %v1793_v45  ;;  %v2986_v42 = vor.u32 %v3085_v36, %v2985_v35 }
  0xc2   : > { %v621_v52 = vpop.f32.mrf.mxu2  ;;  %v647_v53 = vpop.f32.mrf.mxu3 }
  0xc3   : > { %v625_v55 = vadd.f32 %v621_v52, %v598_v32  ;;  %v679_v56 = vpop.f32.mrf.mxu0  ;;  %v711_v57 = vpop.f32.mrf.mxu1  ;;  %v2976_v32 = vld [vmem:[%s3725_s3 + $0x72] sm:$0x3]  ;;  %v1851_v52 = vrot.slane %v1849_v40, 1 }
  0xc4   : > { %v1969_v33 = vand.u32 %v2976_v32, %v3245_v4 }
  0xc5   : > { %v651_v61 = vadd.f32 %v647_v53, %v625_v55  ;;  %v2968_v53 = vld [vmem:[%s3571_s29 + $0x90] sm:$0xf] }
  0xc6   : > { %2926 = vmatmul.msk.bf16.vlgmr.msrb.gmra.mxu0 %vm316_vm2, %v1594_v50  ;;  %2930 = vmatmul.msk.bf16.vlgmr.msrb.gmra.mxu1 %vm316_vm2, %v2928_v31  ;;  %v1819_v50 = vrot.slane %v1817_v39, 1 }
  0xc7   : > { %1834 = vmatpush.bf16.msrb.mxu0 %v1825_v54  ;;  %1866 = vmatpush.bf16.msrb.mxu1 %v1857_v60  ;;  %v683_v63 = vadd.f32 %v679_v56, %v651_v61  ;;  %v2990_v54 = vld [vmem:[%s3725_s3 + $0x78] sm:$0x3]  ;;  %v1852_v56 = vor.u32 %v1851_v52, %v1847_v51 }
  0xc8   : > { %v1820_v55 = vor.u32 %v1819_v50, %v1815_v49  ;;  %v2056_v60 = vand.u32 %v2990_v54, %v3245_v4 }
  0xc9   : > { %v715_v2 = vadd.f32 %v711_v57, %v683_v63  ;;  %v1956_v57 = vunpack.c.l.b16 %v2968_v53 }
  0xca   : > { %v623_v7 = vpop.f32.mrf.mxu2  ;;  %v649_v8 = vpop.f32.mrf.mxu3 }
  0xcb   : > { %v681_v12 = vpop.f32.mrf.mxu0  ;;  %v713_v13 = vpop.f32.mrf.mxu1  ;;  %v1957_v6 = vpack.c.b16 %v1956_v57, %v1956_v57 }
  0xcc   : > { %v2997_v12 = vld [vmem:[%s3725_s3 + $0x7c] sm:$0x3]  ;;  %v2999_v13 = vld [vmem:[%s3725_s3 + $0x7e] sm:$0x3] }
  0xcd   : > { %v2145_v21 = vand.u32 %v2999_v13, %v3245_v4 }
  0xcf   : > { %2935 = vmatmul.msk.bf16.vlgmr.msrb.gmra.mxu2 %vm316_vm2, %v2933_v47  ;;  %2937 = vmatmul.msk.bf16.vlgmr.msrb.gmra.mxu3 %vm316_vm2, %v1676_v11  ;;  %v2001_v47 = vand.u32 %v2978_v41, %v3245_v4  ;;  %v1961_v11 = vshll.u32 %v1957_v6, 16 }
  0xd0   : > { %1896 = vmatpush.bf16.msrb.mxu2 %v1887_v14  ;;  %1921 = vmatpush.bf16.msrb.mxu3 %v1912_v15 }
  0xd2   : > { %v741_v26 = vpop.f32.mrf.mxu2  ;;  %v767_v27 = vpop.f32.mrf.mxu3 }
  0xd3   : > { %v745_v29 = vadd.f32 %v741_v26, %v715_v2  ;;  %v793_v30 = vpop.f32.mrf.mxu0  ;;  %v825_v31 = vpop.f32.mrf.mxu1  ;;  %v3082_v2 = vld [vmem:[%s3571_s29] sm:$0x10] }
  0xd4   : > { %v2964_v8 = vor.u32 %v3082_v2, %v2963_v1 }
  0xd5   : > { %v771_v34 = vadd.f32 %v767_v27, %v745_v29  ;;  %v2175_v29 = vand.u32 %v3003_v25, %v3245_v4 }
  0xd6   : > { %2939 = vmatmul.msk.bf16.vlgmr.msra.gmra.mxu0 %vm316_vm2, %v1708_v22  ;;  %2947 = vmatmul.msk.bf16.vlgmr.msra.gmra.mxu1 %vm316_vm2, %v1738_v23  ;;  %v1882_v17 = vrot.slane %v2964_v8, 1  ;;  %v1959_v22 = vshrl.u32 %v1957_v6, 16  ;;  %v1963_v23 = vrot.slane %v1961_v11, 1  ;;  %v3025_v6 = vld [vmem:[%s3725_s3 + $0x8a] sm:$0x3] }
  0xd7   : > { %1946 = vmatpush.bf16.msra.mxu0 %v1937_v28  ;;  %1978 = vmatpush.bf16.msra.mxu1 %v1969_v33  ;;  %v797_v37 = vadd.f32 %v793_v30, %v771_v34  ;;  %v3012_v34 = vld [vmem:[%s3725_s3 + $0x82] sm:$0x3] }
  0xd8   : > { %v1964_v26 = vor.u32 %v1963_v23, %v1959_v22 }
  0xd9   : > { %v829_v38 = vadd.f32 %v825_v31, %v797_v37  ;;  %v2200_v37 = vand.u32 %v3012_v34, %v3245_v4 }
  0xda   : > { %v743_v43 = vpop.f32.mrf.mxu2  ;;  %v769_v44 = vpop.f32.mrf.mxu3 }
  0xdb   : > { %v795_v45 = vpop.f32.mrf.mxu0  ;;  %v827_v46 = vpop.f32.mrf.mxu1  ;;  %v2989_v43 = vld [vmem:[%s3571_s29 + $0x8] sm:$0xf]  ;;  %v2994_v44 = vld [vmem:[%s3571_s29 + $0x50] sm:$0xf] }
  0xdc   : > { %v3017_v46 = vld [vmem:[%s3725_s3 + $0x84] sm:$0x3]  ;;  %v2100_v54 = vunpack.c.l.b16 %v2989_v43 }
  0xdf   : > { %2950 = vmatmul.msk.bf16.vlgmr.msra.gmra.mxu2 %vm316_vm2, %v1761_v19  ;;  %2955 = vmatmul.msk.bf16.vlgmr.msra.gmra.mxu3 %vm316_vm2, %v2953_v20  ;;  %v1988_v19 = vunpack.c.l.b16 %v2973_v9  ;;  %v2113_v20 = vand.u32 %v2997_v12, %v3245_v4 }
  0xe0   : > { %2010 = vmatpush.bf16.msra.mxu2 %v2001_v47  ;;  %2040 = vmatpush.bf16.msra.mxu3 %v2031_v48  ;;  %v3019_v47 = vld [vmem:[%s3725_s3 + $0x86] sm:$0x3] }
  0xe1   : > { %v1989_v24 = vpack.c.b16 %v1988_v19, %v1988_v19  ;;  %v2257_v57 = vand.u32 %v3019_v47, %v3245_v4 }
  0xe2   : > { %v857_v58 = vpop.f32.mrf.mxu2  ;;  %v887_v59 = vpop.f32.mrf.mxu3 }
  0xe3   : > { %v861_v61 = vadd.f32 %v857_v58, %v829_v38  ;;  %v914_v62 = vpop.f32.mrf.mxu0  ;;  %v940_v63 = vpop.f32.mrf.mxu1  ;;  %v1993_v33 = vshll.u32 %v1989_v24, 16  ;;  %v1991_v40 = vshrl.u32 %v1989_v24, 16  ;;  %v2101_v58 = vpack.c.b16 %v2100_v54, %v2100_v54  ;;  %v3028_v54 = vld [vmem:[%s3571_s29 + $0x98] sm:$0xe] }
  0xe5   : > { %v891_v5 = vadd.f32 %v887_v59, %v861_v61  ;;  %v1995_v41 = vrot.slane %v1993_v33, 1 }
  0xe6   : > { %2957 = vmatmul.msk.bf16.vlgmr.msrb.gmra.mxu0 %vm316_vm2, %v1820_v55  ;;  %2959 = vmatmul.msk.bf16.vlgmr.msrb.gmra.mxu1 %vm316_vm2, %v1852_v56  ;;  %v2132_v55 = vunpack.c.l.b16 %v2994_v44  ;;  %v2225_v56 = vand.u32 %v3017_v46, %v3245_v4 }
  0xe7   : > { %2065 = vmatpush.bf16.msrb.mxu0 %v2056_v60  ;;  %2090 = vmatpush.bf16.msrb.mxu1 %v2081_v3  ;;  %v918_v7 = vadd.f32 %v914_v62, %v891_v5  ;;  %v1996_v50 = vor.u32 %v1995_v41, %v1991_v40  ;;  %v3021_v60 = vld [vmem:[%s3725_s3 + $0x88] sm:$0x3]  ;;  %v2105_v3 = vshll.u32 %v2101_v58, 16 }
  0xe8   : > { %v2133_v59 = vpack.c.b16 %v2132_v55, %v2132_v55  ;;  %v3090_v55 = vld [vmem:[%s3571_s29 + $0x98] sm:$0x10] }
  0xe9   : > { %v944_v10 = vadd.f32 %v940_v63, %v918_v7  ;;  %v2289_v63 = vand.u32 %v3021_v60, %v3245_v4  ;;  %v2319_v7 = vand.u32 %v3025_v6, %v3245_v4  ;;  %v2107_v11 = vrot.slane %v2105_v3, 1 }
  0xea   : > { %v859_v14 = vpop.f32.mrf.mxu2  ;;  %v889_v15 = vpop.f32.mrf.mxu3  ;;  %v2137_v5 = vshll.u32 %v2133_v59, 16  ;;  %v2135_v12 = vshrl.u32 %v2133_v59, 16 }
  0xeb   : > { %v916_v16 = vpop.f32.mrf.mxu0  ;;  %v942_v18 = vpop.f32.mrf.mxu1  ;;  %v3011_v14 = vld [vmem:[%s3571_s29 + $0x98] sm:$0xf] }
  0xec   : > { %v2139_v13 = vrot.slane %v2137_v5, 1  ;;  %v3033_v16 = vld [vmem:[%s3725_s3 + $0x8c] sm:$0x3] }
  0xee   : > { %v2140_v23 = vor.u32 %v2139_v13, %v2135_v12 }
  0xef   : > { %2965 = vmatmul.msk.bf16.vlgmr.msrb.gmra.mxu2 %vm316_vm2, %v1882_v17  ;;  %2970 = vmatmul.msk.bf16.vlgmr.msrb.gmra.mxu3 %vm316_vm2, %v2968_v53  ;;  %v2026_v53 = vrot.slane %v2986_v42, 1  ;;  %v3038_v17 = vld [vmem:[%s3725_s3 + $0x8e] sm:$0x3]  ;;  %v3042_v42 = vld [vmem:[%s3725_s3 + $0x92] sm:$0x3] }
  0xf0   : > { %2122 = vmatpush.bf16.msrb.mxu2 %v2113_v20  ;;  %2154 = vmatpush.bf16.msrb.mxu3 %v2145_v21  ;;  %v3006_v20 = vld [vmem:[%s3571_s29 + $0x8] sm:$0xe]  ;;  %v3087_v21 = vld [vmem:[%s3571_s29 + $0x8] sm:$0x10] }
  0xf2   : > { %v972_v27 = vpop.f32.mrf.mxu2  ;;  %v1004_v28 = vpop.f32.mrf.mxu3 }
  0xf3   : > { %v976_v30 = vadd.f32 %v972_v27, %v944_v10  ;;  %v1034_v31 = vpop.f32.mrf.mxu0  ;;  %v1059_v32 = vpop.f32.mrf.mxu1  ;;  %v2344_v27 = vand.u32 %v3033_v16, %v3245_v4 }
  0xf5   : > { %v1008_v38 = vadd.f32 %v1004_v28, %v976_v30  ;;  %v2369_v28 = vand.u32 %v3038_v17, %v3245_v4  ;;  %v3016_v30 = vld [vmem:[%s3571_s29 + $0xe0] sm:$0xf] }
  0xf6   : > { %2975 = vmatmul.msk.bf16.vlgmr.msra.gmra.mxu0 %vm316_vm2, %v2973_v9  ;;  %2977 = vmatmul.msk.bf16.vlgmr.msra.gmra.mxu1 %vm316_vm2, %v1964_v26  ;;  %v2103_v9 = vshrl.u32 %v2101_v58, 16  ;;  %v2244_v26 = vunpack.c.l.b16 %v3011_v14  ;;  %v2276_v34 = vunpack.c.l.b16 %v3016_v30 }
  0xf7   : > { %2184 = vmatpush.bf16.msra.mxu0 %v2175_v29  ;;  %2209 = vmatpush.bf16.msra.mxu1 %v2200_v37  ;;  %v1038_v39 = vadd.f32 %v1034_v31, %v1008_v38  ;;  %v3007_v29 = vor.u32 %v3087_v21, %v3006_v20 }
  0xf8   : > { %v2108_v22 = vor.u32 %v2107_v11, %v2103_v9  ;;  %v2245_v31 = vpack.c.b16 %v2244_v26, %v2244_v26 }
  0xf9   : > { %v1063_v45 = vadd.f32 %v1059_v32, %v1038_v39  ;;  %v3040_v32 = vld [vmem:[%s3725_s3 + $0x90] sm:$0x3]  ;;  %v2170_v33 = vrot.slane %v3007_v29, 1 }
  0xfa   : > { %v974_v48 = vpop.f32.mrf.mxu2  ;;  %v1006_v49 = vpop.f32.mrf.mxu3  ;;  %v2401_v37 = vand.u32 %v3040_v32, %v3245_v4  ;;  %v2249_v41 = vshll.u32 %v2245_v31, 16  ;;  %v2247_v47 = vshrl.u32 %v2245_v31, 16  ;;  %v3049_v32 = vld [vmem:[%s3571_s29 + $0x10] sm:$0xe] }
  0xfb   : > { %v1036_v51 = vpop.f32.mrf.mxu0  ;;  %v1061_v52 = vpop.f32.mrf.mxu1 }
  0xfc   : > { %v2251_v48 = vrot.slane %v2249_v41, 1  ;;  %v3046_v51 = vld [vmem:[%s3725_s3 + $0x94] sm:$0x3] }
  0xfd   : > { %v2463_v59 = vand.u32 %v3046_v51, %v3245_v4 }
  0xff   : > { %2979 = vmatmul.msk.bf16.vlgmr.msra.gmra.mxu2 %vm316_vm2, %v1996_v50  ;;  %2987 = vmatmul.msk.bf16.vlgmr.msra.gmra.mxu3 %vm316_vm2, %v2026_v53 }
 0x100   : > { %2234 = vmatpush.bf16.msra.mxu2 %v2225_v56  ;;  %2266 = vmatpush.bf16.msra.mxu3 %v2257_v57  ;;  %v2252_v56 = vor.u32 %v2251_v48, %v2247_v47 }
 0x102   : > { %v1084_v61 = vpop.f32.mrf.mxu2  ;;  %v1116_v62 = vpop.f32.mrf.mxu3 }
 0x103   : > { %v1088_v0 = vadd.f32 %v1084_v61, %v1063_v45  ;;  %v1148_v1 = vpop.f32.mrf.mxu0  ;;  %v1178_v2 = vpop.f32.mrf.mxu1  ;;  %v2277_v45 = vpack.c.b16 %v2276_v34, %v2276_v34 }
 0x105   : > { %v1120_v8 = vadd.f32 %v1116_v62, %v1088_v0  ;;  %v2281_v50 = vshll.u32 %v2277_v45, 16  ;;  %v2279_v60 = vshrl.u32 %v2277_v45, 16  ;;  %v3029_v62 = vor.u32 %v3090_v55, %v3028_v54  ;;  %v3037_v0 = vld [vmem:[%s3571_s29 + $0x58] sm:$0xf] }
 0x106   : > { %2991 = vmatmul.msk.bf16.vlgmr.msrb.gmra.mxu0 %vm316_vm2, %v2989_v43  ;;  %2996 = vmatmul.msk.bf16.vlgmr.msrb.gmra.mxu1 %vm316_vm2, %v2994_v44  ;;  %v2433_v43 = vand.u32 %v3042_v42, %v3245_v4  ;;  %v2420_v5 = vunpack.c.l.b16 %v3037_v0 }
 0x107   : > { %2298 = vmatpush.bf16.msrb.mxu0 %v2289_v63  ;;  %2328 = vmatpush.bf16.msrb.mxu1 %v2319_v7  ;;  %v1152_v10 = vadd.f32 %v1148_v1, %v1120_v8  ;;  %v2283_v61 = vrot.slane %v2281_v50, 1  ;;  %v3032_v63 = vld [vmem:[%s3571_s29 + $0x10] sm:$0xf] }
 0x108   : > { %v2388_v3 = vunpack.c.l.b16 %v3032_v63  ;;  %v2421_v12 = vpack.c.b16 %v2420_v5, %v2420_v5 }
 0x109   : > { %v1182_v15 = vadd.f32 %v1178_v2, %v1152_v10  ;;  %v2284_v1 = vor.u32 %v2283_v61, %v2279_v60  ;;  %v2314_v2 = vrot.slane %v3029_v62, 1 }
 0x10a   : > { %v1086_v18 = vpop.f32.mrf.mxu2  ;;  %v1118_v19 = vpop.f32.mrf.mxu3  ;;  %v2389_v11 = vpack.c.b16 %v2388_v3, %v2388_v3  ;;  %v2425_v16 = vshll.u32 %v2421_v12, 16 }
 0x10b   : > { %v1150_v24 = vpop.f32.mrf.mxu0  ;;  %v1180_v25 = vpop.f32.mrf.mxu1 }
 0x10c   : > { %v2391_v21 = vshrl.u32 %v2389_v11, 16  ;;  %v2427_v24 = vrot.slane %v2425_v16, 1 }
 0x10f   : > { %2998 = vmatmul.msk.bf16.vlgmr.msrb.gmra.mxu2 %vm316_vm2, %v2108_v22  ;;  %3000 = vmatmul.msk.bf16.vlgmr.msrb.gmra.mxu3 %vm316_vm2, %v2140_v23  ;;  %v2423_v23 = vshrl.u32 %v2421_v12, 16 }
 0x110   : > { %2353 = vmatpush.bf16.msrb.mxu2 %v2344_v27  ;;  %2378 = vmatpush.bf16.msrb.mxu3 %v2369_v28 }
 0x111   : > { %v2428_v26 = vor.u32 %v2427_v24, %v2423_v23 }
 0x112   : > { %v1203_v35 = vpop.f32.mrf.mxu2  ;;  %v1228_v36 = vpop.f32.mrf.mxu3 }
 0x113   : > { %v1207_v38 = vadd.f32 %v1203_v35, %v1182_v15  ;;  %v1260_v39 = vpop.f32.mrf.mxu0  ;;  %v1292_v40 = vpop.f32.mrf.mxu1  ;;  %v2393_v15 = vshll.u32 %v2389_v11, 16 }
 0x115   : > { %v1232_v44 = vadd.f32 %v1228_v36, %v1207_v38  ;;  %v2395_v22 = vrot.slane %v2393_v15, 1 }
 0x116   : > { %3008 = vmatmul.msk.bf16.vlgmr.msra.gmra.mxu0 %vm316_vm2, %v2170_v33  ;;  %3013 = vmatmul.msk.bf16.vlgmr.msra.gmra.mxu1 %vm316_vm2, %v3011_v14  ;;  %v3092_v33 = vld [vmem:[%s3571_s29 + $0x10] sm:$0x10]  ;;  %s3096_s29 = smul.u32 7, %s3742_s16 }
 0x117   : > { %2410 = vmatpush.bf16.msra.mxu0 %v2401_v37  ;;  %2442 = vmatpush.bf16.msra.mxu1 %v2433_v43  ;;  %v1264_v46 = vadd.f32 %v1260_v39, %v1232_v44  ;;  %v2396_v25 = vor.u32 %v2395_v22, %v2391_v21  ;;  %v3050_v36 = vor.u32 %v3092_v33, %v3049_v32 }
 0x118   : > { %s301_s5 = sadd.s32 %s3096_s29, %s3744_s15 }
 0x119   : > { %v1296_v49 = vadd.f32 %v1292_v40, %v1264_v46  ;;  %v2458_v41 = vrot.slane %v3050_v36, 1  ;;  %s2739_s6 = sshll.u32 %s301_s5, 2 }
 0x11a   : > { %v1205_v52 = vpop.f32.mrf.mxu2  ;;  %v1230_v53 = vpop.f32.mrf.mxu3  ;;  %s303_s9 = scalar_lea.vmem %s3726_s4, %s2739_s6 }
 0x11b   : > { %v1262_v57 = vpop.f32.mrf.mxu0  ;;  %v1294_v58 = vpop.f32.mrf.mxu1 }
 0x11f   : > { %3018 = vmatmul.msk.bf16.vlgmr.msra.gmra.mxu2 %vm316_vm2, %v3016_v30  ;;  %3020 = vmatmul.msk.bf16.vlgmr.msra.gmra.mxu3 %vm316_vm2, %v2252_v56 }
 0x120   : > { %2472 = vmatpush.bf16.msra.mxu2 %v2463_v59 }
 0x122   : > { %v1322_v6 = vpop.f32.mrf.mxu2  ;;  %v1347_v7 = vpop.f32.mrf.mxu3 }
 0x123   : > { %v1326_v8 = vadd.f32 %v1322_v6, %v1296_v49  ;;  %v1372_v9 = vpop.f32.mrf.mxu0  ;;  %v1404_v10 = vpop.f32.mrf.mxu1 }
 0x125   : > { %v1351_v4 = vadd.f32 %v1347_v7, %v1326_v8 }
 0x126   : > { %3022 = vmatmul.msk.bf16.vlgmr.msrb.gmra.mxu0 %vm316_vm2, %v2284_v1  ;;  %3030 = vmatmul.msk.bf16.vlgmr.msrb.gmra.mxu1 %vm316_vm2, %v2314_v2 }
 0x127   : > { %v1376_v13 = vadd.f32 %v1372_v9, %v1351_v4 }
 0x129   : > { %v1408_v14 = vadd.f32 %v1404_v10, %v1376_v13 }
 0x12a   : > { %v1324_v17 = vpop.f32.mrf.mxu2  ;;  %v1349_v18 = vpop.f32.mrf.mxu3 }
 0x12b   : > { %v1374_v19 = vpop.f32.mrf.mxu0  ;;  %v1406_v20 = vpop.f32.mrf.mxu1 }
 0x12f   : > { %3034 = vmatmul.msk.bf16.vlgmr.msrb.gmra.mxu2 %vm316_vm2, %v3032_v63  ;;  %3039 = vmatmul.msk.bf16.vlgmr.msrb.gmra.mxu3 %vm316_vm2, %v3037_v0 }
 0x132   : > { %v1436_v27 = vpop.f32.mrf.mxu2  ;;  %v1466_v28 = vpop.f32.mrf.mxu3 }
 0x133   : > { %v1440_v29 = vadd.f32 %v1436_v27, %v1408_v14  ;;  %v1491_v30 = vpop.f32.mrf.mxu0  ;;  %v1516_v31 = vpop.f32.mrf.mxu1 }
 0x135   : > { %v1470_v34 = vadd.f32 %v1466_v28, %v1440_v29 }
 0x136   : > { %3041 = vmatmul.msk.bf16.vlgmr.msra.gmra.mxu0 %vm316_vm2, %v2396_v25  ;;  %3043 = vmatmul.msk.bf16.vlgmr.msra.gmra.mxu1 %vm316_vm2, %v2428_v26 }
 0x137   : > { %v1495_v35 = vadd.f32 %v1491_v30, %v1470_v34 }
 0x139   : > { %v1520_v37 = vadd.f32 %v1516_v31, %v1495_v35 }
 0x13a   : > { %v1438_v38 = vpop.f32.mrf.mxu2  ;;  %v1468_v39 = vpop.f32.mrf.mxu3 }
 0x13b   : > { %v1493_v40 = vpop.f32.mrf.mxu0  ;;  %v1518_v42 = vpop.f32.mrf.mxu1 }
 0x13f   : > { %3051 = vmatmul.msk.bf16.vlgmr.msra.gmra.mxu2 %vm316_vm2, %v2458_v41 }
 0x142   : > { %v1548_v43 = vpop.f32.mrf.mxu2  ;;  %v1580_v44 = vpop.f32.mrf.mxu3 }
 0x143   : > { %v1552_v45 = vadd.f32 %v1548_v43, %v1520_v37  ;;  %v1610_v46 = vpop.f32.mrf.mxu0  ;;  %v1635_v47 = vpop.f32.mrf.mxu1 }
 0x145   : > { %v1584_v48 = vadd.f32 %v1580_v44, %v1552_v45 }
 0x147   : > { %v1614_v49 = vadd.f32 %v1610_v46, %v1584_v48 }
 0x149   : > { %v1639_v50 = vadd.f32 %v1635_v47, %v1614_v49 }
 0x14a   : > { %v1550_v51 = vpop.f32.mrf.mxu2  ;;  %v1582_v52 = vpop.f32.mrf.mxu3 }
 0x14b   : > { %v1612_v53 = vpop.f32.mrf.mxu0  ;;  %v1637_v54 = vpop.f32.mrf.mxu1 }
 0x152   : > { %v1660_v55 = vpop.f32.mrf.mxu2  ;;  %v1692_v56 = vpop.f32.mrf.mxu3 }
 0x153   : > { %v1724_v57 = vpop.f32.mrf.mxu0  ;;  %v1754_v58 = vpop.f32.mrf.mxu1  ;;  %v1664_v63 = vadd.f32 %v1660_v55, %v1639_v50 }
 0x155   : > { %v1696_v5 = vadd.f32 %v1692_v56, %v1664_v63 }
 0x157   : > { %v1728_v6 = vadd.f32 %v1724_v57, %v1696_v5 }
 0x159   : > { %v1758_v4 = vadd.f32 %v1754_v58, %v1728_v6 }
 0x15a   : > { %v1662_v59 = vpop.f32.mrf.mxu2  ;;  %v1694_v60 = vpop.f32.mrf.mxu3 }
 0x15b   : > { %v1726_v61 = vpop.f32.mrf.mxu0  ;;  %v1756_v62 = vpop.f32.mrf.mxu1 }
 0x162   : > { %v1779_v0 = vpop.f32.mrf.mxu2  ;;  %v1804_v1 = vpop.f32.mrf.mxu3 }
 0x163   : > { %v1836_v2 = vpop.f32.mrf.mxu0  ;;  %v1868_v3 = vpop.f32.mrf.mxu1  ;;  %v1783_v11 = vadd.f32 %v1779_v0, %v1758_v4 }
 0x165   : > { %v1808_v14 = vadd.f32 %v1804_v1, %v1783_v11 }
 0x167   : > { %v1840_v17 = vadd.f32 %v1836_v2, %v1808_v14 }
 0x169   : > { %v1872_v20 = vadd.f32 %v1868_v3, %v1840_v17 }
 0x16a   : > { %v1781_v7 = vpop.f32.mrf.mxu2  ;;  %v1806_v8 = vpop.f32.mrf.mxu3 }
 0x16b   : > { %v1838_v9 = vpop.f32.mrf.mxu0  ;;  %v1870_v10 = vpop.f32.mrf.mxu1 }
 0x172   : > { %v1898_v12 = vpop.f32.mrf.mxu2  ;;  %v1923_v13 = vpop.f32.mrf.mxu3 }
 0x173   : > { %v1948_v15 = vpop.f32.mrf.mxu0  ;;  %v1980_v16 = vpop.f32.mrf.mxu1  ;;  %v1902_v23 = vadd.f32 %v1898_v12, %v1872_v20 }
 0x175   : > { %v1927_v24 = vadd.f32 %v1923_v13, %v1902_v23 }
 0x177   : > { %v1952_v29 = vadd.f32 %v1948_v15, %v1927_v24  ;;  %v2486_v15 = vld [vmem:[%s303_s9] sm:$0xf] }
 0x179   : > { %v1984_v30 = vadd.f32 %v1980_v16, %v1952_v29 }
 0x17a   : > { %v1900_v18 = vpop.f32.mrf.mxu2  ;;  %v1925_v19 = vpop.f32.mrf.mxu3 }
 0x17b   : > { %v1950_v21 = vpop.f32.mrf.mxu0  ;;  %v1982_v22 = vpop.f32.mrf.mxu1 }
 0x182   : > { %v2012_v25 = vpop.f32.mrf.mxu2  ;;  %v2042_v26 = vpop.f32.mrf.mxu3 }
 0x183   : > { %v2067_v27 = vpop.f32.mrf.mxu0  ;;  %v2092_v28 = vpop.f32.mrf.mxu1  ;;  %v2016_v33 = vadd.f32 %v2012_v25, %v1984_v30 }
 0x185   : > { %v2046_v36 = vadd.f32 %v2042_v26, %v2016_v33 }
 0x187   : > { %v2071_v39 = vadd.f32 %v2067_v27, %v2046_v36 }
 0x189   : > { %v2096_v42 = vadd.f32 %v2092_v28, %v2071_v39 }
 0x18a   : > { %v2014_v31 = vpop.f32.mrf.mxu2  ;;  %v2044_v32 = vpop.f32.mrf.mxu3 }
 0x18b   : > { %v2069_v34 = vpop.f32.mrf.mxu0  ;;  %v2094_v35 = vpop.f32.mrf.mxu1 }
 0x192   : > { %v2124_v37 = vpop.f32.mrf.mxu2  ;;  %v2156_v38 = vpop.f32.mrf.mxu3 }
 0x193   : > { %v2186_v40 = vpop.f32.mrf.mxu0  ;;  %v2211_v41 = vpop.f32.mrf.mxu1  ;;  %v2128_v43 = vadd.f32 %v2124_v37, %v2096_v42 }
 0x195   : > { %v2160_v48 = vadd.f32 %v2156_v38, %v2128_v43 }
 0x197   : > { %v2190_v49 = vadd.f32 %v2186_v40, %v2160_v48 }
 0x199   : > { %v2215_v54 = vadd.f32 %v2211_v41, %v2190_v49 }
 0x19a   : > { %v2126_v44 = vpop.f32.mrf.mxu2  ;;  %v2158_v45 = vpop.f32.mrf.mxu3 }
 0x19b   : > { %v2188_v46 = vpop.f32.mrf.mxu0  ;;  %v2213_v47 = vpop.f32.mrf.mxu1 }
 0x1a2   : > { %v2236_v50 = vpop.f32.mrf.mxu2  ;;  %v2268_v51 = vpop.f32.mrf.mxu3 }
 0x1a3   : > { %v2300_v52 = vpop.f32.mrf.mxu0  ;;  %v2330_v53 = vpop.f32.mrf.mxu1  ;;  %v2240_v55 = vadd.f32 %v2236_v50, %v2215_v54 }
 0x1a5   : > { %v2272_v58 = vadd.f32 %v2268_v51, %v2240_v55 }
 0x1a7   : > { %v2304_v61 = vadd.f32 %v2300_v52, %v2272_v58 }
 0x1a9   : > { %v2334_v0 = vadd.f32 %v2330_v53, %v2304_v61 }
 0x1aa   : > { %v2238_v56 = vpop.f32.mrf.mxu2  ;;  %v2270_v57 = vpop.f32.mrf.mxu3 }
 0x1ab   : > { %v2302_v59 = vpop.f32.mrf.mxu0  ;;  %v2332_v60 = vpop.f32.mrf.mxu1 }
 0x1b2   : > { %v2355_v62 = vpop.f32.mrf.mxu2  ;;  %v2380_v63 = vpop.f32.mrf.mxu3 }
 0x1b3   : > { %v2412_v1 = vpop.f32.mrf.mxu0  ;;  %v2444_v2 = vpop.f32.mrf.mxu1  ;;  %v2359_v3 = vadd.f32 %v2355_v62, %v2334_v0 }
 0x1b5   : > { %v2384_v5 = vadd.f32 %v2380_v63, %v2359_v3 }
 0x1b7   : > { %v2416_v10 = vadd.f32 %v2412_v1, %v2384_v5 }
 0x1b9   : > { %v2448_v4 = vadd.f32 %v2444_v2, %v2416_v10 }
 0x1ba   : > { %v2357_v6 = vpop.f32.mrf.mxu2  ;;  %v2382_v7 = vpop.f32.mrf.mxu3 }
 0x1bb   : > { %v2414_v8 = vpop.f32.mrf.mxu0  ;;  %v2446_v9 = vpop.f32.mrf.mxu1 }
 0x1c2   : > { %v2474_v11 = vpop.f32.mrf.mxu2 }
 0x1c3   : > { %v2478_v12 = vadd.f32 %v2474_v11, %v2448_v4 }
 0x1c5   : > { %vm2479_vm5 = vcmp.gt.f32.partialorder %v2478_v12, 0.0  ;;  %v2480_v13 = vmul.f32 0.2, %v2478_v12 }
 0x1c7   : > { %v2481_v14 = vsel %vm2479_vm5, %v2478_v12, %v2480_v13 }
 0x1c8   : > { %v2482_v16 = vpack.c.bf16 %v2481_v14, %v2481_v14 }
 0x1ca   : > { %v2487_v17 = vsel %vm2485_vm6, %v2482_v16, %v2486_v15  ;;  %v2476_v18 = vpop.f32.mrf.mxu2 }
 0x1cb   : > { %2488 = vst [vmem:[%s303_s9] sm:$0xf] %v2487_v17 }
 0x1cc PF: > { %s14_s19 = sadd.s32 1, %s3176_s19   ;;  %s3727_s15 = smov %s3168_s17 }
 0x1cd   : > { %p11_p10 = scmp.ge.s32.totalorder %s14_s19, 30   ;;  %s3728_s16 = smov %s3172_s18 }
 0x1ce   : > { %s3729_s17 = smov %s3732_s20  ;;  %s3730_s18 = smov %s3736_s21 }
 0x1cf   :  { %13 = sbr.rel (!%p11_p10) target bundleno = 3 (0x3), region = 179 }

</bundles_post_ra>
